<compile_context>
chip_gen: v5e
topology: v5e:2x2
jax: 0.10.0
libtpu: 0.0.40
codegen_flags: <defaults>
</compile_context>

<pallas_src>
import functools
import math

import jax
import jax.numpy as jnp
from jax.experimental import pallas as pl
from jax.experimental.pallas import tpu as pltpu


# ----------------------------------------------------------------------------
# Fused SpatialBranch kernel (one grid step per batch element)
# ----------------------------------------------------------------------------
def _spatial_branch_kernel(xf_ref, w1_ref, b1_ref,
                           wdw2_ref, wpw2_ref, b2_ref,
                           wdw3_ref, wpw3_ref, b3_ref,
                           wout_ref, bout_ref,
                           o_ref,
                           y1_ref, dw2_ref, y2_ref, dw3_ref,
                           *, H1, W1, H2, H3):
    """All shapes per batch element.

    xf_ref : (H1+3, W1, 16*Cin) bf16   conv1 input, 2x2 space-to-depth folded and
                                        pre-shifted over the 4 folded-column taps.
    w1_ref : (4, 16*Cin, C) bf16        folded conv1 weight (per folded-row tap).
    y1_ref : (H1+1, W1, C) f32          conv1 output (+1 zero halo row on top).
    dw2_ref: (H2*W1, C) f32             conv2 depthwise output at full width.
    y2_ref : (H2+1, W1, C) f32          conv2 output at full width (+ halo row).
    dw3_ref: (H3*W1, C) f32             conv3 depthwise output at full width.
    o_ref  : (H3*W1, Cout) f32          conv_out output at full width (subsampled
                                        to the true stride-2 columns in the wrapper).
    """
    f32, bf16 = jnp.float32, jnp.bfloat16
    C = wpw2_ref.shape[0]
    K1 = xf_ref.shape[-1]
    RB = 4                                   # conv1 output rows per chunk

    # Scratch is uninitialised: zero the halo rows used by the depthwise stages.
    y1_ref[0:1, :, :] = jnp.zeros((1, W1, C), f32)
    y2_ref[0:1, :, :] = jnp.zeros((1, W1, C), f32)

    # -------------------- conv1: 7x7 s2 p3 + BN + ReLU ------------------------
    b1 = b1_ref[...]

    def conv1_chunk(mb, carry):
        h0 = mb * RB
        acc = jnp.zeros((RB * W1, C), f32)
        for dy2 in range(4):                 # 4 folded-row taps, contiguous slabs
            lhs = xf_ref[pl.ds(h0 + dy2, RB), :, :].reshape(RB * W1, K1)
            acc = acc + jnp.dot(lhs, w1_ref[dy2], preferred_element_type=f32)
        y = jnp.maximum(acc + b1, 0.0)
        y1_ref[pl.ds(h0 + 1, RB), :, :] = y.reshape(RB, W1, C)
        return carry

    jax.lax.fori_loop(0, H1 // RB, conv1_chunk, 0)

    # ---------- depthwise 3x3 stride-2 helper (full width, halo in-kernel) ----
    # Output row i of a stride-2 dw conv uses source rows 2i-1..2i+1 which are
    # rows 2i..2i+2 of the halo-padded scratch.  Column taps are derived from one
    # contiguous row slab per (i, dy) with cheap +-`shift` sublane shifts; the
    # stride-2 column subsample happens only at the very end (wrapper).
    def dw_rows(src_ref, dst_ref, wtaps, n_rows, shift):
        zpad = jnp.zeros((shift, C), f32)

        def row(i, carry):
            acc = jnp.zeros((W1, C), f32)
            for dy in range(3):
                s = src_ref[2 * i + dy]                          # (W1, C) slab
                left = jnp.concatenate([zpad, s[:W1 - shift, :]], axis=0)
                right = jnp.concatenate([s[shift:, :], zpad], axis=0)
                acc = (acc
                       + left * wtaps[3 * dy]
                       + s * wtaps[3 * dy + 1]
                       + right * wtaps[3 * dy + 2])
            dst_ref[pl.ds(pl.multiple_of(i * W1, W1), W1), :] = acc
            return carry

        jax.lax.fori_loop(0, n_rows, row, 0)

    # -------------------- conv2: dw 3x3 s2 (no act) + pw 1x1 + ReLU -----------
    w2t = [jnp.broadcast_to(wdw2_ref[t:t + 1, :], (W1, C)) for t in range(9)]
    dw_rows(y1_ref, dw2_ref, w2t, H2, shift=1)

    half2 = (H2 // 2) * W1                    # two chunks -> bounded live vregs
    for mb in range(2):
        d = dw2_ref[mb * half2:(mb + 1) * half2, :]
        y2c = jnp.maximum(
            jnp.dot(d.astype(bf16), wpw2_ref[...], preferred_element_type=f32)
            + b2_ref[...], 0.0)
        y2_ref[1 + mb * (H2 // 2):1 + (mb + 1) * (H2 // 2), :, :] = (
            y2c.reshape(H2 // 2, W1, C))

    # -------------------- conv3: dw 3x3 s2 (no act) + pw 1x1 + ReLU -----------
    # conv3's input lives at the even columns of the full-width y2, so its column
    # neighbours are +-2 in that coordinate system.
    w3t = [jnp.broadcast_to(wdw3_ref[t:t + 1, :], (W1, C)) for t in range(9)]
    dw_rows(y2_ref, dw3_ref, w3t, H3, shift=2)

    # -------------------- conv3 pw + ReLU, then conv_out 1x1 + BN + ReLU ------
    half3 = (H3 // 2) * W1
    for mb in range(2):
        d = dw3_ref[mb * half3:(mb + 1) * half3, :]
        y3c = jnp.maximum(
            jnp.dot(d.astype(bf16), wpw3_ref[...], preferred_element_type=f32)
            + b3_ref[...], 0.0)
        oc = jnp.maximum(
            jnp.dot(y3c.astype(bf16), wout_ref[...], preferred_element_type=f32)
            + bout_ref[...], 0.0)
        o_ref[mb * half3:(mb + 1) * half3, :] = oc


# ----------------------------------------------------------------------------
# Wrapper-side (tiny) data preparation
# ----------------------------------------------------------------------------
def _prep_conv1_input(x):
    """(N,H,W,Cin) f32 -> (N, H//2+3, W//2, 16*Cin) bf16.

    pad 3, 2x2 space-to-depth fold (channel order (py,px,ci)), then pre-shift the
    4 folded-column taps so every in-kernel conv1 slab load is contiguous.
    """
    N, H, W, Cin = x.shape
    xp = jnp.pad(x, ((0, 0), (3, 3), (3, 3), (0, 0)))
    Hf, Wf = (H + 6) // 2, (W + 6) // 2
    xf = xp.reshape(N, Hf, 2, Wf, 2, Cin).transpose(0, 1, 3, 2, 4, 5)
    xf = xf.reshape(N, Hf, Wf, 4 * Cin)
    W1 = W // 2
    xf = jnp.concatenate([xf[:, :, d:d + W1, :] for d in range(4)], axis=-1)
    return xf.astype(jnp.bfloat16)


def _fold_conv1_weight(w):
    """(7,7,Cin,Cout) -> (4, 16*Cin, Cout) matching _prep_conv1_input's layout."""
    _, _, cin, cout = w.shape
    w8 = jnp.pad(w, ((0, 1), (0, 1), (0, 0), (0, 0)))           # zero taps at ky/kx==7
    wf = w8.reshape(4, 2, 4, 2, cin, cout).transpose(0, 2, 1, 3, 4, 5)
    return wf.reshape(4, 16 * cin, cout)


# ----------------------------------------------------------------------------
# Forward pass (matches SpatialBranch.forward, eval-mode BN folded)
# ----------------------------------------------------------------------------
def spatial_branch_forward(params, x_nchw):
    p = params
    x = jnp.transpose(x_nchw, (0, 2, 3, 1)).astype(jnp.float32)   # NCHW -> NHWC
    N, H, W, Cin = x.shape
    assert H % 16 == 0 and W % 8 == 0, (H, W)
    stem = p['conv1_w'].shape[-1]
    outc = p['out_w'].shape[-1]
    H1, W1 = H // 2, W // 2
    H2, H3 = H1 // 2, H1 // 4

    xf = _prep_conv1_input(x)                                      # ~110 KB / image
    w1 = _fold_conv1_weight(p['conv1_w']).astype(jnp.bfloat16)
    b1 = p['conv1_b'].reshape(1, stem).astype(jnp.float32)
    wdw2 = p['conv2_dw_w'].reshape(9, stem).astype(jnp.float32)
    wpw2 = p['conv2_pw_w'].astype(jnp.bfloat16)
    # dw has no activation, so its (BN-folded) bias commutes into the pw bias.
    b2 = (p['conv2_dw_b'] @ p['conv2_pw_w'] + p['conv2_pw_b']
          ).reshape(1, stem).astype(jnp.float32)
    wdw3 = p['conv3_dw_w'].reshape(9, stem).astype(jnp.float32)
    wpw3 = p['conv3_pw_w'].astype(jnp.bfloat16)
    b3 = (p['conv3_dw_b'] @ p['conv3_pw_w'] + p['conv3_pw_b']
          ).reshape(1, stem).astype(jnp.float32)
    wout = p['out_w'].astype(jnp.bfloat16)
    bout = p['out_b'].reshape(1, outc).astype(jnp.float32)

    kernel = functools.partial(_spatial_branch_kernel, H1=H1, W1=W1, H2=H2, H3=H3)
    out = pl.pallas_call(
        kernel,
        out_shape=jax.ShapeDtypeStruct((N, H3 * W1, outc), jnp.float32),
        grid=(N,),
        in_specs=[
            pl.BlockSpec((None, H1 + 3, W1, 16 * Cin), lambda n: (n, 0, 0, 0)),
            pl.BlockSpec((4, 16 * Cin, stem), lambda n: (0, 0, 0)),
            pl.BlockSpec((1, stem), lambda n: (0, 0)),
            pl.BlockSpec((9, stem), lambda n: (0, 0)),
            pl.BlockSpec((stem, stem), lambda n: (0, 0)),
            pl.BlockSpec((1, stem), lambda n: (0, 0)),
            pl.BlockSpec((9, stem), lambda n: (0, 0)),
            pl.BlockSpec((stem, stem), lambda n: (0, 0)),
            pl.BlockSpec((1, stem), lambda n: (0, 0)),
            pl.BlockSpec((stem, outc), lambda n: (0, 0)),
            pl.BlockSpec((1, outc), lambda n: (0, 0)),
        ],
        out_specs=pl.BlockSpec((None, H3 * W1, outc), lambda n: (n, 0, 0)),
        scratch_shapes=[
            pltpu.VMEM((H1 + 1, W1, stem), jnp.float32),   # conv1 out (+halo row)
            pltpu.VMEM((H2 * W1, stem), jnp.float32),      # conv2 dw, full width
            pltpu.VMEM((H2 + 1, W1, stem), jnp.float32),   # conv2 out (+halo row)
            pltpu.VMEM((H3 * W1, stem), jnp.float32),      # conv3 dw, full width
        ],
        compiler_params=pltpu.CompilerParams(
            dimension_semantics=("parallel",)),
    )(xf, w1, b1, wdw2, wpw2, b2, wdw3, wpw3, b3, wout, bout)

    # Keep only the true stride-2 column positions (u = 4j) and go back to NCHW.
    out = out.reshape(N, H3, W1, outc)[:, :, ::4, :]
    return jnp.transpose(out, (0, 3, 1, 2))


# ----------------------------------------------------------------------------
# Parameters (conv + eval-mode BatchNorm folded)
# ----------------------------------------------------------------------------
class ParamRNG:
    def __init__(self, seed=0):
        self._key = jax.random.PRNGKey(seed)
        self._n = 0

    def __call__(self):
        self._n += 1
        return jax.random.fold_in(self._key, self._n)


def make_conv_bn(rng, shape_w, cout, eps=1e-5):
    """Random conv weight (..., cout) with eval-mode BN folded into (w, b)."""
    fan_in = math.prod(shape_w[:-1])
    w = jax.random.normal(rng(), shape_w, jnp.float32) / math.sqrt(fan_in)
    gamma = 1.0 + 0.1 * jax.random.normal(rng(), (cout,), jnp.float32)
    beta = 0.1 * jax.random.normal(rng(), (cout,), jnp.float32)
    mean = 0.05 * jax.random.normal(rng(), (cout,), jnp.float32)
    var = jnp.abs(1.0 + 0.1 * jax.random.normal(rng(), (cout,), jnp.float32))
    scale = gamma / jnp.sqrt(var + eps)
    return w * scale, beta - mean * scale       # ConvModule: bias='auto' -> no conv bias


def build_spatial_branch(rng, in_channels=3, stem_channels=64, out_channels=128):
    p = {}
    p['conv1_w'], p['conv1_b'] = make_conv_bn(
        rng, (7, 7, in_channels, stem_channels), stem_channels)
    for name in ('conv2', 'conv3'):
        p[name + '_dw_w'], p[name + '_dw_b'] = make_conv_bn(
            rng, (3, 3, stem_channels), stem_channels)
        p[name + '_pw_w'], p[name + '_pw_b'] = make_conv_bn(
            rng, (stem_channels, stem_channels), stem_channels)
    p['out_w'], p['out_b'] = make_conv_bn(
        rng, (stem_channels, out_channels), out_channels)
    return p


# ----------------------------------------------------------------------------
# Pure-JAX (f32) reference for correctness checking
# ----------------------------------------------------------------------------
def reference_forward(params, x_nchw):
    p = params
    x = jnp.transpose(x_nchw, (0, 2, 3, 1)).astype(jnp.float32)

    def conv(inp, w, b, stride, pad, groups=1, act='relu'):
        y = jax.lax.conv_general_dilated(
            inp, w, (stride, stride), ((pad, pad), (pad, pad)),
            dimension_numbers=('NHWC', 'HWIO', 'NHWC'),
            feature_group_count=groups)
        y = y + b
        return jnp.maximum(y, 0.0) if act == 'relu' else y

    stem = p['conv1_w'].shape[-1]
    y = conv(x, p['conv1_w'], p['conv1_b'], 2, 3)
    for name in ('conv2', 'conv3'):
        y = conv(y, p[name + '_dw_w'].reshape(3, 3, 1, stem), p[name + '_dw_b'],
                 2, 1, groups=stem, act='linear')
        y = conv(y, p[name + '_pw_w'].reshape(1, 1, stem, stem),
                 p[name + '_pw_b'], 1, 0)
    out = conv(y, p['out_w'].reshape(1, 1, stem, -1), p['out_b'], 1, 0)
    return jnp.transpose(out, (0, 3, 1, 2))


# ----------------------------------------------------------------------------
# main
# ----------------------------------------------------------------------------
if __name__ == "__main__":
    rng = ParamRNG(seed=0)
    params = build_spatial_branch(rng, in_channels=3, stem_channels=64,
                                  out_channels=128)

    x = jax.random.normal(jax.random.PRNGKey(0), (2, 3, 64, 64), jnp.float32)

    fwd = jax.jit(lambda inp: spatial_branch_forward(params, inp))
    out = jax.block_until_ready(fwd(x))

    assert out.shape == (2, 128, 8, 8), out.shape          # stride-8 spatial branch
    assert bool(jnp.all(jnp.isfinite(out)))

    ref = reference_forward(params, x)
    rel_err = float(jnp.linalg.norm(out - ref) / (jnp.linalg.norm(ref) + 1e-12))
    assert rel_err < 0.05, f"relative error too large: {rel_err}"

    print("KERNEL_OK")
</pallas_src>

<mosaic_0001>
module attributes {stable_mosaic.version = 11 : i64} {
  func.func @_spatial_branch_kernel(%arg0: i32, %arg1: memref<1x35x32x48xbf16, #tpu.memory_space<vmem>>, %arg2: memref<4x48x64xbf16, #tpu.memory_space<vmem>>, %arg3: memref<1x64xf32, #tpu.memory_space<vmem>>, %arg4: memref<9x64xf32, #tpu.memory_space<vmem>>, %arg5: memref<64x64xbf16, #tpu.memory_space<vmem>>, %arg6: memref<1x64xf32, #tpu.memory_space<vmem>>, %arg7: memref<9x64xf32, #tpu.memory_space<vmem>>, %arg8: memref<64x64xbf16, #tpu.memory_space<vmem>>, %arg9: memref<1x64xf32, #tpu.memory_space<vmem>>, %arg10: memref<64x128xbf16, #tpu.memory_space<vmem>>, %arg11: memref<1x128xf32, #tpu.memory_space<vmem>>, %arg12: memref<1x256x128xf32, #tpu.memory_space<vmem>>, %arg13: memref<33x32x64xf32, #tpu.memory_space<vmem>>, %arg14: memref<512x64xf32, #tpu.memory_space<vmem>>, %arg15: memref<17x32x64xf32, #tpu.memory_space<vmem>>, %arg16: memref<256x64xf32, #tpu.memory_space<vmem>>) attributes {dimension_semantics = [#tpu.dimension_semantics<parallel>], iteration_bounds = array<i64: 2>, scalar_prefetch = 0 : i64, scratch_operands = 4 : i64, tpu.core_type = #tpu.core_type<tc>, window_params = [{transform_indices = @transform_0, window_bounds = array<i64: 1, 35, 32, 48>}, {pipeline_mode = #tpu.pipeline_mode<synchronous>, transform_indices = @transform_1, window_bounds = array<i64: 4, 48, 64>}, {pipeline_mode = #tpu.pipeline_mode<synchronous>, transform_indices = @transform_2, window_bounds = array<i64: 1, 64>}, {pipeline_mode = #tpu.pipeline_mode<synchronous>, transform_indices = @transform_3, window_bounds = array<i64: 9, 64>}, {pipeline_mode = #tpu.pipeline_mode<synchronous>, transform_indices = @transform_4, window_bounds = array<i64: 64, 64>}, {pipeline_mode = #tpu.pipeline_mode<synchronous>, transform_indices = @transform_5, window_bounds = array<i64: 1, 64>}, {pipeline_mode = #tpu.pipeline_mode<synchronous>, transform_indices = @transform_6, window_bounds = array<i64: 9, 64>}, {pipeline_mode = #tpu.pipeline_mode<synchronous>, transform_indices = @transform_7, window_bounds = array<i64: 64, 64>}, {pipeline_mode = #tpu.pipeline_mode<synchronous>, transform_indices = @transform_8, window_bounds = array<i64: 1, 64>}, {pipeline_mode = #tpu.pipeline_mode<synchronous>, transform_indices = @transform_9, window_bounds = array<i64: 64, 128>}, {pipeline_mode = #tpu.pipeline_mode<synchronous>, transform_indices = @transform_10, window_bounds = array<i64: 1, 128>}, {transform_indices = @transform_11, window_bounds = array<i64: 1, 256, 128>}]} {
    %cst = arith.constant 0.000000e+00 : f32
    %0 = vector.broadcast %cst : f32 to vector<1x32x64xf32>
    %c0 = arith.constant 0 : index
    %c0_0 = arith.constant 0 : index
    %c0_1 = arith.constant 0 : index
    %1 = vector.load %arg13[%c0, %c0_0, %c0_1] : memref<33x32x64xf32, #tpu.memory_space<vmem>>, vector<1x32x64xf32>
    tpu.vector_store %arg13[%c0, %c0_0, %c0_1], %0 {strides = array<i32>} : memref<33x32x64xf32, #tpu.memory_space<vmem>>, vector<1x32x64xf32>,
    %cst_2 = arith.constant 0.000000e+00 : f32
    %2 = vector.broadcast %cst_2 : f32 to vector<1x32x64xf32>
    %c0_3 = arith.constant 0 : index
    %c0_4 = arith.constant 0 : index
    %c0_5 = arith.constant 0 : index
    %3 = vector.load %arg15[%c0_3, %c0_4, %c0_5] : memref<17x32x64xf32, #tpu.memory_space<vmem>>, vector<1x32x64xf32>
    tpu.vector_store %arg15[%c0_3, %c0_4, %c0_5], %2 {strides = array<i32>} : memref<17x32x64xf32, #tpu.memory_space<vmem>>, vector<1x32x64xf32>,
    %c0_6 = arith.constant 0 : index
    %c0_7 = arith.constant 0 : index
    %4 = vector.load %arg3[%c0_6, %c0_7] : memref<1x64xf32, #tpu.memory_space<vmem>>, vector<1x64xf32>
    %c0_i32 = arith.constant 0 : i32
    %c8_i32 = arith.constant 8 : i32
    %5 = arith.addi %c0_i32, %c8_i32 : i32
    %c1_i32 = arith.constant 1 : i32
    scf.for %arg17 = %c0_i32 to %5 step %c1_i32  : i32 {
      %c4_i32 = arith.constant 4 : i32
      %126 = arith.muli %arg17, %c4_i32 : i32
      %cst_99 = arith.constant 0.000000e+00 : f32
      %127 = vector.broadcast %cst_99 : f32 to vector<128x64xf32>
      %c0_i32_100 = arith.constant 0 : i32
      %128 = arith.addi %126, %c0_i32_100 : i32
      %c0_101 = arith.constant 0 : index
      %129 = arith.index_cast %128 : i32 to index
      %c0_102 = arith.constant 0 : index
      %c0_103 = arith.constant 0 : index
      %130 = vector.load %arg1[%c0_101, %129, %c0_102, %c0_103] : memref<1x35x32x48xbf16, #tpu.memory_space<vmem>>, vector<1x4x32x48xbf16>
      %131 = vector.shape_cast %130 : vector<1x4x32x48xbf16> to vector<4x32x48xbf16>
      %132 = vector.shape_cast %131 : vector<4x32x48xbf16> to vector<128x48xbf16>
      %c0_104 = arith.constant 0 : index
      %c0_105 = arith.constant 0 : index
      %c0_106 = arith.constant 0 : index
      %133 = vector.load %arg2[%c0_104, %c0_105, %c0_106] : memref<4x48x64xbf16, #tpu.memory_space<vmem>>, vector<1x48x64xbf16>
      %134 = vector.shape_cast %133 : vector<1x48x64xbf16> to vector<48x64xbf16>
      %cst_107 = arith.constant dense<0.000000e+00> : vector<128x64xf32>
      %135 = tpu.matmul %132, %134, %cst_107 {dimension_numbers = #tpu.dot_dimension_numbers<[1], [0], [0], [1], [0, 0, 1, 1], [], []>} : vector<128x48xbf16>, vector<48x64xbf16>, vector<128x64xf32> -> vector<128x64xf32>
      %136 = arith.addf %127, %135 : vector<128x64xf32>
      %c1_i32_108 = arith.constant 1 : i32
      %137 = arith.addi %126, %c1_i32_108 : i32
      %c0_109 = arith.constant 0 : index
      %138 = arith.index_cast %137 : i32 to index
      %c0_110 = arith.constant 0 : index
      %c0_111 = arith.constant 0 : index
      %139 = vector.load %arg1[%c0_109, %138, %c0_110, %c0_111] : memref<1x35x32x48xbf16, #tpu.memory_space<vmem>>, vector<1x4x32x48xbf16>
      %140 = vector.shape_cast %139 : vector<1x4x32x48xbf16> to vector<4x32x48xbf16>
      %141 = vector.shape_cast %140 : vector<4x32x48xbf16> to vector<128x48xbf16>
      %c1_112 = arith.constant 1 : index
      %c0_113 = arith.constant 0 : index
      %c0_114 = arith.constant 0 : index
      %142 = vector.load %arg2[%c1_112, %c0_113, %c0_114] : memref<4x48x64xbf16, #tpu.memory_space<vmem>>, vector<1x48x64xbf16>
      %143 = vector.shape_cast %142 : vector<1x48x64xbf16> to vector<48x64xbf16>
      %cst_115 = arith.constant dense<0.000000e+00> : vector<128x64xf32>
      %144 = tpu.matmul %141, %143, %cst_115 {dimension_numbers = #tpu.dot_dimension_numbers<[1], [0], [0], [1], [0, 0, 1, 1], [], []>} : vector<128x48xbf16>, vector<48x64xbf16>, vector<128x64xf32> -> vector<128x64xf32>
      %145 = arith.addf %136, %144 : vector<128x64xf32>
      %c2_i32 = arith.constant 2 : i32
      %146 = arith.addi %126, %c2_i32 : i32
      %c0_116 = arith.constant 0 : index
      %147 = arith.index_cast %146 : i32 to index
      %c0_117 = arith.constant 0 : index
      %c0_118 = arith.constant 0 : index
      %148 = vector.load %arg1[%c0_116, %147, %c0_117, %c0_118] : memref<1x35x32x48xbf16, #tpu.memory_space<vmem>>, vector<1x4x32x48xbf16>
      %149 = vector.shape_cast %148 : vector<1x4x32x48xbf16> to vector<4x32x48xbf16>
      %150 = vector.shape_cast %149 : vector<4x32x48xbf16> to vector<128x48xbf16>
      %c2_119 = arith.constant 2 : index
      %c0_120 = arith.constant 0 : index
      %c0_121 = arith.constant 0 : index
      %151 = vector.load %arg2[%c2_119, %c0_120, %c0_121] : memref<4x48x64xbf16, #tpu.memory_space<vmem>>, vector<1x48x64xbf16>
      %152 = vector.shape_cast %151 : vector<1x48x64xbf16> to vector<48x64xbf16>
      %cst_122 = arith.constant dense<0.000000e+00> : vector<128x64xf32>
      %153 = tpu.matmul %150, %152, %cst_122 {dimension_numbers = #tpu.dot_dimension_numbers<[1], [0], [0], [1], [0, 0, 1, 1], [], []>} : vector<128x48xbf16>, vector<48x64xbf16>, vector<128x64xf32> -> vector<128x64xf32>
      %154 = arith.addf %145, %153 : vector<128x64xf32>
      %c3_i32 = arith.constant 3 : i32
      %155 = arith.addi %126, %c3_i32 : i32
      %c0_123 = arith.constant 0 : index
      %156 = arith.index_cast %155 : i32 to index
      %c0_124 = arith.constant 0 : index
      %c0_125 = arith.constant 0 : index
      %157 = vector.load %arg1[%c0_123, %156, %c0_124, %c0_125] : memref<1x35x32x48xbf16, #tpu.memory_space<vmem>>, vector<1x4x32x48xbf16>
      %158 = vector.shape_cast %157 : vector<1x4x32x48xbf16> to vector<4x32x48xbf16>
      %159 = vector.shape_cast %158 : vector<4x32x48xbf16> to vector<128x48xbf16>
      %c3_126 = arith.constant 3 : index
      %c0_127 = arith.constant 0 : index
      %c0_128 = arith.constant 0 : index
      %160 = vector.load %arg2[%c3_126, %c0_127, %c0_128] : memref<4x48x64xbf16, #tpu.memory_space<vmem>>, vector<1x48x64xbf16>
      %161 = vector.shape_cast %160 : vector<1x48x64xbf16> to vector<48x64xbf16>
      %cst_129 = arith.constant dense<0.000000e+00> : vector<128x64xf32>
      %162 = tpu.matmul %159, %161, %cst_129 {dimension_numbers = #tpu.dot_dimension_numbers<[1], [0], [0], [1], [0, 0, 1, 1], [], []>} : vector<128x48xbf16>, vector<48x64xbf16>, vector<128x64xf32> -> vector<128x64xf32>
      %163 = arith.addf %154, %162 : vector<128x64xf32>
      %164 = vector.broadcast %4 : vector<1x64xf32> to vector<128x64xf32>
      %165 = arith.addf %163, %164 : vector<128x64xf32>
      %cst_130 = arith.constant 0.000000e+00 : f32
      %166 = vector.broadcast %cst_130 : f32 to vector<128x64xf32>
      %167 = arith.maximumf %165, %166 : vector<128x64xf32>
      %168 = vector.shape_cast %167 : vector<128x64xf32> to vector<4x32x64xf32>
      %c1_i32_131 = arith.constant 1 : i32
      %169 = arith.addi %126, %c1_i32_131 : i32
      %170 = arith.index_cast %169 : i32 to index
      %c0_132 = arith.constant 0 : index
      %c0_133 = arith.constant 0 : index
      %171 = vector.load %arg13[%170, %c0_132, %c0_133] : memref<33x32x64xf32, #tpu.memory_space<vmem>>, vector<4x32x64xf32>
      tpu.vector_store %arg13[%170, %c0_132, %c0_133], %168 {strides = array<i32>} : memref<33x32x64xf32, #tpu.memory_space<vmem>>, vector<4x32x64xf32>,
    }
    %c8_i32_8 = arith.constant 8 : i32
    %c0_9 = arith.constant 0 : index
    %c0_10 = arith.constant 0 : index
    %6 = vector.load %arg4[%c0_9, %c0_10] : memref<9x64xf32, #tpu.memory_space<vmem>>, vector<1x64xf32>
    %7 = vector.shape_cast %6 : vector<1x64xf32> to vector<1x64xf32>
    %8 = vector.broadcast %7 : vector<1x64xf32> to vector<32x64xf32>
    %c1 = arith.constant 1 : index
    %c0_11 = arith.constant 0 : index
    %9 = vector.load %arg4[%c1, %c0_11] : memref<9x64xf32, #tpu.memory_space<vmem>>, vector<1x64xf32>
    %10 = vector.shape_cast %9 : vector<1x64xf32> to vector<1x64xf32>
    %11 = vector.broadcast %10 : vector<1x64xf32> to vector<32x64xf32>
    %c2 = arith.constant 2 : index
    %c0_12 = arith.constant 0 : index
    %12 = vector.load %arg4[%c2, %c0_12] : memref<9x64xf32, #tpu.memory_space<vmem>>, vector<1x64xf32>
    %13 = vector.shape_cast %12 : vector<1x64xf32> to vector<1x64xf32>
    %14 = vector.broadcast %13 : vector<1x64xf32> to vector<32x64xf32>
    %c3 = arith.constant 3 : index
    %c0_13 = arith.constant 0 : index
    %15 = vector.load %arg4[%c3, %c0_13] : memref<9x64xf32, #tpu.memory_space<vmem>>, vector<1x64xf32>
    %16 = vector.shape_cast %15 : vector<1x64xf32> to vector<1x64xf32>
    %17 = vector.broadcast %16 : vector<1x64xf32> to vector<32x64xf32>
    %c4 = arith.constant 4 : index
    %c0_14 = arith.constant 0 : index
    %18 = vector.load %arg4[%c4, %c0_14] : memref<9x64xf32, #tpu.memory_space<vmem>>, vector<1x64xf32>
    %19 = vector.shape_cast %18 : vector<1x64xf32> to vector<1x64xf32>
    %20 = vector.broadcast %19 : vector<1x64xf32> to vector<32x64xf32>
    %c5 = arith.constant 5 : index
    %c0_15 = arith.constant 0 : index
    %21 = vector.load %arg4[%c5, %c0_15] : memref<9x64xf32, #tpu.memory_space<vmem>>, vector<1x64xf32>
    %22 = vector.shape_cast %21 : vector<1x64xf32> to vector<1x64xf32>
    %23 = vector.broadcast %22 : vector<1x64xf32> to vector<32x64xf32>
    %c6 = arith.constant 6 : index
    %c0_16 = arith.constant 0 : index
    %24 = vector.load %arg4[%c6, %c0_16] : memref<9x64xf32, #tpu.memory_space<vmem>>, vector<1x64xf32>
    %25 = vector.shape_cast %24 : vector<1x64xf32> to vector<1x64xf32>
    %26 = vector.broadcast %25 : vector<1x64xf32> to vector<32x64xf32>
    %c7 = arith.constant 7 : index
    %c0_17 = arith.constant 0 : index
    %27 = vector.load %arg4[%c7, %c0_17] : memref<9x64xf32, #tpu.memory_space<vmem>>, vector<1x64xf32>
    %28 = vector.shape_cast %27 : vector<1x64xf32> to vector<1x64xf32>
    %29 = vector.broadcast %28 : vector<1x64xf32> to vector<32x64xf32>
    %c8 = arith.constant 8 : index
    %c0_18 = arith.constant 0 : index
    %30 = vector.load %arg4[%c8, %c0_18] : memref<9x64xf32, #tpu.memory_space<vmem>>, vector<1x64xf32>
    %31 = vector.shape_cast %30 : vector<1x64xf32> to vector<1x64xf32>
    %32 = vector.broadcast %31 : vector<1x64xf32> to vector<32x64xf32>
    %cst_19 = arith.constant 0.000000e+00 : f32
    %33 = vector.broadcast %cst_19 : f32 to vector<1x64xf32>
    %c0_i32_20 = arith.constant 0 : i32
    %c16_i32 = arith.constant 16 : i32
    %34 = arith.addi %c0_i32_20, %c16_i32 : i32
    %c1_i32_21 = arith.constant 1 : i32
    scf.for %arg17 = %c0_i32_20 to %34 step %c1_i32_21  : i32 {
      %cst_99 = arith.constant 0.000000e+00 : f32
      %126 = vector.broadcast %cst_99 : f32 to vector<32x64xf32>
      %c2_i32 = arith.constant 2 : i32
      %127 = arith.muli %c2_i32, %arg17 : i32
      %c0_i32_100 = arith.constant 0 : i32
      %128 = arith.addi %127, %c0_i32_100 : i32
      %129 = arith.index_cast %128 : i32 to index
      %c0_101 = arith.constant 0 : index
      %c0_102 = arith.constant 0 : index
      %130 = vector.load %arg13[%129, %c0_101, %c0_102] : memref<33x32x64xf32, #tpu.memory_space<vmem>>, vector<1x32x64xf32>
      %131 = vector.shape_cast %130 : vector<1x32x64xf32> to vector<32x64xf32>
      %132 = vector.extract_strided_slice %131 {offsets = [0, 0], sizes = [31, 64], strides = [1, 1]} : vector<32x64xf32> to vector<31x64xf32>
      %133 = tpu.concatenate %33, %132 in 0 : vector<1x64xf32>, vector<31x64xf32> -> vector<32x64xf32>
      %134 = vector.extract_strided_slice %131 {offsets = [1, 0], sizes = [31, 64], strides = [1, 1]} : vector<32x64xf32> to vector<31x64xf32>
      %135 = tpu.concatenate %134, %33 in 0 : vector<31x64xf32>, vector<1x64xf32> -> vector<32x64xf32>
      %136 = arith.mulf %133, %8 : vector<32x64xf32>
      %137 = arith.addf %126, %136 : vector<32x64xf32>
      %138 = arith.mulf %131, %11 : vector<32x64xf32>
      %139 = arith.addf %137, %138 : vector<32x64xf32>
      %140 = arith.mulf %135, %14 : vector<32x64xf32>
      %141 = arith.addf %139, %140 : vector<32x64xf32>
      %c2_i32_103 = arith.constant 2 : i32
      %142 = arith.muli %c2_i32_103, %arg17 : i32
      %c1_i32_104 = arith.constant 1 : i32
      %143 = arith.addi %142, %c1_i32_104 : i32
      %144 = arith.index_cast %143 : i32 to index
      %c0_105 = arith.constant 0 : index
      %c0_106 = arith.constant 0 : index
      %145 = vector.load %arg13[%144, %c0_105, %c0_106] : memref<33x32x64xf32, #tpu.memory_space<vmem>>, vector<1x32x64xf32>
      %146 = vector.shape_cast %145 : vector<1x32x64xf32> to vector<32x64xf32>
      %147 = vector.extract_strided_slice %146 {offsets = [0, 0], sizes = [31, 64], strides = [1, 1]} : vector<32x64xf32> to vector<31x64xf32>
      %148 = tpu.concatenate %33, %147 in 0 : vector<1x64xf32>, vector<31x64xf32> -> vector<32x64xf32>
      %149 = vector.extract_strided_slice %146 {offsets = [1, 0], sizes = [31, 64], strides = [1, 1]} : vector<32x64xf32> to vector<31x64xf32>
      %150 = tpu.concatenate %149, %33 in 0 : vector<31x64xf32>, vector<1x64xf32> -> vector<32x64xf32>
      %151 = arith.mulf %148, %17 : vector<32x64xf32>
      %152 = arith.addf %141, %151 : vector<32x64xf32>
      %153 = arith.mulf %146, %20 : vector<32x64xf32>
      %154 = arith.addf %152, %153 : vector<32x64xf32>
      %155 = arith.mulf %150, %23 : vector<32x64xf32>
      %156 = arith.addf %154, %155 : vector<32x64xf32>
      %c2_i32_107 = arith.constant 2 : i32
      %157 = arith.muli %c2_i32_107, %arg17 : i32
      %c2_i32_108 = arith.constant 2 : i32
      %158 = arith.addi %157, %c2_i32_108 : i32
      %159 = arith.index_cast %158 : i32 to index
      %c0_109 = arith.constant 0 : index
      %c0_110 = arith.constant 0 : index
      %160 = vector.load %arg13[%159, %c0_109, %c0_110] : memref<33x32x64xf32, #tpu.memory_space<vmem>>, vector<1x32x64xf32>
      %161 = vector.shape_cast %160 : vector<1x32x64xf32> to vector<32x64xf32>
      %162 = vector.extract_strided_slice %161 {offsets = [0, 0], sizes = [31, 64], strides = [1, 1]} : vector<32x64xf32> to vector<31x64xf32>
      %163 = tpu.concatenate %33, %162 in 0 : vector<1x64xf32>, vector<31x64xf32> -> vector<32x64xf32>
      %164 = vector.extract_strided_slice %161 {offsets = [1, 0], sizes = [31, 64], strides = [1, 1]} : vector<32x64xf32> to vector<31x64xf32>
      %165 = tpu.concatenate %164, %33 in 0 : vector<31x64xf32>, vector<1x64xf32> -> vector<32x64xf32>
      %166 = arith.mulf %163, %26 : vector<32x64xf32>
      %167 = arith.addf %156, %166 : vector<32x64xf32>
      %168 = arith.mulf %161, %29 : vector<32x64xf32>
      %169 = arith.addf %167, %168 : vector<32x64xf32>
      %170 = arith.mulf %165, %32 : vector<32x64xf32>
      %171 = arith.addf %169, %170 : vector<32x64xf32>
      %c32_i32 = arith.constant 32 : i32
      %172 = arith.muli %arg17, %c32_i32 : i32
      %173 = tpu.assume_multiple %172, 32 : i32
      %174 = arith.index_cast %173 : i32 to index
      %c0_111 = arith.constant 0 : index
      %175 = vector.load %arg14[%174, %c0_111] : memref<512x64xf32, #tpu.memory_space<vmem>>, vector<32x64xf32>
      tpu.vector_store %arg14[%174, %c0_111], %171 {strides = array<i32>} : memref<512x64xf32, #tpu.memory_space<vmem>>, vector<32x64xf32>,
    }
    %c16_i32_22 = arith.constant 16 : i32
    %c0_23 = arith.constant 0 : index
    %c0_24 = arith.constant 0 : index
    %35 = vector.load %arg14[%c0_23, %c0_24] : memref<512x64xf32, #tpu.memory_space<vmem>>, vector<256x64xf32>
    %36 = arith.truncf %35 : vector<256x64xf32> to vector<256x64xbf16>
    %c0_25 = arith.constant 0 : index
    %c0_26 = arith.constant 0 : index
    %37 = vector.load %arg5[%c0_25, %c0_26] : memref<64x64xbf16, #tpu.memory_space<vmem>>, vector<64x64xbf16>
    %cst_27 = arith.constant dense<0.000000e+00> : vector<256x64xf32>
    %38 = tpu.matmul %36, %37, %cst_27 {dimension_numbers = #tpu.dot_dimension_numbers<[1], [0], [0], [1], [0, 0, 1, 1], [], []>} : vector<256x64xbf16>, vector<64x64xbf16>, vector<256x64xf32> -> vector<256x64xf32>
    %c0_28 = arith.constant 0 : index
    %c0_29 = arith.constant 0 : index
    %39 = vector.load %arg6[%c0_28, %c0_29] : memref<1x64xf32, #tpu.memory_space<vmem>>, vector<1x64xf32>
    %40 = vector.broadcast %39 : vector<1x64xf32> to vector<256x64xf32>
    %41 = arith.addf %38, %40 : vector<256x64xf32>
    %cst_30 = arith.constant 0.000000e+00 : f32
    %42 = vector.broadcast %cst_30 : f32 to vector<256x64xf32>
    %43 = arith.maximumf %41, %42 : vector<256x64xf32>
    %44 = vector.shape_cast %43 : vector<256x64xf32> to vector<8x32x64xf32>
    %c1_31 = arith.constant 1 : index
    %c0_32 = arith.constant 0 : index
    %c0_33 = arith.constant 0 : index
    %45 = vector.load %arg15[%c1_31, %c0_32, %c0_33] : memref<17x32x64xf32, #tpu.memory_space<vmem>>, vector<8x32x64xf32>
    tpu.vector_store %arg15[%c1_31, %c0_32, %c0_33], %44 {strides = array<i32>} : memref<17x32x64xf32, #tpu.memory_space<vmem>>, vector<8x32x64xf32>,
    %c256 = arith.constant 256 : index
    %c0_34 = arith.constant 0 : index
    %46 = vector.load %arg14[%c256, %c0_34] : memref<512x64xf32, #tpu.memory_space<vmem>>, vector<256x64xf32>
    %47 = arith.truncf %46 : vector<256x64xf32> to vector<256x64xbf16>
    %c0_35 = arith.constant 0 : index
    %c0_36 = arith.constant 0 : index
    %48 = vector.load %arg5[%c0_35, %c0_36] : memref<64x64xbf16, #tpu.memory_space<vmem>>, vector<64x64xbf16>
    %cst_37 = arith.constant dense<0.000000e+00> : vector<256x64xf32>
    %49 = tpu.matmul %47, %48, %cst_37 {dimension_numbers = #tpu.dot_dimension_numbers<[1], [0], [0], [1], [0, 0, 1, 1], [], []>} : vector<256x64xbf16>, vector<64x64xbf16>, vector<256x64xf32> -> vector<256x64xf32>
    %c0_38 = arith.constant 0 : index
    %c0_39 = arith.constant 0 : index
    %50 = vector.load %arg6[%c0_38, %c0_39] : memref<1x64xf32, #tpu.memory_space<vmem>>, vector<1x64xf32>
    %51 = vector.broadcast %50 : vector<1x64xf32> to vector<256x64xf32>
    %52 = arith.addf %49, %51 : vector<256x64xf32>
    %cst_40 = arith.constant 0.000000e+00 : f32
    %53 = vector.broadcast %cst_40 : f32 to vector<256x64xf32>
    %54 = arith.maximumf %52, %53 : vector<256x64xf32>
    %55 = vector.shape_cast %54 : vector<256x64xf32> to vector<8x32x64xf32>
    %c9 = arith.constant 9 : index
    %c0_41 = arith.constant 0 : index
    %c0_42 = arith.constant 0 : index
    %56 = vector.load %arg15[%c9, %c0_41, %c0_42] : memref<17x32x64xf32, #tpu.memory_space<vmem>>, vector<8x32x64xf32>
    tpu.vector_store %arg15[%c9, %c0_41, %c0_42], %55 {strides = array<i32>} : memref<17x32x64xf32, #tpu.memory_space<vmem>>, vector<8x32x64xf32>,
    %c0_43 = arith.constant 0 : index
    %c0_44 = arith.constant 0 : index
    %57 = vector.load %arg7[%c0_43, %c0_44] : memref<9x64xf32, #tpu.memory_space<vmem>>, vector<1x64xf32>
    %58 = vector.shape_cast %57 : vector<1x64xf32> to vector<1x64xf32>
    %59 = vector.broadcast %58 : vector<1x64xf32> to vector<32x64xf32>
    %c1_45 = arith.constant 1 : index
    %c0_46 = arith.constant 0 : index
    %60 = vector.load %arg7[%c1_45, %c0_46] : memref<9x64xf32, #tpu.memory_space<vmem>>, vector<1x64xf32>
    %61 = vector.shape_cast %60 : vector<1x64xf32> to vector<1x64xf32>
    %62 = vector.broadcast %61 : vector<1x64xf32> to vector<32x64xf32>
    %c2_47 = arith.constant 2 : index
    %c0_48 = arith.constant 0 : index
    %63 = vector.load %arg7[%c2_47, %c0_48] : memref<9x64xf32, #tpu.memory_space<vmem>>, vector<1x64xf32>
    %64 = vector.shape_cast %63 : vector<1x64xf32> to vector<1x64xf32>
    %65 = vector.broadcast %64 : vector<1x64xf32> to vector<32x64xf32>
    %c3_49 = arith.constant 3 : index
    %c0_50 = arith.constant 0 : index
    %66 = vector.load %arg7[%c3_49, %c0_50] : memref<9x64xf32, #tpu.memory_space<vmem>>, vector<1x64xf32>
    %67 = vector.shape_cast %66 : vector<1x64xf32> to vector<1x64xf32>
    %68 = vector.broadcast %67 : vector<1x64xf32> to vector<32x64xf32>
    %c4_51 = arith.constant 4 : index
    %c0_52 = arith.constant 0 : index
    %69 = vector.load %arg7[%c4_51, %c0_52] : memref<9x64xf32, #tpu.memory_space<vmem>>, vector<1x64xf32>
    %70 = vector.shape_cast %69 : vector<1x64xf32> to vector<1x64xf32>
    %71 = vector.broadcast %70 : vector<1x64xf32> to vector<32x64xf32>
    %c5_53 = arith.constant 5 : index
    %c0_54 = arith.constant 0 : index
    %72 = vector.load %arg7[%c5_53, %c0_54] : memref<9x64xf32, #tpu.memory_space<vmem>>, vector<1x64xf32>
    %73 = vector.shape_cast %72 : vector<1x64xf32> to vector<1x64xf32>
    %74 = vector.broadcast %73 : vector<1x64xf32> to vector<32x64xf32>
    %c6_55 = arith.constant 6 : index
    %c0_56 = arith.constant 0 : index
    %75 = vector.load %arg7[%c6_55, %c0_56] : memref<9x64xf32, #tpu.memory_space<vmem>>, vector<1x64xf32>
    %76 = vector.shape_cast %75 : vector<1x64xf32> to vector<1x64xf32>
    %77 = vector.broadcast %76 : vector<1x64xf32> to vector<32x64xf32>
    %c7_57 = arith.constant 7 : index
    %c0_58 = arith.constant 0 : index
    %78 = vector.load %arg7[%c7_57, %c0_58] : memref<9x64xf32, #tpu.memory_space<vmem>>, vector<1x64xf32>
    %79 = vector.shape_cast %78 : vector<1x64xf32> to vector<1x64xf32>
    %80 = vector.broadcast %79 : vector<1x64xf32> to vector<32x64xf32>
    %c8_59 = arith.constant 8 : index
    %c0_60 = arith.constant 0 : index
    %81 = vector.load %arg7[%c8_59, %c0_60] : memref<9x64xf32, #tpu.memory_space<vmem>>, vector<1x64xf32>
    %82 = vector.shape_cast %81 : vector<1x64xf32> to vector<1x64xf32>
    %83 = vector.broadcast %82 : vector<1x64xf32> to vector<32x64xf32>
    %cst_61 = arith.constant 0.000000e+00 : f32
    %84 = vector.broadcast %cst_61 : f32 to vector<2x64xf32>
    %c0_i32_62 = arith.constant 0 : i32
    %c8_i32_63 = arith.constant 8 : i32
    %85 = arith.addi %c0_i32_62, %c8_i32_63 : i32
    %c1_i32_64 = arith.constant 1 : i32
    scf.for %arg17 = %c0_i32_62 to %85 step %c1_i32_64  : i32 {
      %cst_99 = arith.constant 0.000000e+00 : f32
      %126 = vector.broadcast %cst_99 : f32 to vector<32x64xf32>
      %c2_i32 = arith.constant 2 : i32
      %127 = arith.muli %c2_i32, %arg17 : i32
      %c0_i32_100 = arith.constant 0 : i32
      %128 = arith.addi %127, %c0_i32_100 : i32
      %129 = arith.index_cast %128 : i32 to index
      %c0_101 = arith.constant 0 : index
      %c0_102 = arith.constant 0 : index
      %130 = vector.load %arg15[%129, %c0_101, %c0_102] : memref<17x32x64xf32, #tpu.memory_space<vmem>>, vector<1x32x64xf32>
      %131 = vector.shape_cast %130 : vector<1x32x64xf32> to vector<32x64xf32>
      %132 = vector.extract_strided_slice %131 {offsets = [0, 0], sizes = [30, 64], strides = [1, 1]} : vector<32x64xf32> to vector<30x64xf32>
      %133 = tpu.concatenate %84, %132 in 0 : vector<2x64xf32>, vector<30x64xf32> -> vector<32x64xf32>
      %134 = vector.extract_strided_slice %131 {offsets = [2, 0], sizes = [30, 64], strides = [1, 1]} : vector<32x64xf32> to vector<30x64xf32>
      %135 = tpu.concatenate %134, %84 in 0 : vector<30x64xf32>, vector<2x64xf32> -> vector<32x64xf32>
      %136 = arith.mulf %133, %59 : vector<32x64xf32>
      %137 = arith.addf %126, %136 : vector<32x64xf32>
      %138 = arith.mulf %131, %62 : vector<32x64xf32>
      %139 = arith.addf %137, %138 : vector<32x64xf32>
      %140 = arith.mulf %135, %65 : vector<32x64xf32>
      %141 = arith.addf %139, %140 : vector<32x64xf32>
      %c2_i32_103 = arith.constant 2 : i32
      %142 = arith.muli %c2_i32_103, %arg17 : i32
      %c1_i32_104 = arith.constant 1 : i32
      %143 = arith.addi %142, %c1_i32_104 : i32
      %144 = arith.index_cast %143 : i32 to index
      %c0_105 = arith.constant 0 : index
      %c0_106 = arith.constant 0 : index
      %145 = vector.load %arg15[%144, %c0_105, %c0_106] : memref<17x32x64xf32, #tpu.memory_space<vmem>>, vector<1x32x64xf32>
      %146 = vector.shape_cast %145 : vector<1x32x64xf32> to vector<32x64xf32>
      %147 = vector.extract_strided_slice %146 {offsets = [0, 0], sizes = [30, 64], strides = [1, 1]} : vector<32x64xf32> to vector<30x64xf32>
      %148 = tpu.concatenate %84, %147 in 0 : vector<2x64xf32>, vector<30x64xf32> -> vector<32x64xf32>
      %149 = vector.extract_strided_slice %146 {offsets = [2, 0], sizes = [30, 64], strides = [1, 1]} : vector<32x64xf32> to vector<30x64xf32>
      %150 = tpu.concatenate %149, %84 in 0 : vector<30x64xf32>, vector<2x64xf32> -> vector<32x64xf32>
      %151 = arith.mulf %148, %68 : vector<32x64xf32>
      %152 = arith.addf %141, %151 : vector<32x64xf32>
      %153 = arith.mulf %146, %71 : vector<32x64xf32>
      %154 = arith.addf %152, %153 : vector<32x64xf32>
      %155 = arith.mulf %150, %74 : vector<32x64xf32>
      %156 = arith.addf %154, %155 : vector<32x64xf32>
      %c2_i32_107 = arith.constant 2 : i32
      %157 = arith.muli %c2_i32_107, %arg17 : i32
      %c2_i32_108 = arith.constant 2 : i32
      %158 = arith.addi %157, %c2_i32_108 : i32
      %159 = arith.index_cast %158 : i32 to index
      %c0_109 = arith.constant 0 : index
      %c0_110 = arith.constant 0 : index
      %160 = vector.load %arg15[%159, %c0_109, %c0_110] : memref<17x32x64xf32, #tpu.memory_space<vmem>>, vector<1x32x64xf32>
      %161 = vector.shape_cast %160 : vector<1x32x64xf32> to vector<32x64xf32>
      %162 = vector.extract_strided_slice %161 {offsets = [0, 0], sizes = [30, 64], strides = [1, 1]} : vector<32x64xf32> to vector<30x64xf32>
      %163 = tpu.concatenate %84, %162 in 0 : vector<2x64xf32>, vector<30x64xf32> -> vector<32x64xf32>
      %164 = vector.extract_strided_slice %161 {offsets = [2, 0], sizes = [30, 64], strides = [1, 1]} : vector<32x64xf32> to vector<30x64xf32>
      %165 = tpu.concatenate %164, %84 in 0 : vector<30x64xf32>, vector<2x64xf32> -> vector<32x64xf32>
      %166 = arith.mulf %163, %77 : vector<32x64xf32>
      %167 = arith.addf %156, %166 : vector<32x64xf32>
      %168 = arith.mulf %161, %80 : vector<32x64xf32>
      %169 = arith.addf %167, %168 : vector<32x64xf32>
      %170 = arith.mulf %165, %83 : vector<32x64xf32>
      %171 = arith.addf %169, %170 : vector<32x64xf32>
      %c32_i32 = arith.constant 32 : i32
      %172 = arith.muli %arg17, %c32_i32 : i32
      %173 = tpu.assume_multiple %172, 32 : i32
      %174 = arith.index_cast %173 : i32 to index
      %c0_111 = arith.constant 0 : index
      %175 = vector.load %arg16[%174, %c0_111] : memref<256x64xf32, #tpu.memory_space<vmem>>, vector<32x64xf32>
      tpu.vector_store %arg16[%174, %c0_111], %171 {strides = array<i32>} : memref<256x64xf32, #tpu.memory_space<vmem>>, vector<32x64xf32>,
    }
    %c8_i32_65 = arith.constant 8 : i32
    %c0_66 = arith.constant 0 : index
    %c0_67 = arith.constant 0 : index
    %86 = vector.load %arg16[%c0_66, %c0_67] : memref<256x64xf32, #tpu.memory_space<vmem>>, vector<128x64xf32>
    %87 = arith.truncf %86 : vector<128x64xf32> to vector<128x64xbf16>
    %c0_68 = arith.constant 0 : index
    %c0_69 = arith.constant 0 : index
    %88 = vector.load %arg8[%c0_68, %c0_69] : memref<64x64xbf16, #tpu.memory_space<vmem>>, vector<64x64xbf16>
    %cst_70 = arith.constant dense<0.000000e+00> : vector<128x64xf32>
    %89 = tpu.matmul %87, %88, %cst_70 {dimension_numbers = #tpu.dot_dimension_numbers<[1], [0], [0], [1], [0, 0, 1, 1], [], []>} : vector<128x64xbf16>, vector<64x64xbf16>, vector<128x64xf32> -> vector<128x64xf32>
    %c0_71 = arith.constant 0 : index
    %c0_72 = arith.constant 0 : index
    %90 = vector.load %arg9[%c0_71, %c0_72] : memref<1x64xf32, #tpu.memory_space<vmem>>, vector<1x64xf32>
    %91 = vector.broadcast %90 : vector<1x64xf32> to vector<128x64xf32>
    %92 = arith.addf %89, %91 : vector<128x64xf32>
    %cst_73 = arith.constant 0.000000e+00 : f32
    %93 = vector.broadcast %cst_73 : f32 to vector<128x64xf32>
    %94 = arith.maximumf %92, %93 : vector<128x64xf32>
    %95 = arith.truncf %94 : vector<128x64xf32> to vector<128x64xbf16>
    %c0_74 = arith.constant 0 : index
    %c0_75 = arith.constant 0 : index
    %96 = vector.load %arg10[%c0_74, %c0_75] : memref<64x128xbf16, #tpu.memory_space<vmem>>, vector<64x128xbf16>
    %cst_76 = arith.constant dense<0.000000e+00> : vector<128x128xf32>
    %97 = tpu.matmul %95, %96, %cst_76 {dimension_numbers = #tpu.dot_dimension_numbers<[1], [0], [0], [1], [0, 0, 1, 1], [], []>} : vector<128x64xbf16>, vector<64x128xbf16>, vector<128x128xf32> -> vector<128x128xf32>
    %c0_77 = arith.constant 0 : index
    %c0_78 = arith.constant 0 : index
    %98 = vector.load %arg11[%c0_77, %c0_78] : memref<1x128xf32, #tpu.memory_space<vmem>>, vector<1x128xf32>
    %99 = vector.broadcast %98 : vector<1x128xf32> to vector<128x128xf32>
    %100 = arith.addf %97, %99 : vector<128x128xf32>
    %cst_79 = arith.constant 0.000000e+00 : f32
    %101 = vector.broadcast %cst_79 : f32 to vector<128x128xf32>
    %102 = arith.maximumf %100, %101 : vector<128x128xf32>
    %c0_80 = arith.constant 0 : index
    %c0_81 = arith.constant 0 : index
    %c0_82 = arith.constant 0 : index
    %103 = vector.load %arg12[%c0_80, %c0_81, %c0_82] : memref<1x256x128xf32, #tpu.memory_space<vmem>>, vector<1x128x128xf32>
    %104 = vector.shape_cast %103 : vector<1x128x128xf32> to vector<128x128xf32>
    %105 = vector.shape_cast %102 : vector<128x128xf32> to vector<1x128x128xf32>
    tpu.vector_store %arg12[%c0_80, %c0_81, %c0_82], %105 {strides = array<i32>} : memref<1x256x128xf32, #tpu.memory_space<vmem>>, vector<1x128x128xf32>,
    %c128 = arith.constant 128 : index
    %c0_83 = arith.constant 0 : index
    %106 = vector.load %arg16[%c128, %c0_83] : memref<256x64xf32, #tpu.memory_space<vmem>>, vector<128x64xf32>
    %107 = arith.truncf %106 : vector<128x64xf32> to vector<128x64xbf16>
    %c0_84 = arith.constant 0 : index
    %c0_85 = arith.constant 0 : index
    %108 = vector.load %arg8[%c0_84, %c0_85] : memref<64x64xbf16, #tpu.memory_space<vmem>>, vector<64x64xbf16>
    %cst_86 = arith.constant dense<0.000000e+00> : vector<128x64xf32>
    %109 = tpu.matmul %107, %108, %cst_86 {dimension_numbers = #tpu.dot_dimension_numbers<[1], [0], [0], [1], [0, 0, 1, 1], [], []>} : vector<128x64xbf16>, vector<64x64xbf16>, vector<128x64xf32> -> vector<128x64xf32>
    %c0_87 = arith.constant 0 : index
    %c0_88 = arith.constant 0 : index
    %110 = vector.load %arg9[%c0_87, %c0_88] : memref<1x64xf32, #tpu.memory_space<vmem>>, vector<1x64xf32>
    %111 = vector.broadcast %110 : vector<1x64xf32> to vector<128x64xf32>
    %112 = arith.addf %109, %111 : vector<128x64xf32>
    %cst_89 = arith.constant 0.000000e+00 : f32
    %113 = vector.broadcast %cst_89 : f32 to vector<128x64xf32>
    %114 = arith.maximumf %112, %113 : vector<128x64xf32>
    %115 = arith.truncf %114 : vector<128x64xf32> to vector<128x64xbf16>
    %c0_90 = arith.constant 0 : index
    %c0_91 = arith.constant 0 : index
    %116 = vector.load %arg10[%c0_90, %c0_91] : memref<64x128xbf16, #tpu.memory_space<vmem>>, vector<64x128xbf16>
    %cst_92 = arith.constant dense<0.000000e+00> : vector<128x128xf32>
    %117 = tpu.matmul %115, %116, %cst_92 {dimension_numbers = #tpu.dot_dimension_numbers<[1], [0], [0], [1], [0, 0, 1, 1], [], []>} : vector<128x64xbf16>, vector<64x128xbf16>, vector<128x128xf32> -> vector<128x128xf32>
    %c0_93 = arith.constant 0 : index
    %c0_94 = arith.constant 0 : index
    %118 = vector.load %arg11[%c0_93, %c0_94] : memref<1x128xf32, #tpu.memory_space<vmem>>, vector<1x128xf32>
    %119 = vector.broadcast %118 : vector<1x128xf32> to vector<128x128xf32>
    %120 = arith.addf %117, %119 : vector<128x128xf32>
    %cst_95 = arith.constant 0.000000e+00 : f32
    %121 = vector.broadcast %cst_95 : f32 to vector<128x128xf32>
    %122 = arith.maximumf %120, %121 : vector<128x128xf32>
    %c0_96 = arith.constant 0 : index
    %c128_97 = arith.constant 128 : index
    %c0_98 = arith.constant 0 : index
    %123 = vector.load %arg12[%c0_96, %c128_97, %c0_98] : memref<1x256x128xf32, #tpu.memory_space<vmem>>, vector<1x128x128xf32>
    %124 = vector.shape_cast %123 : vector<1x128x128xf32> to vector<128x128xf32>
    %125 = vector.shape_cast %122 : vector<128x128xf32> to vector<1x128x128xf32>
    tpu.vector_store %arg12[%c0_96, %c128_97, %c0_98], %125 {strides = array<i32>} : memref<1x256x128xf32, #tpu.memory_space<vmem>>, vector<1x128x128xf32>,
    return
  }
  func.func @transform_0(%arg0: i32) -> (i32, i32, i32, i32) {
    %c0_i32 = arith.constant 0 : i32
    %c0_i32_0 = arith.constant 0 : i32
    %c0_i32_1 = arith.constant 0 : i32
    %c0_i32_2 = arith.constant 0 : i32
    return %arg0, %c0_i32, %c0_i32_0, %c0_i32_1 : i32, i32, i32, i32
  }
  func.func @transform_1(%arg0: i32) -> (i32, i32, i32) {
    %c0_i32 = arith.constant 0 : i32
    %c0_i32_0 = arith.constant 0 : i32
    %c0_i32_1 = arith.constant 0 : i32
    %c0_i32_2 = arith.constant 0 : i32
    return %c0_i32, %c0_i32_0, %c0_i32_1 : i32, i32, i32
  }
  func.func @transform_2(%arg0: i32) -> (i32, i32) {
    %c0_i32 = arith.constant 0 : i32
    %c0_i32_0 = arith.constant 0 : i32
    %c0_i32_1 = arith.constant 0 : i32
    return %c0_i32, %c0_i32_0 : i32, i32
  }
  func.func @transform_3(%arg0: i32) -> (i32, i32) {
    %c0_i32 = arith.constant 0 : i32
    %c0_i32_0 = arith.constant 0 : i32
    %c0_i32_1 = arith.constant 0 : i32
    return %c0_i32, %c0_i32_0 : i32, i32
  }
  func.func @transform_4(%arg0: i32) -> (i32, i32) {
    %c0_i32 = arith.constant 0 : i32
    %c0_i32_0 = arith.constant 0 : i32
    %c0_i32_1 = arith.constant 0 : i32
    return %c0_i32, %c0_i32_0 : i32, i32
  }
  func.func @transform_5(%arg0: i32) -> (i32, i32) {
    %c0_i32 = arith.constant 0 : i32
    %c0_i32_0 = arith.constant 0 : i32
    %c0_i32_1 = arith.constant 0 : i32
    return %c0_i32, %c0_i32_0 : i32, i32
  }
  func.func @transform_6(%arg0: i32) -> (i32, i32) {
    %c0_i32 = arith.constant 0 : i32
    %c0_i32_0 = arith.constant 0 : i32
    %c0_i32_1 = arith.constant 0 : i32
    return %c0_i32, %c0_i32_0 : i32, i32
  }
  func.func @transform_7(%arg0: i32) -> (i32, i32) {
    %c0_i32 = arith.constant 0 : i32
    %c0_i32_0 = arith.constant 0 : i32
    %c0_i32_1 = arith.constant 0 : i32
    return %c0_i32, %c0_i32_0 : i32, i32
  }
  func.func @transform_8(%arg0: i32) -> (i32, i32) {
    %c0_i32 = arith.constant 0 : i32
    %c0_i32_0 = arith.constant 0 : i32
    %c0_i32_1 = arith.constant 0 : i32
    return %c0_i32, %c0_i32_0 : i32, i32
  }
  func.func @transform_9(%arg0: i32) -> (i32, i32) {
    %c0_i32 = arith.constant 0 : i32
    %c0_i32_0 = arith.constant 0 : i32
    %c0_i32_1 = arith.constant 0 : i32
    return %c0_i32, %c0_i32_0 : i32, i32
  }
  func.func @transform_10(%arg0: i32) -> (i32, i32) {
    %c0_i32 = arith.constant 0 : i32
    %c0_i32_0 = arith.constant 0 : i32
    %c0_i32_1 = arith.constant 0 : i32
    return %c0_i32, %c0_i32_0 : i32, i32
  }
  func.func @transform_11(%arg0: i32) -> (i32, i32, i32) {
    %c0_i32 = arith.constant 0 : i32
    %c0_i32_0 = arith.constant 0 : i32
    %c0_i32_1 = arith.constant 0 : i32
    return %arg0, %c0_i32, %c0_i32_0 : i32, i32, i32
  }
}

</mosaic_0001>

<bundles_post_ra>
// kernel: _lambda_.1
= control target key start
LH: loop header
LB: loop body
LE: loop exit
PB: predicated region body
PF: predicated region fallthrough
CT: control target
= control target key end

     0   :  { %s3552_s17 = smov 0   ;;  %s4462_s0 = inlined_call_operand.vmem [shape: bf16[2,35,32,48], index: 0, kind: input, shape index: {}]   ;;  %s4463_s1 = inlined_call_operand.vmem [shape: bf16[4,48,64], index: 1, kind: input, shape index: {}]   ;;  %s4464_s2 = inlined_call_operand.vmem [shape: f32[1,64], index: 2, kind: input, shape index: {}]   ;;  %s4465_s3 = inlined_call_operand.vmem [shape: f32[9,64], index: 3, kind: input, shape index: {}]   ;;  %s4466_s4 = inlined_call_operand.vmem [shape: bf16[64,64], index: 4, kind: input, shape index: {}]   ;;  %s4467_s5 = inlined_call_operand.vmem [shape: f32[1,64], index: 5, kind: input, shape index: {}]   ;;  %s4468_s6 = inlined_call_operand.vmem [shape: f32[9,64], index: 6, kind: input, shape index: {}]   ;;  %s4469_s7 = inlined_call_operand.vmem [shape: bf16[64,64], index: 7, kind: input, shape index: {}]   ;;  %s4470_s8 = inlined_call_operand.vmem [shape: f32[1,64], index: 8, kind: input, shape index: {}]   ;;  %s4471_s9 = inlined_call_operand.vmem [shape: bf16[64,128], index: 9, kind: input, shape index: {}]   ;;  %s4472_s10 = inlined_call_operand.vmem [shape: f32[1,128], index: 10, kind: input, shape index: {}]   ;;  %s4473_s11 = inlined_call_operand.vmem [shape: f32[2,256,128], index: 11, kind: output, shape index: {}]  }
   0x1 LB: > { %s2819_s18 = sadd.s32 4294967295, %s3477_s17   ;;  %p2823_p0 = scmp.ge.s32.totalorder %s3477_s17, 1  ;;  %s3477_s17 = sphi %s3552_s17, %s21_s17  }
   0x2   : > { %p337_p1 = scmp.lt.s32.totalorder %s3477_s17, 3 }
   0x4   : > { %p338_p2 = pnand %p2823_p0, %p337_p1 }
   0x5   : > { %p377_p3 = scmp.lt.s32.totalorder (!%p338_p2), %s2819_s18, 1  ;;  %s3583_s29 = smov (!%p338_p2), 0  }
   0x6   : > { %341 = sbr.rel (%p338_p2) target bundleno = 1319 (0x527), region = 64 }
   0xb   : > { %vm388_vm0 = vcmask 523264   ;;  %v3563_v0 = vld [vmem:[%s4464_s2] sm:$0x1]  ;;  %v3491_v1 = vmov 0.0   ;;  %s4475_s18 = smov (!%p377_p3, %s2819_s18), 1 }
   0xc   : > { %389 = vst.msk [vmem:[#allocation2] sm:$0xff] %vm388_vm0, %v3491_v1  ;;  %s3401_s21 = smul.u32 560, %s4475_s18  ;;  %s3320_s22 = sshll.u32 %s4475_s18, 8 }
   0xd   : > { %390 = vst.msk [vmem:[#allocation2 + $0x8] sm:$0xff] %vm388_vm0, %v3491_v1  ;;  %s3572_s25 = scalar_lea.vmem %s4473_s11, %s3320_s22 }
   0xe   : > { %391 = vst.msk [vmem:[#allocation2 + $0x10] sm:$0xff] %vm388_vm0, %v3491_v1  ;;  %s3578_s28 = scalar_lea.vmem %s4462_s0, %s3401_s21 }
   0xf   : > { %392 = vst.msk [vmem:[#allocation2 + $0x18] sm:$0xff] %vm388_vm0, %v3491_v1 }
  0x10   : > { %393 = vst.msk [vmem:[#allocation4] sm:$0xff] %vm388_vm0, %v3491_v1 }
  0x11   : > { %394 = vst.msk [vmem:[#allocation4 + $0x8] sm:$0xff] %vm388_vm0, %v3491_v1 }
  0x12   : > { %395 = vst.msk [vmem:[#allocation4 + $0x10] sm:$0xff] %vm388_vm0, %v3491_v1 }
  0x13   : > { %396 = vst.msk [vmem:[#allocation4 + $0x18] sm:$0xff] %vm388_vm0, %v3491_v1 }
  0x14 LB: >> { %v3345_v2 = vld [vmem:[%s4463_s1 + $0x28] sm:$0xff]  ;;  %v3333_v3 = vld [vmem:[%s4463_s1 + $0x10] sm:$0xff]  ;;  %v3357_v4 = vld [vmem:[%s4463_s1 + $0x40] sm:$0xff]  ;;  %s3322_s12 = sshll.u32 %s3481_s29, 6  ;;  %vm515_vm1 = vcmask 392192   ;;  %v3693_v52 = vperm.slane %v3563_v0, 0  ;;  %s3481_s29 = sphi %s3583_s29, %s403_s29  }
  0x15   : >> { %v3369_v5 = vld [vmem:[%s4463_s1 + $0x58] sm:$0xff]  ;;  %545 = vmatpush.bf16.msra.mxu0 %v3345_v2  ;;  %676 = vmatpush.bf16.msra.mxu1 %v3333_v3  ;;  %v3344_v6 = vld [vmem:[%s4463_s1 + $0x20] sm:$0xff]  ;;  %v3332_v7 = vld [vmem:[%s4463_s1 + $0x8] sm:$0xff]  ;;  %s3620_s18 = scalar_lea.vmem %s3578_s28, %s3322_s12  ;;  %s3370_s23 = sshll.u32 %s3481_s29, 7 }
  0x16   : >> { %834 = vmatpush.bf16.msra.mxu2 %v3357_v4  ;;  %1008 = vmatpush.bf16.msra.mxu3 %v3369_v5  ;;  %v3356_v8 = vld [vmem:[%s4463_s1 + $0x38] sm:$0xff]  ;;  %v3368_v9 = vld [vmem:[%s4463_s1 + $0x50] sm:$0xff]  ;;  %v3331_v11 = vld [vmem:[%s4463_s1] sm:$0xff]  ;;  %s3697_s24 = scalar_lea.vmem [#allocation2], %s3370_s23  ;;  %s403_s29 = sadd.s32 1, %s3481_s29  }
  0x17   : >> { %v3343_v10 = vld [vmem:[%s4463_s1 + $0x18] sm:$0xff]  ;;  %v3355_v12 = vld [vmem:[%s4463_s1 + $0x30] sm:$0xff]  ;;  %v3367_v13 = vld [vmem:[%s4463_s1 + $0x48] sm:$0xff]  ;;  %p400_p4 = scmp.ge.s32.totalorder %s403_s29, 8  }
  0x18   : >> { %v3335_v14 = vld [vmem:[%s3620_s18 + $0x10] sm:$0xff]  ;;  %v3323_v15 = vld [vmem:[%s3620_s18] sm:$0xff]  ;;  %v3336_v18 = vld [vmem:[%s3620_s18 + $0x18] sm:$0xff]  ;;  %s3794_s27 = smov (%p400_p4), 0  }
  0x19   : >> { %546 = vmatpush.bf16.msra.mxu0 %v3344_v6  ;;  %677 = vmatpush.bf16.msra.mxu1 %v3332_v7  ;;  %v3347_v16 = vld [vmem:[%s3620_s18 + $0x20] sm:$0xff]  ;;  %v3359_v17 = vld [vmem:[%s3620_s18 + $0x30] sm:$0xff]  ;;  %v3324_v19 = vld [vmem:[%s3620_s18 + $0x8] sm:$0xff] }
  0x1a   : >> { %835 = vmatpush.bf16.msra.mxu2 %v3356_v8  ;;  %1009 = vmatpush.bf16.msra.mxu3 %v3368_v9  ;;  %v3348_v20 = vld [vmem:[%s3620_s18 + $0x28] sm:$0xff]  ;;  %v3360_v21 = vld [vmem:[%s3620_s18 + $0x38] sm:$0xff]  ;;  %v3337_v22 = vld [vmem:[%s3620_s18 + $0x20] sm:$0xff] }
  0x1b   : >> { %v3325_v23 = vld [vmem:[%s3620_s18 + $0x10] sm:$0xff]  ;;  %v3361_v25 = vld [vmem:[%s3620_s18 + $0x40] sm:$0xff]  ;;  %v3338_v26 = vld [vmem:[%s3620_s18 + $0x28] sm:$0xff] }
  0x1c   : >> { %v3349_v24 = vld [vmem:[%s3620_s18 + $0x30] sm:$0xff]  ;;  %v3326_v27 = vld [vmem:[%s3620_s18 + $0x18] sm:$0xff]  ;;  %v3362_v29 = vld [vmem:[%s3620_s18 + $0x48] sm:$0xff] }
  0x1d   : >> { %547 = vmatpush.bf16.msra.mxu0 %v3343_v10  ;;  %678 = vmatpush.bf16.msra.mxu1 %v3331_v11  ;;  %v3350_v28 = vld [vmem:[%s3620_s18 + $0x38] sm:$0xff]  ;;  %v3339_v30 = vld [vmem:[%s3620_s18 + $0x30] sm:$0xff]  ;;  %v3327_v31 = vld [vmem:[%s3620_s18 + $0x20] sm:$0xff] }
  0x1e   : >> { %836 = vmatpush.bf16.msra.mxu2 %v3355_v12  ;;  %1010 = vmatpush.bf16.msra.mxu3 %v3367_v13  ;;  %v3351_v32 = vld [vmem:[%s3620_s18 + $0x40] sm:$0xff]  ;;  %v3363_v33 = vld [vmem:[%s3620_s18 + $0x50] sm:$0xff]  ;;  %v3340_v34 = vld [vmem:[%s3620_s18 + $0x38] sm:$0xff] }
  0x1f   : >> { %v3328_v35 = vld [vmem:[%s3620_s18 + $0x28] sm:$0xff]  ;;  %v3364_v37 = vld [vmem:[%s3620_s18 + $0x58] sm:$0xff]  ;;  %v3341_v38 = vld [vmem:[%s3620_s18 + $0x40] sm:$0xff] }
  0x20   : >> { %2898 = vmatmul.msk.bf16.vlgmr.msra.gmra.mxu0 %vm515_vm1, %v3335_v14  ;;  %2950 = vmatmul.msk.bf16.vlgmr.msra.gmra.mxu1 %vm515_vm1, %v3323_v15  ;;  %v3352_v36 = vld [vmem:[%s3620_s18 + $0x48] sm:$0xff]  ;;  %v3329_v39 = vld [vmem:[%s3620_s18 + $0x30] sm:$0xff]  ;;  %v3365_v41 = vld [vmem:[%s3620_s18 + $0x60] sm:$0xff] }
  0x21   : >> { %3026 = vmatmul.msk.bf16.vlgmr.msra.gmra.mxu2 %vm515_vm1, %v3347_v16  ;;  %3102 = vmatmul.msk.bf16.vlgmr.msra.gmra.mxu3 %vm515_vm1, %v3359_v17  ;;  %v3353_v40 = vld [vmem:[%s3620_s18 + $0x50] sm:$0xff]  ;;  %v3342_v42 = vld [vmem:[%s3620_s18 + $0x48] sm:$0xff]  ;;  %v3330_v43 = vld [vmem:[%s3620_s18 + $0x38] sm:$0xff] }
  0x22   : >> { %v3354_v44 = vld [vmem:[%s3620_s18 + $0x58] sm:$0xff]  ;;  %v3366_v45 = vld [vmem:[%s3620_s18 + $0x68] sm:$0xff]  ;;  %v3772_v0 = vld [vmem:[%s4465_s3 + $0x4] ss:$0 sm:$0xff] (%p400_p4) }
  0x30   : >> { %2899 = vmatmul.msk.bf16.gmra.mxu0 %vm515_vm1, %v3336_v18  ;;  %2951 = vmatmul.msk.bf16.gmra.mxu1 %vm515_vm1, %v3324_v19 }
  0x31   : >> { %3027 = vmatmul.msk.bf16.gmra.mxu2 %vm515_vm1, %v3348_v20  ;;  %3103 = vmatmul.msk.bf16.gmra.mxu3 %vm515_vm1, %v3360_v21 }
  0x40   : >> { %2900 = vmatmul.msk.bf16.gmra.mxu0 %vm515_vm1, %v3337_v22  ;;  %2952 = vmatmul.msk.bf16.gmra.mxu1 %vm515_vm1, %v3325_v23 }
  0x41   : >> { %3028 = vmatmul.msk.bf16.gmra.mxu2 %vm515_vm1, %v3349_v24  ;;  %3104 = vmatmul.msk.bf16.gmra.mxu3 %vm515_vm1, %v3361_v25 }
  0x50   : >> { %2901 = vmatmul.msk.bf16.gmra.mxu0 %vm515_vm1, %v3338_v26  ;;  %2953 = vmatmul.msk.bf16.gmra.mxu1 %vm515_vm1, %v3326_v27 }
  0x51   : >> { %3029 = vmatmul.msk.bf16.gmra.mxu2 %vm515_vm1, %v3350_v28  ;;  %3105 = vmatmul.msk.bf16.gmra.mxu3 %vm515_vm1, %v3362_v29 }
  0x60   : >> { %2902 = vmatmul.msk.bf16.gmra.mxu0 %vm515_vm1, %v3339_v30  ;;  %2954 = vmatmul.msk.bf16.gmra.mxu1 %vm515_vm1, %v3327_v31 }
  0x61   : >> { %3030 = vmatmul.msk.bf16.gmra.mxu2 %vm515_vm1, %v3351_v32  ;;  %3106 = vmatmul.msk.bf16.gmra.mxu3 %vm515_vm1, %v3363_v33 }
  0x70   : >> { %2903 = vmatmul.msk.bf16.gmra.mxu0 %vm515_vm1, %v3340_v34  ;;  %2955 = vmatmul.msk.bf16.gmra.mxu1 %vm515_vm1, %v3328_v35 }
  0x71   : >> { %3031 = vmatmul.msk.bf16.gmra.mxu2 %vm515_vm1, %v3352_v36  ;;  %3107 = vmatmul.msk.bf16.gmra.mxu3 %vm515_vm1, %v3364_v37 }
  0x80   : >> { %2904 = vmatmul.msk.bf16.gmra.mxu0 %vm515_vm1, %v3341_v38  ;;  %2956 = vmatmul.msk.bf16.gmra.mxu1 %vm515_vm1, %v3329_v39 }
  0x81   : >> { %3032 = vmatmul.msk.bf16.gmra.mxu2 %vm515_vm1, %v3353_v40  ;;  %3108 = vmatmul.msk.bf16.gmra.mxu3 %vm515_vm1, %v3365_v41 }
  0x90   : >> { %2905 = vmatmul.msk.bf16.gmra.mxu0 %vm515_vm1, %v3342_v42  ;;  %2957 = vmatmul.msk.bf16.gmra.mxu1 %vm515_vm1, %v3330_v43 }
  0x91   : >> { %3033 = vmatmul.msk.bf16.gmra.mxu2 %vm515_vm1, %v3354_v44  ;;  %3109 = vmatmul.msk.bf16.gmra.mxu3 %vm515_vm1, %v3366_v45 }
  0x9d   : >> { %v549_v46 = vpop.f32.mrf.mxu0  ;;  %v680_v47 = vpop.f32.mrf.mxu1 }
  0x9e   : >> { %v681_v48 = vadd.f32 %v680_v47, %v549_v46 }
  0xa4   : >> { %v838_v49 = vpop.f32.mrf.mxu2  ;;  %v1012_v50 = vpop.f32.mrf.mxu3 }
  0xa5   : >> { %v878_v51 = vadd.f32 %v838_v49, %v681_v48  ;;  %v551_v53 = vpop.f32.mrf.mxu0  ;;  %v682_v54 = vpop.f32.mrf.mxu1 }
  0xa6   : >> { %v683_v58 = vadd.f32 %v682_v54, %v551_v53 }
  0xa7   : >> { %v1052_v55 = vadd.f32 %v1012_v50, %v878_v51 }
  0xa9   : >> { %v1071_v56 = vadd.f32 %v3693_v52, %v1052_v55 }
  0xab   : >> { %v1087_v57 = vmax.f32 %v1071_v56, 0.0 }
  0xac   : >> { %v840_v59 = vpop.f32.mrf.mxu2  ;;  %v1014_v60 = vpop.f32.mrf.mxu3 }
  0xad   : >> { %3112 = vst.msk [vmem:[%s3697_s24 + $0x20] sm:$0xff] %vm388_vm0, %v1087_v57  ;;  %v879_v61 = vadd.f32 %v840_v59, %v683_v58  ;;  %v554_v62 = vpop.f32.mrf.mxu0  ;;  %v685_v63 = vpop.f32.mrf.mxu1 }
  0xae   : >> { %v686_v3 = vadd.f32 %v685_v63, %v554_v62 }
  0xaf   : >> { %v1053_v1 = vadd.f32 %v1014_v60, %v879_v61 }
  0xb1   : >> { %v1072_v2 = vadd.f32 %v3693_v52, %v1053_v1 }
  0xb3   : >> { %v1088_v4 = vmax.f32 %v1072_v2, 0.0 }
  0xb4   : >> { %v843_v5 = vpop.f32.mrf.mxu2  ;;  %v1017_v6 = vpop.f32.mrf.mxu3 }
  0xb5   : >> { %3113 = vst.msk [vmem:[%s3697_s24 + $0x28] sm:$0xff] %vm388_vm0, %v1088_v4  ;;  %v880_v7 = vadd.f32 %v843_v5, %v686_v3  ;;  %v556_v8 = vpop.f32.mrf.mxu0  ;;  %v687_v9 = vpop.f32.mrf.mxu1 }
  0xb6   : >> { %v688_v13 = vadd.f32 %v687_v9, %v556_v8 }
  0xb7   : >> { %v1054_v10 = vadd.f32 %v1017_v6, %v880_v7 }
  0xb9   : >> { %v1073_v11 = vadd.f32 %v3693_v52, %v1054_v10 }
  0xbb   : >> { %v1089_v12 = vmax.f32 %v1073_v11, 0.0 }
  0xbc   : >> { %v845_v14 = vpop.f32.mrf.mxu2  ;;  %v1019_v15 = vpop.f32.mrf.mxu3 }
  0xbd   : >> { %3114 = vst.msk [vmem:[%s3697_s24 + $0x30] sm:$0xff] %vm388_vm0, %v1089_v12  ;;  %v881_v16 = vadd.f32 %v845_v14, %v688_v13  ;;  %v559_v17 = vpop.f32.mrf.mxu0  ;;  %v690_v18 = vpop.f32.mrf.mxu1 }
  0xbe   : >> { %v691_v21 = vadd.f32 %v690_v18, %v559_v17 }
  0xbf   : >> { %v1055_v19 = vadd.f32 %v1019_v15, %v881_v16 }
  0xc1   : >> { %v1074_v20 = vadd.f32 %v3693_v52, %v1055_v19 }
  0xc3   : >> { %v1090_v22 = vmax.f32 %v1074_v20, 0.0 }
  0xc4   : >> { %v848_v23 = vpop.f32.mrf.mxu2  ;;  %v1022_v24 = vpop.f32.mrf.mxu3 }
  0xc5   : >> { %3115 = vst.msk [vmem:[%s3697_s24 + $0x38] sm:$0xff] %vm388_vm0, %v1090_v22  ;;  %v882_v25 = vadd.f32 %v848_v23, %v691_v21  ;;  %v561_v26 = vpop.f32.mrf.mxu0  ;;  %v692_v27 = vpop.f32.mrf.mxu1 }
  0xc6   : >> { %v693_v31 = vadd.f32 %v692_v27, %v561_v26 }
  0xc7   : >> { %v1056_v28 = vadd.f32 %v1022_v24, %v882_v25 }
  0xc9   : >> { %v1075_v29 = vadd.f32 %v3693_v52, %v1056_v28 }
  0xcb   : >> { %v1091_v30 = vmax.f32 %v1075_v29, 0.0 }
  0xcc   : >> { %v850_v32 = vpop.f32.mrf.mxu2  ;;  %v1024_v33 = vpop.f32.mrf.mxu3 }
  0xcd   : >> { %3116 = vst.msk [vmem:[%s3697_s24 + $0x40] sm:$0xff] %vm388_vm0, %v1091_v30  ;;  %v883_v34 = vadd.f32 %v850_v32, %v693_v31  ;;  %v564_v35 = vpop.f32.mrf.mxu0  ;;  %v695_v36 = vpop.f32.mrf.mxu1 }
  0xce   : >> { %v696_v39 = vadd.f32 %v695_v36, %v564_v35 }
  0xcf   : >> { %v1057_v37 = vadd.f32 %v1024_v33, %v883_v34 }
  0xd1   : >> { %v1076_v38 = vadd.f32 %v3693_v52, %v1057_v37 }
  0xd3   : >> { %v1092_v40 = vmax.f32 %v1076_v38, 0.0 }
  0xd4   : >> { %v853_v41 = vpop.f32.mrf.mxu2  ;;  %v1027_v42 = vpop.f32.mrf.mxu3 }
  0xd5   : >> { %3117 = vst.msk [vmem:[%s3697_s24 + $0x48] sm:$0xff] %vm388_vm0, %v1092_v40  ;;  %v884_v43 = vadd.f32 %v853_v41, %v696_v39  ;;  %v566_v44 = vpop.f32.mrf.mxu0  ;;  %v697_v45 = vpop.f32.mrf.mxu1 }
  0xd6   : >> { %v698_v49 = vadd.f32 %v697_v45, %v566_v44 }
  0xd7   : >> { %v1058_v46 = vadd.f32 %v1027_v42, %v884_v43 }
  0xd9   : >> { %v1077_v47 = vadd.f32 %v3693_v52, %v1058_v46 }
  0xdb   : >> { %v1093_v48 = vmax.f32 %v1077_v47, 0.0 }
  0xdc   : >> { %v855_v50 = vpop.f32.mrf.mxu2  ;;  %v1029_v51 = vpop.f32.mrf.mxu3 }
  0xdd   : >> { %3118 = vst.msk [vmem:[%s3697_s24 + $0x50] sm:$0xff] %vm388_vm0, %v1093_v48  ;;  %v885_v53 = vadd.f32 %v855_v50, %v698_v49  ;;  %v569_v54 = vpop.f32.mrf.mxu0  ;;  %v700_v55 = vpop.f32.mrf.mxu1 }
  0xde   : >> { %v701_v58 = vadd.f32 %v700_v55, %v569_v54 }
  0xdf   : >> { %v1059_v56 = vadd.f32 %v1029_v51, %v885_v53 }
  0xe1   : >> { %v1078_v57 = vadd.f32 %v3693_v52, %v1059_v56 }
  0xe3   : >> { %v1094_v59 = vmax.f32 %v1078_v57, 0.0 }
  0xe4   : >> { %v858_v60 = vpop.f32.mrf.mxu2  ;;  %v1032_v61 = vpop.f32.mrf.mxu3 }
  0xe5   : >> { %3119 = vst.msk [vmem:[%s3697_s24 + $0x58] sm:$0xff] %vm388_vm0, %v1094_v59  ;;  %v886_v62 = vadd.f32 %v858_v60, %v701_v58  ;;  %v571_v63 = vpop.f32.mrf.mxu0  ;;  %v702_v1 = vpop.f32.mrf.mxu1 }
  0xe6   : >> { %v703_v5 = vadd.f32 %v702_v1, %v571_v63 }
  0xe7   : >> { %v1060_v2 = vadd.f32 %v1032_v61, %v886_v62 }
  0xe9   : >> { %v1079_v3 = vadd.f32 %v3693_v52, %v1060_v2 }
  0xeb   : >> { %v1095_v4 = vmax.f32 %v1079_v3, 0.0 }
  0xec   : >> { %v860_v6 = vpop.f32.mrf.mxu2  ;;  %v1034_v7 = vpop.f32.mrf.mxu3 }
  0xed   : >> { %3120 = vst.msk [vmem:[%s3697_s24 + $0x60] sm:$0xff] %vm388_vm0, %v1095_v4  ;;  %v887_v8 = vadd.f32 %v860_v6, %v703_v5  ;;  %v574_v9 = vpop.f32.mrf.mxu0  ;;  %v705_v10 = vpop.f32.mrf.mxu1  ;;  %v3752_v4 = vld [vmem:[%s4465_s3] ss:$0 sm:$0xff] (%p400_p4)  ;;  %v3757_v5 = vld [vmem:[%s4465_s3 + $0x1] ss:$0 sm:$0xff] (%p400_p4) }
  0xee   : >> { %v706_v13 = vadd.f32 %v705_v10, %v574_v9  ;;  %v3767_v6 = vld [vmem:[%s4465_s3 + $0x3] ss:$0 sm:$0xff] (%p400_p4)  ;;  %v3787_v9 = vld [vmem:[%s4465_s3 + $0x7] ss:$0 sm:$0xff] (%p400_p4)  ;;  %v3792_v10 = vld [vmem:[%s4465_s3 + $0x8] ss:$0 sm:$0xff] (%p400_p4) }
  0xef   : >> { %v1061_v11 = vadd.f32 %v1034_v7, %v887_v8  ;;  %v3777_v7 = vld [vmem:[%s4465_s3 + $0x5] ss:$0 sm:$0xff] (%p400_p4)  ;;  %v3782_v8 = vld [vmem:[%s4465_s3 + $0x6] ss:$0 sm:$0xff] (%p400_p4) }
  0xf1   : >> { %v1080_v12 = vadd.f32 %v3693_v52, %v1061_v11 }
  0xf3   : >> { %v1096_v14 = vmax.f32 %v1080_v12, 0.0 }
  0xf4   : >> { %v863_v15 = vpop.f32.mrf.mxu2  ;;  %v1037_v16 = vpop.f32.mrf.mxu3 }
  0xf5   : >> { %3121 = vst.msk [vmem:[%s3697_s24 + $0x68] sm:$0xff] %vm388_vm0, %v1096_v14  ;;  %v888_v17 = vadd.f32 %v863_v15, %v706_v13  ;;  %v576_v18 = vpop.f32.mrf.mxu0  ;;  %v707_v19 = vpop.f32.mrf.mxu1 }
  0xf6   : >> { %v708_v23 = vadd.f32 %v707_v19, %v576_v18 }
  0xf7   : >> { %v1062_v20 = vadd.f32 %v1037_v16, %v888_v17 }
  0xf9   : >> { %v1081_v21 = vadd.f32 %v3693_v52, %v1062_v20 }
  0xfb   : >> { %v1097_v22 = vmax.f32 %v1081_v21, 0.0 }
  0xfc   : >> { %v865_v24 = vpop.f32.mrf.mxu2  ;;  %v1039_v25 = vpop.f32.mrf.mxu3 }
  0xfd   : >> { %3122 = vst.msk [vmem:[%s3697_s24 + $0x70] sm:$0xff] %vm388_vm0, %v1097_v22  ;;  %v889_v26 = vadd.f32 %v865_v24, %v708_v23  ;;  %v579_v27 = vpop.f32.mrf.mxu0  ;;  %v710_v28 = vpop.f32.mrf.mxu1 }
  0xfe   : >> { %v711_v31 = vadd.f32 %v710_v28, %v579_v27 }
  0xff   : >> { %v1063_v29 = vadd.f32 %v1039_v25, %v889_v26 }
 0x101   : >> { %v1082_v30 = vadd.f32 %v3693_v52, %v1063_v29 }
 0x103   : >> { %v1098_v32 = vmax.f32 %v1082_v30, 0.0 }
 0x104   : >> { %v868_v33 = vpop.f32.mrf.mxu2  ;;  %v1042_v34 = vpop.f32.mrf.mxu3 }
 0x105   : >> { %3123 = vst.msk [vmem:[%s3697_s24 + $0x78] sm:$0xff] %vm388_vm0, %v1098_v32  ;;  %v890_v35 = vadd.f32 %v868_v33, %v711_v31  ;;  %v581_v36 = vpop.f32.mrf.mxu0  ;;  %v712_v37 = vpop.f32.mrf.mxu1 }
 0x106   : >> { %v713_v41 = vadd.f32 %v712_v37, %v581_v36 }
 0x107   : >> { %v1064_v38 = vadd.f32 %v1042_v34, %v890_v35 }
 0x109   : >> { %v1083_v39 = vadd.f32 %v3693_v52, %v1064_v38 }
 0x10b   : >> { %v1099_v40 = vmax.f32 %v1083_v39, 0.0 }
 0x10c   : >> { %v870_v42 = vpop.f32.mrf.mxu2  ;;  %v1044_v43 = vpop.f32.mrf.mxu3 }
 0x10d   : >> { %3124 = vst.msk [vmem:[%s3697_s24 + $0x80] sm:$0xff] %vm388_vm0, %v1099_v40  ;;  %v891_v44 = vadd.f32 %v870_v42, %v713_v41  ;;  %v584_v45 = vpop.f32.mrf.mxu0  ;;  %v715_v46 = vpop.f32.mrf.mxu1 }
 0x10e   : >> { %v716_v49 = vadd.f32 %v715_v46, %v584_v45 }
 0x10f   : >> { %v1065_v47 = vadd.f32 %v1044_v43, %v891_v44 }
 0x111   : >> { %v1084_v48 = vadd.f32 %v3693_v52, %v1065_v47 }
 0x113   : >> { %v1100_v50 = vmax.f32 %v1084_v48, 0.0 }
 0x114   : >> { %v873_v51 = vpop.f32.mrf.mxu2  ;;  %v1047_v53 = vpop.f32.mrf.mxu3 }
 0x115   : >> { %3125 = vst.msk [vmem:[%s3697_s24 + $0x88] sm:$0xff] %vm388_vm0, %v1100_v50  ;;  %v892_v54 = vadd.f32 %v873_v51, %v716_v49  ;;  %v586_v56 = vpop.f32.mrf.mxu0  ;;  %v717_v57 = vpop.f32.mrf.mxu1 }
 0x116   : >> { %v718_v60 = vadd.f32 %v717_v57, %v586_v56 }
 0x117   : >> { %v1066_v55 = vadd.f32 %v1047_v53, %v892_v54 }
 0x119   : >> { %v1085_v58 = vadd.f32 %v3693_v52, %v1066_v55 }
 0x11b   : >> { %v1101_v59 = vmax.f32 %v1085_v58, 0.0 }
 0x11c   : >> { %v875_v61 = vpop.f32.mrf.mxu2  ;;  %v1049_v63 = vpop.f32.mrf.mxu3 }
 0x11d   : >> { %3126 = vst.msk [vmem:[%s3697_s24 + $0x90] sm:$0xff] %vm388_vm0, %v1101_v59  ;;  %v893_v62 = vadd.f32 %v875_v61, %v718_v60 }
 0x11f   : >> { %v1067_v1 = vadd.f32 %v1049_v63, %v893_v62 }
 0x121   : >> { %v1086_v2 = vadd.f32 %v3693_v52, %v1067_v1  ;;  %402 = sbr.rel (!%p400_p4) target bundleno = 20 (0x14), region = 133  ;;  %v3762_v52 = vld [vmem:[%s4465_s3 + $0x2] ss:$0 sm:$0xff] (%p400_p4) }
 0x123   : >> { %v1102_v3 = vmax.f32 %v1086_v2, 0.0 }
 0x125   : >> { %3127 = vst.msk [vmem:[%s3697_s24 + $0x98] sm:$0xff] %vm388_vm0, %v1102_v3 }
 0x126 LB: >> { %s3371_s30 = sshll.u32 %s3485_s27, 6  ;;  %vm1156_vm2 = vcmask 1040384   ;;  %vm1169_vm3 = vcmask 1046528   ;;  %s3142_s13 = sshll.u32 %s3485_s27, 5  ;;  %s3485_s27 = sphi %s3794_s27, %s1144_s27  }
 0x127   : >> { %s3800_s12 = scalar_lea.vmem [#allocation2], %s3371_s30  ;;  %s3885_s14 = scalar_lea.vmem [#allocation3], %s3142_s13 }
 0x128   : >> { %s1144_s27 = sadd.s32 1, %s3485_s27  }
 0x129   : >> { %p1141_p5 = scmp.ge.s32.totalorder %s1144_s27, 16  }
 0x12a   : > { %s4157_s18 = smov (%p1141_p5), 0  }
 0x12c   : >> { %v1148_v11 = vld [vmem:[%s3800_s12] sm:$0xff]  ;;  %v3804_v12 = vld [vmem:[%s3800_s12 + $0x8] sm:$0xff]  ;;  %v3828_v37 = vld [vmem:[%s3800_s12 + $0x10] sm:$0xff] }
 0x12d   : >> { %v3132_v13 = vld [vmem:[%s3800_s12 + $0x20] sm:$0xff]  ;;  %v1157_v14 = vrot.slane %v1148_v11, 7  ;;  %v1170_v15 = vrot.slane %v1148_v11, 1  ;;  %v1171_v16 = vrot.slane %v3804_v12, 1  ;;  %v3809_v17 = vld [vmem:[%s3800_s12 + $0x28] sm:$0xff]  ;;  %v1190_v19 = vmul.f32 %v3757_v5, %v1148_v11  ;;  %v3836_v42 = vld [vmem:[%s3800_s12 + $0x30] sm:$0xff] }
 0x12e   : >> { %v3138_v18 = vld [vmem:[%s3800_s12 + $0x40] sm:$0xff]  ;;  %v1217_v20 = vrot.slane %v3132_v13, 7  ;;  %v1229_v21 = vrot.slane %v3132_v13, 1  ;;  %v1230_v22 = vrot.slane %v3809_v17, 1  ;;  %v3821_v30 = vld [vmem:[%s3800_s12 + $0x48] sm:$0xff]  ;;  %v1249_v36 = vmul.f32 %v3772_v0, %v3132_v13  ;;  %v3850_v57 = vld [vmem:[%s3800_s12 + $0x50] sm:$0xff] }
 0x12f   : >> { %v1168_v23 = vsel %vm1156_vm2, 0.0, %v1157_v14  ;;  %v1172_v24 = vsel %vm1169_vm3, %v1170_v15, %v1171_v16  ;;  %v1276_v25 = vrot.slane %v3138_v18, 7  ;;  %v1288_v32 = vrot.slane %v3138_v18, 1  ;;  %v1151_v62 = vld [vmem:[%s3800_s12 + $0x18] sm:$0xff] }
 0x130   : >> { %v1182_v26 = vmul.f32 %v3752_v4, %v1168_v23  ;;  %v1198_v27 = vmul.f32 %v3762_v52, %v1172_v24  ;;  %v1228_v28 = vsel %vm1156_vm2, 0.0, %v1217_v20  ;;  %v1231_v29 = vsel %vm1169_vm3, %v1229_v21, %v1230_v22  ;;  %v3135_v23 = vld [vmem:[%s3800_s12 + $0x38] sm:$0xff] }
 0x131   : >> { %v1287_v31 = vsel %vm1156_vm2, 0.0, %v1276_v25  ;;  %v1289_v33 = vrot.slane %v3821_v30, 1  ;;  %v1241_v35 = vmul.f32 %v3767_v6, %v1228_v28  ;;  %v1158_v38 = vrot.slane %v3804_v12, 7 }
 0x132   : >> { %v1194_v34 = vadd.f32 %v1190_v19, %v1182_v26  ;;  %v1257_v39 = vmul.f32 %v3777_v7, %v1231_v29  ;;  %v1173_v40 = vrot.slane %v3828_v37, 1  ;;  %v1191_v41 = vmul.f32 %v3757_v5, %v3804_v12 }
 0x133   : >> { %v1218_v43 = vrot.slane %v3809_v17, 7  ;;  %v1300_v45 = vmul.f32 %v3782_v8, %v1287_v31  ;;  %v1159_v46 = vsel %vm1156_vm2, %v1157_v14, %v1158_v38  ;;  %v1232_v47 = vrot.slane %v3836_v42, 1 }
 0x134   : >> { %v1202_v44 = vadd.f32 %v1198_v27, %v1194_v34  ;;  %v1290_v48 = vsel %vm1169_vm3, %v1288_v32, %v1289_v33  ;;  %v1174_v49 = vsel %vm1169_vm3, %v1171_v16, %v1173_v40  ;;  %v1183_v50 = vmul.f32 %v3752_v4, %v1159_v46 }
 0x135   : >> { %v1219_v51 = vsel %vm1156_vm2, %v1217_v20, %v1218_v43  ;;  %v1308_v54 = vmul.f32 %v3787_v9, %v3138_v18  ;;  %v1199_v55 = vmul.f32 %v3762_v52, %v1174_v49  ;;  %v1233_v56 = vsel %vm1169_vm3, %v1230_v22, %v1232_v47 }
 0x136   : >> { %v1245_v53 = vadd.f32 %v1241_v35, %v1202_v44  ;;  %v1195_v58 = vadd.f32 %v1191_v41, %v1183_v50  ;;  %v1242_v59 = vmul.f32 %v3767_v6, %v1219_v51  ;;  %v1277_v60 = vrot.slane %v3821_v30, 7 }
 0x137   : >> { %v1291_v61 = vrot.slane %v3850_v57, 1  ;;  %v1316_v1 = vmul.f32 %v3792_v10, %v1290_v48  ;;  %v1160_v2 = vrot.slane %v3828_v37, 7  ;;  %v1175_v3 = vrot.slane %v1151_v62, 1 }
 0x138   : >> { %v1253_v63 = vadd.f32 %v1249_v36, %v1245_v53  ;;  %v1203_v11 = vadd.f32 %v1199_v55, %v1195_v58  ;;  %v1250_v12 = vmul.f32 %v3772_v0, %v3809_v17  ;;  %v1278_v13 = vsel %vm1156_vm2, %v1276_v25, %v1277_v60 }
 0x139   : >> { %v1192_v14 = vmul.f32 %v3757_v5, %v3828_v37  ;;  %v1258_v16 = vmul.f32 %v3777_v7, %v1233_v56  ;;  %v1292_v18 = vsel %vm1169_vm3, %v1289_v33, %v1291_v61  ;;  %v1161_v19 = vsel %vm1156_vm2, %v1158_v38, %v1160_v2 }
 0x13a   : >> { %v1261_v15 = vadd.f32 %v1257_v39, %v1253_v63  ;;  %v1246_v20 = vadd.f32 %v1242_v59, %v1203_v11  ;;  %v1176_v21 = vsel %vm1169_vm3, %v1173_v40, %v1175_v3  ;;  %v1184_v22 = vmul.f32 %v3752_v4, %v1161_v19  ;;  %v3141_v40 = vld [vmem:[%s3800_s12 + $0x58] sm:$0xff] }
 0x13b   : >> { %v1220_v17 = vrot.slane %v3836_v42, 7  ;;  %v1301_v25 = vmul.f32 %v3782_v8, %v1278_v13  ;;  %v1200_v26 = vmul.f32 %v3762_v52, %v1176_v21  ;;  %v1234_v27 = vrot.slane %v3135_v23, 1 }
 0x13c   : >> { %v1304_v24 = vadd.f32 %v1300_v45, %v1261_v15  ;;  %v1254_v28 = vadd.f32 %v1250_v12, %v1246_v20  ;;  %v1196_v29 = vadd.f32 %v1192_v14, %v1184_v22  ;;  %v1279_v32 = vrot.slane %v3850_v57, 7 }
 0x13d   : >> { %v1221_v31 = vsel %vm1156_vm2, %v1218_v43, %v1220_v17  ;;  %v1235_v34 = vsel %vm1169_vm3, %v1232_v47, %v1234_v27  ;;  %v1309_v37 = vmul.f32 %v3787_v9, %v3821_v30  ;;  %v1251_v39 = vmul.f32 %v3772_v0, %v3836_v42 }
 0x13e   : >> { %v1312_v33 = vadd.f32 %v1308_v54, %v1304_v24  ;;  %v1243_v35 = vmul.f32 %v3767_v6, %v1221_v31  ;;  %v1262_v36 = vadd.f32 %v1258_v16, %v1254_v28  ;;  %v1204_v38 = vadd.f32 %v1200_v26, %v1196_v29  ;;  %v3377_v29 = vld [vmem:[%s4466_s4 + $0x18] sm:$0xff] (%p1141_p5) }
 0x13f   : >> { %v1317_v44 = vmul.f32 %v3792_v10, %v1292_v18  ;;  %v1280_v43 = vsel %vm1156_vm2, %v1277_v60, %v1279_v32  ;;  %v1293_v45 = vrot.slane %v3141_v40, 1  ;;  %v1259_v47 = vmul.f32 %v3777_v7, %v1235_v34  ;;  %v3381_v31 = vld [vmem:[%s4466_s4 + $0x18] sm:$0xff] (%p1141_p5)  ;;  %1466 = vmatpush.bf16.msra.mxu0 (%p1141_p5), %v3377_v29 }
 0x140   : >> { %v1320_v41 = vadd.f32 %v1316_v1, %v1312_v33  ;;  %v1305_v46 = vadd.f32 %v1301_v25, %v1262_v36  ;;  %v1247_v48 = vadd.f32 %v1243_v35, %v1204_v38  ;;  %v1162_v49 = vrot.slane %v1151_v62, 7  ;;  %1752 = vmatpush.bf16.msra.mxu1 (%p1141_p5), %v3381_v31  ;;  %v3380_v33 = vld [vmem:[%s4466_s4 + $0x10] sm:$0xff] (%p1141_p5) }
 0x141   : >> { %v1181_v30 = vsel %vm1169_vm3, %v1175_v3, 0.0  ;;  %v1193_v42 = vmul.f32 %v3757_v5, %v1151_v62  ;;  %v1222_v50 = vrot.slane %v3135_v23, 7  ;;  %v1302_v54 = vmul.f32 %v3782_v8, %v1280_v43  ;;  %v3379_v5 = vld [vmem:[%s4466_s4 + $0x8] sm:$0xff] (%p1141_p5) }
 0x142   : >> { %1326 = vst.msk [vmem:[%s3885_s14] sm:$0xff] %vm388_vm0, %v1320_v41  ;;  %v1313_v51 = vadd.f32 %v1309_v37, %v1305_v46  ;;  %v1255_v53 = vadd.f32 %v1251_v39, %v1247_v48  ;;  %v1163_v55 = vsel %vm1156_vm2, %v1160_v2, %v1162_v49  ;;  %v1294_v56 = vsel %vm1169_vm3, %v1291_v61, %v1293_v45 }
 0x143   : >> { %v1185_v58 = vmul.f32 %v3752_v4, %v1163_v55  ;;  %v1201_v59 = vmul.f32 %v3762_v52, %v1181_v30  ;;  %v1223_v60 = vsel %vm1156_vm2, %v1220_v17, %v1222_v50  ;;  %v1310_v62 = vmul.f32 %v3787_v9, %v3850_v57  ;;  %v3375_v4 = vld [vmem:[%s4466_s4 + $0x8] sm:$0xff] (%p1141_p5)  ;;  %v3374_v52 = vld [vmem:[%s4466_s4] sm:$0xff] (%p1141_p5) }
 0x144   : >> { %v1321_v63 = vadd.f32 %v1317_v44, %v1313_v51  ;;  %v1263_v1 = vadd.f32 %v1259_v47, %v1255_v53  ;;  %v1281_v3 = vrot.slane %v3141_v40, 7  ;;  %v1244_v12 = vmul.f32 %v3767_v6, %v1223_v60  ;;  %1753 = vmatpush.bf16.msra.mxu1 (%p1141_p5), %v3380_v33  ;;  %v3378_v6 = vld [vmem:[%s4466_s4] sm:$0xff] (%p1141_p5) }
 0x145   : >> { %v1197_v11 = vadd.f32 %v1193_v42, %v1185_v58  ;;  %v1318_v61 = vmul.f32 %v3792_v10, %v1294_v56  ;;  %v1240_v13 = vsel %vm1169_vm3, %v1234_v27, 0.0  ;;  %v1252_v15 = vmul.f32 %v3772_v0, %v3135_v23 }
 0x146   : >> { %1327 = vst.msk [vmem:[%s3885_s14 + $0x8] sm:$0xff] %vm388_vm0, %v1321_v63  ;;  %v1306_v2 = vadd.f32 %v1302_v54, %v1263_v1  ;;  %v1282_v18 = vsel %vm1156_vm2, %v1279_v32, %v1281_v3  ;;  %v1260_v19 = vmul.f32 %v3777_v7, %v1240_v13  ;;  %v1299_v17 = vsel %vm1169_vm3, %v1293_v45, 0.0  ;;  %v3376_v32 = vld [vmem:[%s4466_s4 + $0x10] sm:$0xff] (%p1141_p5) }
 0x147   : >> { %v1205_v14 = vadd.f32 %v1201_v59, %v1197_v11  ;;  %v1303_v22 = vmul.f32 %v3782_v8, %v1282_v18  ;;  %v1311_v25 = vmul.f32 %v3787_v9, %v3141_v40  ;;  %v1319_v23 = vmul.f32 %v3792_v10, %v1299_v17  ;;  %1467 = vmatpush.bf16.msra.mxu0 (%p1141_p5), %v3376_v32 }
 0x148   : >> { %v1314_v16 = vadd.f32 %v1310_v62, %v1306_v2  ;;  %1754 = vmatpush.bf16.msra.mxu1 (%p1141_p5), %v3379_v5 }
 0x149   : >> { %v1248_v57 = vadd.f32 %v1244_v12, %v1205_v14 }
 0x14a   : >> { %v1322_v20 = vadd.f32 %v1318_v61, %v1314_v16 }
 0x14b   : >> { %v1256_v21 = vadd.f32 %v1252_v15, %v1248_v57  ;;  %1468 = vmatpush.bf16.msra.mxu0 (%p1141_p5), %v3375_v4 }
 0x14c   : >> { %1328 = vst.msk [vmem:[%s3885_s14 + $0x10] sm:$0xff] %vm388_vm0, %v1322_v20  ;;  %1755 = vmatpush.bf16.msra.mxu1 (%p1141_p5), %v3378_v6 }
 0x14d   : >> { %v1264_v24 = vadd.f32 %v1260_v19, %v1256_v21 }
 0x14f   : >> { %v1307_v26 = vadd.f32 %v1303_v22, %v1264_v24  ;;  %1469 = vmatpush.bf16.msra.mxu0 (%p1141_p5), %v3374_v52 }
 0x151   : >> { %v1315_v27 = vadd.f32 %v1311_v25, %v1307_v26  ;;  %1143 = sbr.rel (!%p1141_p5) target bundleno = 294 (0x126), region = 144  ;;  %v3961_v26 = vld [vmem:[%s4467_s5] ss:$0 sm:$0xff] (%p1141_p5) }
 0x153   : >> { %v1323_v28 = vadd.f32 %v1319_v23, %v1315_v27  ;;  %v3966_v23 = vld [vmem:[%s4467_s5] ss:$0 sm:$0xff] (%p1141_p5) }
 0x155   : >> { %1329 = vst.msk [vmem:[%s3885_s14 + $0x18] sm:$0xff] %vm388_vm0, %v1323_v28 }
 0x15c   : > { %v1330_v0 = vld [vmem:[#allocation3] sm:$0xff]  ;;  %v1331_v7 = vld [vmem:[#allocation3 + $0x8] sm:$0xff]  ;;  %v1332_v35 = vld [vmem:[#allocation3 + $0x10] sm:$0xff] }
 0x15d   : > { %v1616_v8 = vld [vmem:[#allocation3 + $0x100] sm:$0xff]  ;;  %v1617_v9 = vld [vmem:[#allocation3 + $0x108] sm:$0xff]  ;;  %v1362_v10 = vpack.c.bf16 %v1331_v7, %v1330_v0  ;;  %v1333_v36 = vld [vmem:[#allocation3 + $0x18] sm:$0xff] }
 0x15e   : > { %v1648_v34 = vpack.c.bf16 %v1617_v9, %v1616_v8  ;;  %v1618_v37 = vld [vmem:[#allocation3 + $0x110] sm:$0xff]  ;;  %v1619_v38 = vld [vmem:[#allocation3 + $0x118] sm:$0xff]  ;;  %v1363_v39 = vpack.c.bf16 %v1333_v36, %v1332_v35  ;;  %v1334_v41 = vld [vmem:[#allocation3 + $0x20] sm:$0xff] }
 0x15f   : > { %3159 = vmatmul.msk.bf16.vlgmr.msra.gmra.mxu0 %vm388_vm0, %v1362_v10  ;;  %v1649_v40 = vpack.c.bf16 %v1619_v38, %v1618_v37  ;;  %v1335_v44 = vld [vmem:[#allocation3 + $0x28] sm:$0xff]  ;;  %v1620_v43 = vld [vmem:[#allocation3 + $0x120] sm:$0xff]  ;;  %v1336_v47 = vld [vmem:[#allocation3 + $0x30] sm:$0xff] }
 0x160   : > { %3191 = vmatmul.msk.bf16.vlgmr.msra.gmra.mxu1 %vm388_vm0, %v1648_v34  ;;  %v1621_v45 = vld [vmem:[#allocation3 + $0x128] sm:$0xff]  ;;  %v1364_v46 = vpack.c.bf16 %v1335_v44, %v1334_v41  ;;  %v1337_v49 = vld [vmem:[#allocation3 + $0x38] sm:$0xff]  ;;  %v1622_v30 = vld [vmem:[#allocation3 + $0x130] sm:$0xff] }
 0x161   : > { %v1650_v48 = vpack.c.bf16 %v1621_v45, %v1620_v43  ;;  %v1623_v42 = vld [vmem:[#allocation3 + $0x138] sm:$0xff]  ;;  %v1365_v50 = vpack.c.bf16 %v1337_v49, %v1336_v47  ;;  %v1338_v53 = vld [vmem:[#allocation3 + $0x40] sm:$0xff]  ;;  %v1339_v54 = vld [vmem:[#allocation3 + $0x48] sm:$0xff] }
 0x162   : > { %v1651_v51 = vpack.c.bf16 %v1623_v42, %v1622_v30  ;;  %v1624_v55 = vld [vmem:[#allocation3 + $0x140] sm:$0xff]  ;;  %v1625_v56 = vld [vmem:[#allocation3 + $0x148] sm:$0xff]  ;;  %v1366_v58 = vpack.c.bf16 %v1339_v54, %v1338_v53  ;;  %v1340_v60 = vld [vmem:[#allocation3 + $0x50] sm:$0xff] }
 0x163   : > { %v1652_v59 = vpack.c.bf16 %v1625_v56, %v1624_v55  ;;  %v1341_v63 = vld [vmem:[#allocation3 + $0x58] sm:$0xff]  ;;  %v1626_v1 = vld [vmem:[#allocation3 + $0x150] sm:$0xff]  ;;  %v1342_v12 = vld [vmem:[#allocation3 + $0x60] sm:$0xff] }
 0x164   : > { %v1627_v62 = vld [vmem:[#allocation3 + $0x158] sm:$0xff]  ;;  %v1367_v3 = vpack.c.bf16 %v1341_v63, %v1340_v60  ;;  %v1343_v2 = vld [vmem:[#allocation3 + $0x68] sm:$0xff]  ;;  %v1628_v61 = vld [vmem:[#allocation3 + $0x160] sm:$0xff] }
 0x165   : > { %v1653_v11 = vpack.c.bf16 %v1627_v62, %v1626_v1  ;;  %v1629_v13 = vld [vmem:[#allocation3 + $0x168] sm:$0xff]  ;;  %v1368_v14 = vpack.c.bf16 %v1343_v2, %v1342_v12  ;;  %v1344_v16 = vld [vmem:[#allocation3 + $0x70] sm:$0xff]  ;;  %v1345_v18 = vld [vmem:[#allocation3 + $0x78] sm:$0xff] }
 0x166   : > { %v1654_v15 = vpack.c.bf16 %v1629_v13, %v1628_v61  ;;  %v1630_v57 = vld [vmem:[#allocation3 + $0x170] sm:$0xff]  ;;  %v1631_v19 = vld [vmem:[#allocation3 + $0x178] sm:$0xff]  ;;  %v1369_v20 = vpack.c.bf16 %v1345_v18, %v1344_v16  ;;  %v1346_v22 = vld [vmem:[#allocation3 + $0x80] sm:$0xff] }
 0x167   : > { %v1655_v21 = vpack.c.bf16 %v1631_v19, %v1630_v57  ;;  %v1347_v17 = vld [vmem:[#allocation3 + $0x88] sm:$0xff]  ;;  %v1632_v24 = vld [vmem:[#allocation3 + $0x180] sm:$0xff]  ;;  %v1348_v10 = vld [vmem:[#allocation3 + $0x90] sm:$0xff] }
 0x168   : > { %v1633_v25 = vld [vmem:[#allocation3 + $0x188] sm:$0xff]  ;;  %v1370_v27 = vpack.c.bf16 %v1347_v17, %v1346_v22  ;;  %v1349_v34 = vld [vmem:[#allocation3 + $0x98] sm:$0xff]  ;;  %v1634_v35 = vld [vmem:[#allocation3 + $0x190] sm:$0xff] }
 0x169   : > { %v1656_v28 = vpack.c.bf16 %v1633_v25, %v1632_v24  ;;  %v1635_v36 = vld [vmem:[#allocation3 + $0x198] sm:$0xff]  ;;  %v1371_v37 = vpack.c.bf16 %v1349_v34, %v1348_v10  ;;  %v1636_v53 = vld [vmem:[#allocation3 + $0x1a0] sm:$0xff]  ;;  %v1637_v54 = vld [vmem:[#allocation3 + $0x1a8] sm:$0xff] }
 0x16a   : > { %v1657_v38 = vpack.c.bf16 %v1635_v36, %v1634_v35  ;;  %v1658_v56 = vpack.c.bf16 %v1637_v54, %v1636_v53  ;;  %v1638_v16 = vld [vmem:[#allocation3 + $0x1b0] sm:$0xff]  ;;  %v1639_v18 = vld [vmem:[#allocation3 + $0x1b8] sm:$0xff] }
 0x16b   : > { %v1659_v19 = vpack.c.bf16 %v1639_v18, %v1638_v16 }
 0x16f   : > { %3160 = vmatmul.msk.bf16.gmra.mxu0 %vm388_vm0, %v1363_v39 }
 0x170   : > { %3192 = vmatmul.msk.bf16.gmra.mxu1 %vm388_vm0, %v1649_v40 }
 0x17f   : > { %3161 = vmatmul.msk.bf16.gmra.mxu0 %vm388_vm0, %v1364_v46 }
 0x180   : > { %3193 = vmatmul.msk.bf16.gmra.mxu1 %vm388_vm0, %v1650_v48 }
 0x18f   : > { %3162 = vmatmul.msk.bf16.gmra.mxu0 %vm388_vm0, %v1365_v50  ;;  %v1350_v50 = vld [vmem:[#allocation3 + $0xa0] sm:$0xff] }
 0x190   : > { %3194 = vmatmul.msk.bf16.gmra.mxu1 %vm388_vm0, %v1651_v51  ;;  %v1351_v51 = vld [vmem:[#allocation3 + $0xa8] sm:$0xff] }
 0x191   : > { %v1372_v55 = vpack.c.bf16 %v1351_v51, %v1350_v50 }
 0x19f   : > { %3163 = vmatmul.msk.bf16.gmra.mxu0 %vm388_vm0, %v1366_v58 }
 0x1a0   : > { %3195 = vmatmul.msk.bf16.gmra.mxu1 %vm388_vm0, %v1652_v59 }
 0x1af   : > { %3164 = vmatmul.msk.bf16.gmra.mxu0 %vm388_vm0, %v1367_v3 }
 0x1b0   : > { %3196 = vmatmul.msk.bf16.gmra.mxu1 %vm388_vm0, %v1653_v11 }
 0x1bf   : > { %3165 = vmatmul.msk.bf16.gmra.mxu0 %vm388_vm0, %v1368_v14  ;;  %v1352_v14 = vld [vmem:[#allocation3 + $0xb0] sm:$0xff] }
 0x1c0   : > { %3197 = vmatmul.msk.bf16.gmra.mxu1 %vm388_vm0, %v1654_v15  ;;  %v1353_v15 = vld [vmem:[#allocation3 + $0xb8] sm:$0xff] }
 0x1c1   : > { %v1373_v57 = vpack.c.bf16 %v1353_v15, %v1352_v14 }
 0x1cf   : > { %3166 = vmatmul.msk.bf16.gmra.mxu0 %vm388_vm0, %v1369_v20 }
 0x1d0   : > { %3198 = vmatmul.msk.bf16.gmra.mxu1 %vm388_vm0, %v1655_v21 }
 0x1dc   : > { %v1471_v29 = vpop.f32.mrf.mxu0 }
 0x1dd   : > { %v1757_v31 = vpop.f32.mrf.mxu1  ;;  %v1472_v32 = vadd.f32 %v3961_v26, %v1471_v29 }
 0x1de   : > { %v1758_v33 = vadd.f32 %v3966_v23, %v1757_v31 }
 0x1df   : > { %v1551_v4 = vmax.f32 %v1472_v32, 0.0  ;;  %3167 = vmatmul.msk.bf16.gmra.mxu0 %vm388_vm0, %v1370_v27 }
 0x1e0   : > { %v1837_v5 = vmax.f32 %v1758_v33, 0.0  ;;  %3199 = vmatmul.msk.bf16.gmra.mxu1 %vm388_vm0, %v1656_v28 }
 0x1e1   : > { %1584 = vst.msk [vmem:[#allocation4 + $0x20] sm:$0xff] %vm388_vm0, %v1551_v4  ;;  %v1354_v4 = vld [vmem:[#allocation3 + $0xc0] sm:$0xff] }
 0x1e2   : > { %1870 = vst.msk [vmem:[#allocation4 + $0x120] sm:$0xff] %vm388_vm0, %v1837_v5  ;;  %v1355_v5 = vld [vmem:[#allocation3 + $0xc8] sm:$0xff] }
 0x1e4   : > { %v1473_v52 = vpop.f32.mrf.mxu0 }
 0x1e5   : > { %v1759_v6 = vpop.f32.mrf.mxu1  ;;  %v1474_v0 = vadd.f32 %v3961_v26, %v1473_v52  ;;  %v1640_v52 = vld [vmem:[#allocation3 + $0x1c0] sm:$0xff] }
 0x1e6   : > { %v1760_v7 = vadd.f32 %v3966_v23, %v1759_v6  ;;  %v1641_v6 = vld [vmem:[#allocation3 + $0x1c8] sm:$0xff] }
 0x1e7   : > { %v1552_v8 = vmax.f32 %v1474_v0, 0.0  ;;  %v1374_v0 = vpack.c.bf16 %v1355_v5, %v1354_v4 }
 0x1e8   : > { %v1838_v9 = vmax.f32 %v1760_v7, 0.0  ;;  %v1660_v7 = vpack.c.bf16 %v1641_v6, %v1640_v52 }
 0x1e9   : > { %1585 = vst.msk [vmem:[#allocation4 + $0x28] sm:$0xff] %vm388_vm0, %v1552_v8 }
 0x1ea   : > { %1871 = vst.msk [vmem:[#allocation4 + $0x128] sm:$0xff] %vm388_vm0, %v1838_v9 }
 0x1ec   : > { %v1476_v39 = vpop.f32.mrf.mxu0 }
 0x1ed   : > { %v1762_v40 = vpop.f32.mrf.mxu1  ;;  %v1477_v41 = vadd.f32 %v3961_v26, %v1476_v39 }
 0x1ee   : > { %v1763_v44 = vadd.f32 %v3966_v23, %v1762_v40 }
 0x1ef   : > { %v1553_v43 = vmax.f32 %v1477_v41, 0.0  ;;  %3168 = vmatmul.msk.bf16.gmra.mxu0 %vm388_vm0, %v1371_v37 }
 0x1f0   : > { %v1839_v45 = vmax.f32 %v1763_v44, 0.0  ;;  %3200 = vmatmul.msk.bf16.gmra.mxu1 %vm388_vm0, %v1657_v38 }
 0x1f1   : > { %1586 = vst.msk [vmem:[#allocation4 + $0x30] sm:$0xff] %vm388_vm0, %v1553_v43  ;;  %v1356_v43 = vld [vmem:[#allocation3 + $0xd0] sm:$0xff] }
 0x1f2   : > { %1872 = vst.msk [vmem:[#allocation4 + $0x130] sm:$0xff] %vm388_vm0, %v1839_v45  ;;  %v1357_v45 = vld [vmem:[#allocation3 + $0xd8] sm:$0xff] }
 0x1f4   : > { %v1478_v46 = vpop.f32.mrf.mxu0 }
 0x1f5   : > { %v1764_v48 = vpop.f32.mrf.mxu1  ;;  %v1479_v47 = vadd.f32 %v3961_v26, %v1478_v46  ;;  %v1642_v46 = vld [vmem:[#allocation3 + $0x1d0] sm:$0xff] }
 0x1f6   : > { %v1765_v49 = vadd.f32 %v3966_v23, %v1764_v48  ;;  %v1643_v48 = vld [vmem:[#allocation3 + $0x1d8] sm:$0xff] }
 0x1f7   : > { %v1554_v30 = vmax.f32 %v1479_v47, 0.0  ;;  %v1375_v47 = vpack.c.bf16 %v1357_v45, %v1356_v43 }
 0x1f8   : > { %v1840_v42 = vmax.f32 %v1765_v49, 0.0  ;;  %v1661_v49 = vpack.c.bf16 %v1643_v48, %v1642_v46 }
 0x1f9   : > { %1587 = vst.msk [vmem:[#allocation4 + $0x38] sm:$0xff] %vm388_vm0, %v1554_v30 }
 0x1fa   : > { %1873 = vst.msk [vmem:[#allocation4 + $0x138] sm:$0xff] %vm388_vm0, %v1840_v42 }
 0x1fc   : > { %v1481_v58 = vpop.f32.mrf.mxu0 }
 0x1fd   : > { %v1767_v59 = vpop.f32.mrf.mxu1  ;;  %v1482_v60 = vadd.f32 %v3961_v26, %v1481_v58 }
 0x1fe   : > { %v1768_v63 = vadd.f32 %v3966_v23, %v1767_v59 }
 0x1ff   : > { %v1555_v1 = vmax.f32 %v1482_v60, 0.0  ;;  %3169 = vmatmul.msk.bf16.gmra.mxu0 %vm388_vm0, %v1372_v55 }
 0x200   : > { %v1841_v62 = vmax.f32 %v1768_v63, 0.0  ;;  %3201 = vmatmul.msk.bf16.gmra.mxu1 %vm388_vm0, %v1658_v56 }
 0x201   : > { %1588 = vst.msk [vmem:[#allocation4 + $0x40] sm:$0xff] %vm388_vm0, %v1555_v1  ;;  %v1358_v1 = vld [vmem:[#allocation3 + $0xe0] sm:$0xff] }
 0x202   : > { %1874 = vst.msk [vmem:[#allocation4 + $0x140] sm:$0xff] %vm388_vm0, %v1841_v62  ;;  %v1359_v62 = vld [vmem:[#allocation3 + $0xe8] sm:$0xff] }
 0x204   : > { %v1483_v3 = vpop.f32.mrf.mxu0 }
 0x205   : > { %v1769_v11 = vpop.f32.mrf.mxu1  ;;  %v1484_v12 = vadd.f32 %v3961_v26, %v1483_v3  ;;  %v1644_v3 = vld [vmem:[#allocation3 + $0x1e0] sm:$0xff] }
 0x206   : > { %v1770_v2 = vadd.f32 %v3966_v23, %v1769_v11  ;;  %v1645_v11 = vld [vmem:[#allocation3 + $0x1e8] sm:$0xff] }
 0x207   : > { %v1556_v61 = vmax.f32 %v1484_v12, 0.0  ;;  %v1376_v12 = vpack.c.bf16 %v1359_v62, %v1358_v1 }
 0x208   : > { %v1842_v13 = vmax.f32 %v1770_v2, 0.0  ;;  %v1662_v2 = vpack.c.bf16 %v1645_v11, %v1644_v3 }
 0x209   : > { %1589 = vst.msk [vmem:[#allocation4 + $0x48] sm:$0xff] %vm388_vm0, %v1556_v61 }
 0x20a   : > { %1875 = vst.msk [vmem:[#allocation4 + $0x148] sm:$0xff] %vm388_vm0, %v1842_v13 }
 0x20c   : > { %v1486_v20 = vpop.f32.mrf.mxu0 }
 0x20d   : > { %v1772_v21 = vpop.f32.mrf.mxu1  ;;  %v1487_v22 = vadd.f32 %v3961_v26, %v1486_v20 }
 0x20e   : > { %v1773_v17 = vadd.f32 %v3966_v23, %v1772_v21 }
 0x20f   : > { %v1557_v24 = vmax.f32 %v1487_v22, 0.0  ;;  %3170 = vmatmul.msk.bf16.gmra.mxu0 %vm388_vm0, %v1373_v57 }
 0x210   : > { %v1843_v25 = vmax.f32 %v1773_v17, 0.0  ;;  %3202 = vmatmul.msk.bf16.gmra.mxu1 %vm388_vm0, %v1659_v19 }
 0x211   : > { %1590 = vst.msk [vmem:[#allocation4 + $0x50] sm:$0xff] %vm388_vm0, %v1557_v24  ;;  %v1360_v24 = vld [vmem:[#allocation3 + $0xf0] sm:$0xff] }
 0x212   : > { %1876 = vst.msk [vmem:[#allocation4 + $0x150] sm:$0xff] %vm388_vm0, %v1843_v25  ;;  %v1361_v25 = vld [vmem:[#allocation3 + $0xf8] sm:$0xff] }
 0x214   : > { %v1488_v27 = vpop.f32.mrf.mxu0 }
 0x215   : > { %v1774_v28 = vpop.f32.mrf.mxu1  ;;  %v1489_v29 = vadd.f32 %v3961_v26, %v1488_v27  ;;  %v1646_v27 = vld [vmem:[#allocation3 + $0x1f0] sm:$0xff] }
 0x216   : > { %v1775_v31 = vadd.f32 %v3966_v23, %v1774_v28  ;;  %v1647_v28 = vld [vmem:[#allocation3 + $0x1f8] sm:$0xff] }
 0x217   : > { %v1558_v32 = vmax.f32 %v1489_v29, 0.0  ;;  %v1377_v29 = vpack.c.bf16 %v1361_v25, %v1360_v24 }
 0x218   : > { %v1844_v33 = vmax.f32 %v1775_v31, 0.0  ;;  %v1663_v31 = vpack.c.bf16 %v1647_v28, %v1646_v27 }
 0x219   : > { %1591 = vst.msk [vmem:[#allocation4 + $0x58] sm:$0xff] %vm388_vm0, %v1558_v32 }
 0x21a   : > { %1877 = vst.msk [vmem:[#allocation4 + $0x158] sm:$0xff] %vm388_vm0, %v1844_v33 }
 0x21c   : > { %v1491_v8 = vpop.f32.mrf.mxu0 }
 0x21d   : > { %v1777_v9 = vpop.f32.mrf.mxu1  ;;  %v1492_v10 = vadd.f32 %v3961_v26, %v1491_v8 }
 0x21e   : > { %v1778_v34 = vadd.f32 %v3966_v23, %v1777_v9 }
 0x21f   : > { %v1559_v35 = vmax.f32 %v1492_v10, 0.0  ;;  %3171 = vmatmul.msk.bf16.gmra.mxu0 %vm388_vm0, %v1374_v0 }
 0x220   : > { %v1845_v36 = vmax.f32 %v1778_v34, 0.0  ;;  %3203 = vmatmul.msk.bf16.gmra.mxu1 %vm388_vm0, %v1660_v7 }
 0x221   : > { %1592 = vst.msk [vmem:[#allocation4 + $0x60] sm:$0xff] %vm388_vm0, %v1559_v35 }
 0x222   : > { %1878 = vst.msk [vmem:[#allocation4 + $0x160] sm:$0xff] %vm388_vm0, %v1845_v36 }
 0x224   : > { %v1493_v37 = vpop.f32.mrf.mxu0 }
 0x225   : > { %v1779_v38 = vpop.f32.mrf.mxu1  ;;  %v1494_v39 = vadd.f32 %v3961_v26, %v1493_v37 }
 0x226   : > { %v1780_v40 = vadd.f32 %v3966_v23, %v1779_v38 }
 0x227   : > { %v1560_v41 = vmax.f32 %v1494_v39, 0.0 }
 0x228   : > { %v1846_v44 = vmax.f32 %v1780_v40, 0.0 }
 0x229   : > { %1593 = vst.msk [vmem:[#allocation4 + $0x68] sm:$0xff] %vm388_vm0, %v1560_v41 }
 0x22a   : > { %1879 = vst.msk [vmem:[#allocation4 + $0x168] sm:$0xff] %vm388_vm0, %v1846_v44 }
 0x22c   : > { %v1496_v30 = vpop.f32.mrf.mxu0 }
 0x22d   : > { %v1782_v42 = vpop.f32.mrf.mxu1  ;;  %v1497_v50 = vadd.f32 %v3961_v26, %v1496_v30 }
 0x22e   : > { %v1783_v51 = vadd.f32 %v3966_v23, %v1782_v42 }
 0x22f   : > { %v1561_v53 = vmax.f32 %v1497_v50, 0.0  ;;  %3172 = vmatmul.msk.bf16.gmra.mxu0 %vm388_vm0, %v1375_v47 }
 0x230   : > { %v1847_v54 = vmax.f32 %v1783_v51, 0.0  ;;  %3204 = vmatmul.msk.bf16.gmra.mxu1 %vm388_vm0, %v1661_v49 }
 0x231   : > { %1594 = vst.msk [vmem:[#allocation4 + $0x70] sm:$0xff] %vm388_vm0, %v1561_v53 }
 0x232   : > { %1880 = vst.msk [vmem:[#allocation4 + $0x170] sm:$0xff] %vm388_vm0, %v1847_v54 }
 0x234   : > { %v1498_v55 = vpop.f32.mrf.mxu0 }
 0x235   : > { %v1784_v56 = vpop.f32.mrf.mxu1  ;;  %v1499_v58 = vadd.f32 %v3961_v26, %v1498_v55 }
 0x236   : > { %v1785_v59 = vadd.f32 %v3966_v23, %v1784_v56 }
 0x237   : > { %v1562_v60 = vmax.f32 %v1499_v58, 0.0 }
 0x238   : > { %v1848_v63 = vmax.f32 %v1785_v59, 0.0 }
 0x239   : > { %1595 = vst.msk [vmem:[#allocation4 + $0x78] sm:$0xff] %vm388_vm0, %v1562_v60 }
 0x23a   : > { %1881 = vst.msk [vmem:[#allocation4 + $0x178] sm:$0xff] %vm388_vm0, %v1848_v63 }
 0x23c   : > { %v1501_v61 = vpop.f32.mrf.mxu0 }
 0x23d   : > { %v1787_v13 = vpop.f32.mrf.mxu1  ;;  %v1502_v14 = vadd.f32 %v3961_v26, %v1501_v61 }
 0x23e   : > { %v1788_v15 = vadd.f32 %v3966_v23, %v1787_v13 }
 0x23f   : > { %v1563_v16 = vmax.f32 %v1502_v14, 0.0  ;;  %3173 = vmatmul.msk.bf16.gmra.mxu0 %vm388_vm0, %v1376_v12 }
 0x240   : > { %v1849_v18 = vmax.f32 %v1788_v15, 0.0  ;;  %3205 = vmatmul.msk.bf16.gmra.mxu1 %vm388_vm0, %v1662_v2 }
 0x241   : > { %1596 = vst.msk [vmem:[#allocation4 + $0x80] sm:$0xff] %vm388_vm0, %v1563_v16 }
 0x242   : > { %1882 = vst.msk [vmem:[#allocation4 + $0x180] sm:$0xff] %vm388_vm0, %v1849_v18 }
 0x244   : > { %v1503_v57 = vpop.f32.mrf.mxu0 }
 0x245   : > { %v1789_v19 = vpop.f32.mrf.mxu1  ;;  %v1504_v20 = vadd.f32 %v3961_v26, %v1503_v57 }
 0x246   : > { %v1790_v21 = vadd.f32 %v3966_v23, %v1789_v19 }
 0x247   : > { %v1564_v22 = vmax.f32 %v1504_v20, 0.0 }
 0x248   : > { %v1850_v17 = vmax.f32 %v1790_v21, 0.0 }
 0x249   : > { %1597 = vst.msk [vmem:[#allocation4 + $0x88] sm:$0xff] %vm388_vm0, %v1564_v22 }
 0x24a   : > { %1883 = vst.msk [vmem:[#allocation4 + $0x188] sm:$0xff] %vm388_vm0, %v1850_v17 }
 0x24c   : > { %v1506_v32 = vpop.f32.mrf.mxu0 }
 0x24d   : > { %v1792_v33 = vpop.f32.mrf.mxu1  ;;  %v1507_v4 = vadd.f32 %v3961_v26, %v1506_v32 }
 0x24e   : > { %v1793_v5 = vadd.f32 %v3966_v23, %v1792_v33 }
 0x24f   : > { %v1565_v52 = vmax.f32 %v1507_v4, 0.0  ;;  %3174 = vmatmul.msk.bf16.gmra.mxu0 %vm388_vm0, %v1377_v29 }
 0x250   : > { %v1851_v6 = vmax.f32 %v1793_v5, 0.0  ;;  %3206 = vmatmul.msk.bf16.gmra.mxu1 %vm388_vm0, %v1663_v31 }
 0x251   : > { %1598 = vst.msk [vmem:[#allocation4 + $0x90] sm:$0xff] %vm388_vm0, %v1565_v52 }
 0x252   : > { %1884 = vst.msk [vmem:[#allocation4 + $0x190] sm:$0xff] %vm388_vm0, %v1851_v6 }
 0x254   : > { %v1508_v0 = vpop.f32.mrf.mxu0 }
 0x255   : > { %v1794_v7 = vpop.f32.mrf.mxu1  ;;  %v1509_v8 = vadd.f32 %v3961_v26, %v1508_v0 }
 0x256   : > { %v1795_v9 = vadd.f32 %v3966_v23, %v1794_v7 }
 0x257   : > { %v1566_v10 = vmax.f32 %v1509_v8, 0.0 }
 0x258   : > { %v1852_v34 = vmax.f32 %v1795_v9, 0.0 }
 0x259   : > { %1599 = vst.msk [vmem:[#allocation4 + $0x98] sm:$0xff] %vm388_vm0, %v1566_v10 }
 0x25a   : > { %1885 = vst.msk [vmem:[#allocation4 + $0x198] sm:$0xff] %vm388_vm0, %v1852_v34 }
 0x25c   : > { %v1511_v35 = vpop.f32.mrf.mxu0 }
 0x25d   : > { %v1797_v36 = vpop.f32.mrf.mxu1  ;;  %v1512_v37 = vadd.f32 %v3961_v26, %v1511_v35 }
 0x25e   : > { %v1798_v38 = vadd.f32 %v3966_v23, %v1797_v36 }
 0x25f   : > { %v1567_v39 = vmax.f32 %v1512_v37, 0.0 }
 0x260   : > { %v1853_v40 = vmax.f32 %v1798_v38, 0.0 }
 0x261   : > { %1600 = vst.msk [vmem:[#allocation4 + $0xa0] sm:$0xff] %vm388_vm0, %v1567_v39 }
 0x262   : > { %1886 = vst.msk [vmem:[#allocation4 + $0x1a0] sm:$0xff] %vm388_vm0, %v1853_v40 }
 0x264   : > { %v1513_v41 = vpop.f32.mrf.mxu0 }
 0x265   : > { %v1799_v44 = vpop.f32.mrf.mxu1  ;;  %v1514_v43 = vadd.f32 %v3961_v26, %v1513_v41 }
 0x266   : > { %v1800_v45 = vadd.f32 %v3966_v23, %v1799_v44 }
 0x267   : > { %v1568_v46 = vmax.f32 %v1514_v43, 0.0 }
 0x268   : > { %v1854_v48 = vmax.f32 %v1800_v45, 0.0 }
 0x269   : > { %1601 = vst.msk [vmem:[#allocation4 + $0xa8] sm:$0xff] %vm388_vm0, %v1568_v46  ;;  %v4099_v46 = vld [vmem:[%s4468_s6] ss:$0 sm:$0xff] }
 0x26a   : > { %1887 = vst.msk [vmem:[#allocation4 + $0x1a8] sm:$0xff] %vm388_vm0, %v1854_v48  ;;  %v4104_v48 = vld [vmem:[%s4468_s6 + $0x1] ss:$0 sm:$0xff] }
 0x26c   : > { %v1516_v47 = vpop.f32.mrf.mxu0 }
 0x26d   : > { %v1802_v49 = vpop.f32.mrf.mxu1  ;;  %v1517_v30 = vadd.f32 %v3961_v26, %v1516_v47  ;;  %v4109_v47 = vld [vmem:[%s4468_s6 + $0x2] ss:$0 sm:$0xff] }
 0x26e   : > { %v1803_v42 = vadd.f32 %v3966_v23, %v1802_v49  ;;  %v4114_v49 = vld [vmem:[%s4468_s6 + $0x3] ss:$0 sm:$0xff] }
 0x26f   : > { %v1569_v50 = vmax.f32 %v1517_v30, 0.0  ;;  %v4119_v30 = vld [vmem:[%s4468_s6 + $0x4] ss:$0 sm:$0xff] }
 0x270   : > { %v1855_v51 = vmax.f32 %v1803_v42, 0.0 }
 0x271   : > { %1602 = vst.msk [vmem:[#allocation4 + $0xb0] sm:$0xff] %vm388_vm0, %v1569_v50 }
 0x272   : > { %1888 = vst.msk [vmem:[#allocation4 + $0x1b0] sm:$0xff] %vm388_vm0, %v1855_v51  ;;  %v4124_v51 = vld [vmem:[%s4468_s6 + $0x5] ss:$0 sm:$0xff] }
 0x274   : > { %v1518_v53 = vpop.f32.mrf.mxu0 }
 0x275   : > { %v1804_v54 = vpop.f32.mrf.mxu1  ;;  %v1519_v55 = vadd.f32 %v3961_v26, %v1518_v53  ;;  %v4129_v53 = vld [vmem:[%s4468_s6 + $0x6] ss:$0 sm:$0xff] }
 0x276   : > { %v1805_v56 = vadd.f32 %v3966_v23, %v1804_v54  ;;  %v4134_v54 = vld [vmem:[%s4468_s6 + $0x7] ss:$0 sm:$0xff] }
 0x277   : > { %v1570_v58 = vmax.f32 %v1519_v55, 0.0 }
 0x278   : > { %v1856_v59 = vmax.f32 %v1805_v56, 0.0 }
 0x279   : > { %1603 = vst.msk [vmem:[#allocation4 + $0xb8] sm:$0xff] %vm388_vm0, %v1570_v58  ;;  %v4141_v58 = vld [vmem:[%s4468_s6 + $0x8] ss:$0 sm:$0xff] }
 0x27a   : > { %1889 = vst.msk [vmem:[#allocation4 + $0x1b8] sm:$0xff] %vm388_vm0, %v1856_v59 }
 0x27c   : > { %v1521_v60 = vpop.f32.mrf.mxu0 }
 0x27d   : > { %v1807_v63 = vpop.f32.mrf.mxu1  ;;  %v1522_v1 = vadd.f32 %v3961_v26, %v1521_v60 }
 0x27e   : > { %v1808_v62 = vadd.f32 %v3966_v23, %v1807_v63 }
 0x27f   : > { %v1571_v3 = vmax.f32 %v1522_v1, 0.0 }
 0x280   : > { %v1857_v11 = vmax.f32 %v1808_v62, 0.0 }
 0x281   : > { %1604 = vst.msk [vmem:[#allocation4 + $0xc0] sm:$0xff] %vm388_vm0, %v1571_v3 }
 0x282   : > { %1890 = vst.msk [vmem:[#allocation4 + $0x1c0] sm:$0xff] %vm388_vm0, %v1857_v11 }
 0x284   : > { %v1523_v12 = vpop.f32.mrf.mxu0 }
 0x285   : > { %v1809_v2 = vpop.f32.mrf.mxu1  ;;  %v1524_v61 = vadd.f32 %v3961_v26, %v1523_v12 }
 0x286   : > { %v1810_v13 = vadd.f32 %v3966_v23, %v1809_v2 }
 0x287   : > { %v1572_v14 = vmax.f32 %v1524_v61, 0.0 }
 0x288   : > { %v1858_v15 = vmax.f32 %v1810_v13, 0.0 }
 0x289   : > { %1605 = vst.msk [vmem:[#allocation4 + $0xc8] sm:$0xff] %vm388_vm0, %v1572_v14 }
 0x28a   : > { %1891 = vst.msk [vmem:[#allocation4 + $0x1c8] sm:$0xff] %vm388_vm0, %v1858_v15 }
 0x28c   : > { %v1526_v16 = vpop.f32.mrf.mxu0 }
 0x28d   : > { %v1812_v18 = vpop.f32.mrf.mxu1  ;;  %v1527_v57 = vadd.f32 %v3961_v26, %v1526_v16 }
 0x28e   : > { %v1813_v19 = vadd.f32 %v3966_v23, %v1812_v18 }
 0x28f   : > { %v1573_v20 = vmax.f32 %v1527_v57, 0.0 }
 0x290   : > { %v1859_v21 = vmax.f32 %v1813_v19, 0.0 }
 0x291   : > { %1606 = vst.msk [vmem:[#allocation4 + $0xd0] sm:$0xff] %vm388_vm0, %v1573_v20 }
 0x292   : > { %1892 = vst.msk [vmem:[#allocation4 + $0x1d0] sm:$0xff] %vm388_vm0, %v1859_v21 }
 0x294   : > { %v1528_v22 = vpop.f32.mrf.mxu0 }
 0x295   : > { %v1814_v17 = vpop.f32.mrf.mxu1  ;;  %v1529_v24 = vadd.f32 %v3961_v26, %v1528_v22 }
 0x296   : > { %v1815_v25 = vadd.f32 %v3966_v23, %v1814_v17 }
 0x297   : > { %v1574_v27 = vmax.f32 %v1529_v24, 0.0 }
 0x298   : > { %v1860_v28 = vmax.f32 %v1815_v25, 0.0 }
 0x299   : > { %1607 = vst.msk [vmem:[#allocation4 + $0xd8] sm:$0xff] %vm388_vm0, %v1574_v27 }
 0x29a   : > { %1893 = vst.msk [vmem:[#allocation4 + $0x1d8] sm:$0xff] %vm388_vm0, %v1860_v28 }
 0x29c   : > { %v1531_v29 = vpop.f32.mrf.mxu0 }
 0x29d   : > { %v1817_v31 = vpop.f32.mrf.mxu1  ;;  %v1532_v32 = vadd.f32 %v3961_v26, %v1531_v29 }
 0x29e   : > { %v1818_v33 = vadd.f32 %v3966_v23, %v1817_v31 }
 0x29f   : > { %v1575_v4 = vmax.f32 %v1532_v32, 0.0 }
 0x2a0   : > { %v1861_v5 = vmax.f32 %v1818_v33, 0.0 }
 0x2a1   : > { %1608 = vst.msk [vmem:[#allocation4 + $0xe0] sm:$0xff] %vm388_vm0, %v1575_v4 }
 0x2a2   : > { %1894 = vst.msk [vmem:[#allocation4 + $0x1e0] sm:$0xff] %vm388_vm0, %v1861_v5 }
 0x2a4   : > { %v1533_v52 = vpop.f32.mrf.mxu0 }
 0x2a5   : > { %v1819_v6 = vpop.f32.mrf.mxu1  ;;  %v1534_v0 = vadd.f32 %v3961_v26, %v1533_v52 }
 0x2a6   : > { %v1820_v7 = vadd.f32 %v3966_v23, %v1819_v6 }
 0x2a7   : > { %v1576_v8 = vmax.f32 %v1534_v0, 0.0 }
 0x2a8   : > { %v1862_v9 = vmax.f32 %v1820_v7, 0.0 }
 0x2a9   : > { %1609 = vst.msk [vmem:[#allocation4 + $0xe8] sm:$0xff] %vm388_vm0, %v1576_v8 }
 0x2aa   : > { %1895 = vst.msk [vmem:[#allocation4 + $0x1e8] sm:$0xff] %vm388_vm0, %v1862_v9 }
 0x2ac   : > { %v1536_v10 = vpop.f32.mrf.mxu0 }
 0x2ad   : > { %v1822_v34 = vpop.f32.mrf.mxu1  ;;  %v1537_v35 = vadd.f32 %v3961_v26, %v1536_v10 }
 0x2ae   : > { %v1823_v36 = vadd.f32 %v3966_v23, %v1822_v34 }
 0x2af   : > { %v1577_v37 = vmax.f32 %v1537_v35, 0.0 }
 0x2b0   : > { %v1863_v38 = vmax.f32 %v1823_v36, 0.0 }
 0x2b1   : > { %1610 = vst.msk [vmem:[#allocation4 + $0xf0] sm:$0xff] %vm388_vm0, %v1577_v37 }
 0x2b2   : > { %1896 = vst.msk [vmem:[#allocation4 + $0x1f0] sm:$0xff] %vm388_vm0, %v1863_v38 }
 0x2b4   : > { %v1538_v39 = vpop.f32.mrf.mxu0 }
 0x2b5   : > { %v1824_v40 = vpop.f32.mrf.mxu1  ;;  %v1539_v41 = vadd.f32 %v3961_v26, %v1538_v39 }
 0x2b6   : > { %v1825_v44 = vadd.f32 %v3966_v23, %v1824_v40 }
 0x2b7   : > { %v1578_v43 = vmax.f32 %v1539_v41, 0.0 }
 0x2b8   : > { %v1864_v45 = vmax.f32 %v1825_v44, 0.0 }
 0x2b9   : > { %1611 = vst.msk [vmem:[#allocation4 + $0xf8] sm:$0xff] %vm388_vm0, %v1578_v43 }
 0x2ba   : > { %1897 = vst.msk [vmem:[#allocation4 + $0x1f8] sm:$0xff] %vm388_vm0, %v1864_v45 }
 0x2bc   : > { %v1541_v42 = vpop.f32.mrf.mxu0 }
 0x2bd   : > { %v1827_v50 = vpop.f32.mrf.mxu1  ;;  %v1542_v55 = vadd.f32 %v3961_v26, %v1541_v42 }
 0x2be   : > { %v1828_v56 = vadd.f32 %v3966_v23, %v1827_v50 }
 0x2bf   : > { %v1579_v59 = vmax.f32 %v1542_v55, 0.0 }
 0x2c0   : > { %v1865_v60 = vmax.f32 %v1828_v56, 0.0 }
 0x2c1   : > { %1612 = vst.msk [vmem:[#allocation4 + $0x100] sm:$0xff] %vm388_vm0, %v1579_v59 }
 0x2c2   : > { %1898 = vst.msk [vmem:[#allocation4 + $0x200] sm:$0xff] %vm388_vm0, %v1865_v60 }
 0x2c4   : > { %v1543_v63 = vpop.f32.mrf.mxu0 }
 0x2c5   : > { %v1829_v1 = vpop.f32.mrf.mxu1  ;;  %v1544_v62 = vadd.f32 %v3961_v26, %v1543_v63 }
 0x2c6   : > { %v1830_v3 = vadd.f32 %v3966_v23, %v1829_v1 }
 0x2c7   : > { %v1580_v11 = vmax.f32 %v1544_v62, 0.0 }
 0x2c8   : > { %v1866_v12 = vmax.f32 %v1830_v3, 0.0 }
 0x2c9   : > { %1613 = vst.msk [vmem:[#allocation4 + $0x108] sm:$0xff] %vm388_vm0, %v1580_v11 }
 0x2ca   : > { %1899 = vst.msk [vmem:[#allocation4 + $0x208] sm:$0xff] %vm388_vm0, %v1866_v12 }
 0x2cc   : > { %v1546_v2 = vpop.f32.mrf.mxu0 }
 0x2cd   : > { %v1832_v61 = vpop.f32.mrf.mxu1  ;;  %v1547_v13 = vadd.f32 %v3961_v26, %v1546_v2 }
 0x2ce   : > { %v1833_v14 = vadd.f32 %v3966_v23, %v1832_v61 }
 0x2cf   : > { %v1581_v15 = vmax.f32 %v1547_v13, 0.0 }
 0x2d0   : > { %v1867_v16 = vmax.f32 %v1833_v14, 0.0 }
 0x2d1   : > { %1614 = vst.msk [vmem:[#allocation4 + $0x110] sm:$0xff] %vm388_vm0, %v1581_v15 }
 0x2d2   : > { %1900 = vst.msk [vmem:[#allocation4 + $0x210] sm:$0xff] %vm388_vm0, %v1867_v16 }
 0x2d4   : > { %v1548_v18 = vpop.f32.mrf.mxu0 }
 0x2d5   : > { %v1834_v57 = vpop.f32.mrf.mxu1  ;;  %v1549_v19 = vadd.f32 %v3961_v26, %v1548_v18 }
 0x2d6   : > { %v1835_v20 = vadd.f32 %v3966_v23, %v1834_v57 }
 0x2d7   : > { %v1582_v21 = vmax.f32 %v1549_v19, 0.0 }
 0x2d8   : > { %v1868_v22 = vmax.f32 %v1835_v20, 0.0 }
 0x2d9   : > { %1615 = vst.msk [vmem:[#allocation4 + $0x118] sm:$0xff] %vm388_vm0, %v1582_v21 }
 0x2da   : > { %1901 = vst.msk [vmem:[#allocation4 + $0x218] sm:$0xff] %vm388_vm0, %v1868_v22 }
 0x2db LB: >> { %s3382_s19 = sshll.u32 %s3489_s18, 6  ;;  %vm1937_vm4 = vcmask 1041408   ;;  %vm1950_vm5 = vcmask 1045504   ;;  %s3221_s21 = sshll.u32 %s3489_s18, 5  ;;  %s3489_s18 = sphi %s4157_s18, %s1925_s18  }
 0x2dc   : >> { %s4163_s20 = scalar_lea.vmem [#allocation4], %s3382_s19  ;;  %s4248_s22 = scalar_lea.vmem [#allocation5], %s3221_s21 }
 0x2dd   : >> { %s1925_s18 = sadd.s32 1, %s3489_s18  }
 0x2de   : >> { %p1922_p6 = scmp.ge.s32.totalorder %s1925_s18, 8  }
 0x2e1   : >> { %v1929_v26 = vld [vmem:[%s4163_s20] sm:$0xff]  ;;  %v4167_v23 = vld [vmem:[%s4163_s20 + $0x8] sm:$0xff]  ;;  %v4191_v40 = vld [vmem:[%s4163_s20 + $0x10] sm:$0xff] }
 0x2e2   : >> { %v3211_v17 = vld [vmem:[%s4163_s20 + $0x20] sm:$0xff]  ;;  %v1938_v24 = vrot.slane %v1929_v26, 6  ;;  %v1951_v25 = vrot.slane %v1929_v26, 2  ;;  %v1952_v27 = vrot.slane %v4167_v23, 2  ;;  %v4172_v28 = vld [vmem:[%s4163_s20 + $0x28] sm:$0xff]  ;;  %v1971_v31 = vmul.f32 %v4104_v48, %v1929_v26  ;;  %v4199_v42 = vld [vmem:[%s4163_s20 + $0x30] sm:$0xff] }
 0x2e3   : >> { %v3217_v29 = vld [vmem:[%s4163_s20 + $0x40] sm:$0xff]  ;;  %v1998_v32 = vrot.slane %v3211_v17, 6  ;;  %v2010_v33 = vrot.slane %v3211_v17, 2  ;;  %v2011_v4 = vrot.slane %v4172_v28, 2  ;;  %v4184_v10 = vld [vmem:[%s4163_s20 + $0x48] sm:$0xff]  ;;  %v2030_v39 = vmul.f32 %v4119_v30, %v3211_v17  ;;  %v4213_v13 = vld [vmem:[%s4163_s20 + $0x50] sm:$0xff] }
 0x2e4   : >> { %v1949_v5 = vsel %vm1937_vm4, 0.0, %v1938_v24  ;;  %v1953_v52 = vsel %vm1950_vm5, %v1951_v25, %v1952_v27  ;;  %v2057_v6 = vrot.slane %v3217_v29, 6  ;;  %v2069_v35 = vrot.slane %v3217_v29, 2  ;;  %v1932_v57 = vld [vmem:[%s4163_s20 + $0x18] sm:$0xff] }
 0x2e5   : >> { %v1963_v0 = vmul.f32 %v4099_v46, %v1949_v5  ;;  %v1979_v7 = vmul.f32 %v4109_v47, %v1953_v52  ;;  %v2009_v8 = vsel %vm1937_vm4, 0.0, %v1998_v32  ;;  %v2012_v9 = vsel %vm1950_vm5, %v2010_v33, %v2011_v4  ;;  %v3214_v5 = vld [vmem:[%s4163_s20 + $0x38] sm:$0xff] }
 0x2e6   : >> { %v2068_v34 = vsel %vm1937_vm4, 0.0, %v2057_v6  ;;  %v2070_v36 = vrot.slane %v4184_v10, 2  ;;  %v2022_v38 = vmul.f32 %v4114_v49, %v2009_v8  ;;  %v1939_v41 = vrot.slane %v4167_v23, 6 }
 0x2e7   : >> { %v1975_v37 = vadd.f32 %v1971_v31, %v1963_v0  ;;  %v2038_v44 = vmul.f32 %v4124_v51, %v2012_v9  ;;  %v1954_v43 = vrot.slane %v4191_v40, 2  ;;  %v1972_v45 = vmul.f32 %v4104_v48, %v4167_v23 }
 0x2e8   : >> { %v1999_v50 = vrot.slane %v4172_v28, 6  ;;  %v2081_v56 = vmul.f32 %v4129_v53, %v2068_v34  ;;  %v1940_v59 = vsel %vm1937_vm4, %v1938_v24, %v1939_v41  ;;  %v2013_v60 = vrot.slane %v4199_v42, 2 }
 0x2e9   : >> { %v1983_v55 = vadd.f32 %v1979_v7, %v1975_v37  ;;  %v2071_v63 = vsel %vm1950_vm5, %v2069_v35, %v2070_v36  ;;  %v1955_v1 = vsel %vm1950_vm5, %v1952_v27, %v1954_v43  ;;  %v1964_v62 = vmul.f32 %v4099_v46, %v1940_v59 }
 0x2ea   : >> { %v2000_v3 = vsel %vm1937_vm4, %v1998_v32, %v1999_v50  ;;  %v2089_v12 = vmul.f32 %v4134_v54, %v3217_v29  ;;  %v1980_v2 = vmul.f32 %v4109_v47, %v1955_v1  ;;  %v2014_v61 = vsel %vm1950_vm5, %v2011_v4, %v2013_v60 }
 0x2eb   : >> { %v2026_v11 = vadd.f32 %v2022_v38, %v1983_v55  ;;  %v1976_v14 = vadd.f32 %v1972_v45, %v1964_v62  ;;  %v2023_v15 = vmul.f32 %v4114_v49, %v2000_v3  ;;  %v2058_v16 = vrot.slane %v4184_v10, 6 }
 0x2ec   : >> { %v2072_v18 = vrot.slane %v4213_v13, 2  ;;  %v2097_v20 = vmul.f32 %v4141_v58, %v2071_v63  ;;  %v1941_v21 = vrot.slane %v4191_v40, 6  ;;  %v1956_v22 = vrot.slane %v1932_v57, 2 }
 0x2ed   : >> { %v2034_v19 = vadd.f32 %v2030_v39, %v2026_v11  ;;  %v1984_v26 = vadd.f32 %v1980_v2, %v1976_v14  ;;  %v2031_v23 = vmul.f32 %v4119_v30, %v4172_v28  ;;  %v2059_v17 = vsel %vm1937_vm4, %v2057_v6, %v2058_v16 }
 0x2ee   : >> { %v1973_v24 = vmul.f32 %v4104_v48, %v4191_v40  ;;  %v2039_v27 = vmul.f32 %v4124_v51, %v2014_v61  ;;  %v2073_v29 = vsel %vm1950_vm5, %v2070_v36, %v2072_v18  ;;  %v1942_v31 = vsel %vm1937_vm4, %v1939_v41, %v1941_v21 }
 0x2ef   : >> { %v2042_v25 = vadd.f32 %v2038_v44, %v2034_v19  ;;  %v2027_v32 = vadd.f32 %v2023_v15, %v1984_v26  ;;  %v1957_v33 = vsel %vm1950_vm5, %v1954_v43, %v1956_v22  ;;  %v1965_v4 = vmul.f32 %v4099_v46, %v1942_v31  ;;  %v3220_v43 = vld [vmem:[%s4163_s20 + $0x58] sm:$0xff] }
 0x2f0   : >> { %v2001_v28 = vrot.slane %v4199_v42, 6  ;;  %v2082_v6 = vmul.f32 %v4129_v53, %v2059_v17  ;;  %v1981_v0 = vmul.f32 %v4109_v47, %v1957_v33  ;;  %v2015_v7 = vrot.slane %v3214_v5, 2 }
 0x2f1   : >> { %v2085_v52 = vadd.f32 %v2081_v56, %v2042_v25  ;;  %v2035_v8 = vadd.f32 %v2031_v23, %v2027_v32  ;;  %v1977_v9 = vadd.f32 %v1973_v24, %v1965_v4  ;;  %v2060_v35 = vrot.slane %v4213_v13, 6 }
 0x2f2   : >> { %v2002_v34 = vsel %vm1937_vm4, %v1999_v50, %v2001_v28  ;;  %v2016_v37 = vsel %vm1950_vm5, %v2013_v60, %v2015_v7  ;;  %v2090_v40 = vmul.f32 %v4134_v54, %v4184_v10  ;;  %v2032_v44 = vmul.f32 %v4119_v30, %v4199_v42 }
 0x2f3   : >> { %v2093_v36 = vadd.f32 %v2089_v12, %v2085_v52  ;;  %v2024_v38 = vmul.f32 %v4114_v49, %v2002_v34  ;;  %v2043_v39 = vadd.f32 %v2039_v27, %v2035_v8  ;;  %v1985_v41 = vadd.f32 %v1981_v0, %v1977_v9  ;;  %v3388_v9 = vld [vmem:[%s4469_s7 + $0x18] sm:$0xff] (%p1922_p6)  ;;  %v3387_v34 = vld [vmem:[%s4469_s7 + $0x10] sm:$0xff] (%p1922_p6) }
 0x2f4   : >> { %v2098_v55 = vmul.f32 %v4141_v58, %v2073_v29  ;;  %v2061_v50 = vsel %vm1937_vm4, %v2058_v16, %v2060_v35  ;;  %v2074_v56 = vrot.slane %v3220_v43, 2  ;;  %v2040_v60 = vmul.f32 %v4124_v51, %v2016_v37  ;;  %2199 = vmatpush.bf16.msra.mxu2 (%p1922_p6), %v3388_v9 }
 0x2f5   : >> { %v2101_v45 = vadd.f32 %v2097_v20, %v2093_v36  ;;  %v2086_v59 = vadd.f32 %v2082_v6, %v2043_v39  ;;  %v2028_v63 = vadd.f32 %v2024_v38, %v1985_v41  ;;  %v1943_v1 = vrot.slane %v1932_v57, 6  ;;  %v3385_v36 = vld [vmem:[%s4469_s7] sm:$0xff] (%p1922_p6)  ;;  %v3394_v39 = vld [vmem:[%s4469_s7 + $0x8] sm:$0xff] (%p1922_p6) }
 0x2f6   : >> { %v1962_v10 = vsel %vm1950_vm5, %v1956_v22, 0.0  ;;  %v1974_v42 = vmul.f32 %v4104_v48, %v1932_v57  ;;  %v2003_v62 = vrot.slane %v3214_v5, 6  ;;  %v2083_v12 = vmul.f32 %v4129_v53, %v2061_v50  ;;  %v3396_v48 = vld [vmem:[%s4469_s7 + $0x18] sm:$0xff] (%p1922_p6)  ;;  %v3393_v50 = vld [vmem:[%s4469_s7] sm:$0xff] (%p1922_p6) }
 0x2f7   : >> { %2107 = vst.msk [vmem:[%s4248_s22] sm:$0xff] %vm388_vm0, %v2101_v45  ;;  %v2094_v3 = vadd.f32 %v2090_v40, %v2086_v59  ;;  %v2036_v11 = vadd.f32 %v2032_v44, %v2028_v63  ;;  %v1944_v2 = vsel %vm1937_vm4, %v1941_v21, %v1943_v1  ;;  %v2075_v61 = vsel %vm1950_vm5, %v2072_v18, %v2074_v56 }
 0x2f8   : >> { %v1966_v14 = vmul.f32 %v4099_v46, %v1944_v2  ;;  %v1982_v15 = vmul.f32 %v4109_v47, %v1962_v10  ;;  %v2004_v16 = vsel %vm1937_vm4, %v2001_v28, %v2003_v62  ;;  %v2091_v57 = vmul.f32 %v4134_v54, %v4213_v13  ;;  %2200 = vmatpush.bf16.msra.mxu2 (%p1922_p6), %v3387_v34  ;;  %v3391_v62 = vld [vmem:[%s4471_s9 + $0x10] sm:$0xff] (%p1922_p6) }
 0x2f9   : >> { %v2102_v19 = vadd.f32 %v2098_v55, %v2094_v3  ;;  %v2044_v20 = vadd.f32 %v2040_v60, %v2036_v11  ;;  %v2062_v22 = vrot.slane %v3220_v43, 6  ;;  %v2025_v23 = vmul.f32 %v4114_v49, %v2004_v16  ;;  %v3395_v49 = vld [vmem:[%s4469_s7 + $0x10] sm:$0xff] (%p1922_p6) }
 0x2fa   : >> { %v1978_v26 = vadd.f32 %v1974_v42, %v1966_v14  ;;  %v2099_v18 = vmul.f32 %v4141_v58, %v2075_v61  ;;  %v2021_v17 = vsel %vm1950_vm5, %v2015_v7, 0.0  ;;  %v2033_v25 = vmul.f32 %v4119_v30, %v3214_v5  ;;  %v3392_v42 = vld [vmem:[%s4471_s9 + $0x18] sm:$0xff] (%p1922_p6)  ;;  %v3389_v61 = vld [vmem:[%s4471_s9] sm:$0xff] (%p1922_p6) }
 0x2fb   : >> { %2108 = vst.msk [vmem:[%s4248_s22 + $0x8] sm:$0xff] %vm388_vm0, %v2102_v19  ;;  %v2087_v21 = vadd.f32 %v2083_v12, %v2044_v20  ;;  %v2063_v29 = vsel %vm1937_vm4, %v2060_v35, %v2062_v22  ;;  %v2041_v31 = vmul.f32 %v4124_v51, %v2021_v17  ;;  %v2080_v28 = vsel %vm1950_vm5, %v2074_v56, 0.0  ;;  %v3386_v35 = vld [vmem:[%s4469_s7 + $0x8] sm:$0xff] (%p1922_p6)  ;;  %2332 = vmatpush.bf16.msra.mxu3 (%p1922_p6), %v3392_v42  ;;  %v3400_v14 = vld [vmem:[%s4471_s9 + $0x18] sm:$0xff] (%p1922_p6)  ;;  %v3397_v42 = vld [vmem:[%s4471_s9] sm:$0xff] (%p1922_p6) }
 0x2fc   : >> { %v1986_v24 = vadd.f32 %v1982_v15, %v1978_v26  ;;  %v2084_v4 = vmul.f32 %v4129_v53, %v2063_v29  ;;  %v2092_v6 = vmul.f32 %v4134_v54, %v3220_v43  ;;  %v2100_v5 = vmul.f32 %v4141_v58, %v2080_v28  ;;  %2201 = vmatpush.bf16.msra.mxu2 (%p1922_p6), %v3386_v35  ;;  %v3390_v12 = vld [vmem:[%s4471_s9 + $0x8] sm:$0xff] (%p1922_p6)  ;;  %v3399_v29 = vld [vmem:[%s4471_s9 + $0x10] sm:$0xff] (%p1922_p6) }
 0x2fd   : >> { %v2095_v27 = vadd.f32 %v2091_v57, %v2087_v21  ;;  %v4332_v57 = vld [vmem:[%s4470_s8] ss:$0 sm:$0xff] (%p1922_p6) }
 0x2fe   : >> { %v2029_v13 = vadd.f32 %v2025_v23, %v1986_v24 }
 0x2ff   : >> { %v2103_v32 = vadd.f32 %v2099_v18, %v2095_v27  ;;  %2333 = vmatpush.bf16.msra.mxu3 (%p1922_p6), %v3391_v62 }
 0x300   : >> { %v2037_v33 = vadd.f32 %v2033_v25, %v2029_v13  ;;  %2202 = vmatpush.bf16.msra.mxu2 (%p1922_p6), %v3385_v36 }
 0x301   : >> { %2109 = vst.msk [vmem:[%s4248_s22 + $0x10] sm:$0xff] %vm388_vm0, %v2103_v32 }
 0x302   : >> { %v2045_v52 = vadd.f32 %v2041_v31, %v2037_v33 }
 0x303   : > { %2334 = vmatpush.bf16.msra.mxu3 (%p1922_p6), %v3390_v12 }
 0x304   : >> { %v2088_v0 = vadd.f32 %v2084_v4, %v2045_v52  ;;  %2497 = vmatpush.bf16.msrb.mxu2 (%p1922_p6), %v3396_v48 }
 0x306   : >> { %v2096_v7 = vadd.f32 %v2092_v6, %v2088_v0  ;;  %1924 = sbr.rel (!%p1922_p6) target bundleno = 731 (0x2db), region = 155 }
 0x307   : > { %2335 = vmatpush.bf16.msra.mxu3 (%p1922_p6), %v3389_v61 }
 0x308   : >> { %v2104_v8 = vadd.f32 %v2100_v5, %v2096_v7  ;;  %2498 = vmatpush.bf16.msrb.mxu2 (%p1922_p6), %v3395_v49  ;;  %v3398_v49 = vld [vmem:[%s4471_s9 + $0x8] sm:$0xff] (%p1922_p6) }
 0x30a   : >> { %2110 = vst.msk [vmem:[%s4248_s22 + $0x18] sm:$0xff] %vm388_vm0, %v2104_v8 }
 0x30b   : > { %2630 = vmatpush.bf16.msrb.mxu3 %v3400_v14 }
 0x30c   : > { %2499 = vmatpush.bf16.msrb.mxu2 %v3394_v39 }
 0x30f   : > { %2631 = vmatpush.bf16.msrb.mxu3 %v3399_v29 }
 0x310   : > { %2500 = vmatpush.bf16.msrb.mxu2 %v3393_v50 }
 0x311   : > { %v2111_v37 = vld [vmem:[#allocation5] sm:$0xff]  ;;  %v2112_v46 = vld [vmem:[#allocation5 + $0x8] sm:$0xff]  ;;  %v2113_v30 = vld [vmem:[#allocation5 + $0x10] sm:$0xff] }
 0x312   : > { %v2127_v47 = vpack.c.bf16 %v2112_v46, %v2111_v37  ;;  %v2114_v51 = vld [vmem:[#allocation5 + $0x18] sm:$0xff]  ;;  %v2115_v54 = vld [vmem:[#allocation5 + $0x20] sm:$0xff]  ;;  %v2116_v58 = vld [vmem:[#allocation5 + $0x28] sm:$0xff] }
 0x313   : > { %v2128_v53 = vpack.c.bf16 %v2114_v51, %v2113_v30  ;;  %v2129_v38 = vpack.c.bf16 %v2116_v58, %v2115_v54  ;;  %v2117_v40 = vld [vmem:[#allocation5 + $0x30] sm:$0xff]  ;;  %v2118_v41 = vld [vmem:[#allocation5 + $0x38] sm:$0xff]  ;;  %v2119_v43 = vld [vmem:[#allocation5 + $0x40] sm:$0xff]  ;;  %2632 = vmatpush.bf16.msrb.mxu3 %v3398_v49 }
 0x314   : > { %3238 = vmatmul.msk.bf16.vlgmr.msra.gmra.mxu2 %vm388_vm0, %v2127_v47  ;;  %v2130_v44 = vpack.c.bf16 %v2118_v41, %v2117_v40  ;;  %v2120_v45 = vld [vmem:[#allocation5 + $0x48] sm:$0xff]  ;;  %v2121_v56 = vld [vmem:[#allocation5 + $0x50] sm:$0xff]  ;;  %v2122_v59 = vld [vmem:[#allocation5 + $0x58] sm:$0xff] }
 0x315   : > { %v2131_v55 = vpack.c.bf16 %v2120_v45, %v2119_v43  ;;  %v2132_v63 = vpack.c.bf16 %v2122_v59, %v2121_v56  ;;  %v2123_v60 = vld [vmem:[#allocation5 + $0x60] sm:$0xff]  ;;  %v2124_v1 = vld [vmem:[#allocation5 + $0x68] sm:$0xff]  ;;  %v2125_v3 = vld [vmem:[#allocation5 + $0x70] sm:$0xff] }
 0x316   : > { %v2133_v10 = vpack.c.bf16 %v2124_v1, %v2123_v60  ;;  %v2126_v11 = vld [vmem:[#allocation5 + $0x78] sm:$0xff]  ;;  %v2409_v15 = vld [vmem:[#allocation5 + $0x80] sm:$0xff]  ;;  %v2410_v16 = vld [vmem:[#allocation5 + $0x88] sm:$0xff] }
 0x317   : > { %v2134_v2 = vpack.c.bf16 %v2126_v11, %v2125_v3  ;;  %v2425_v19 = vpack.c.bf16 %v2410_v16, %v2409_v15  ;;  %v2411_v22 = vld [vmem:[#allocation5 + $0x90] sm:$0xff]  ;;  %v2412_v26 = vld [vmem:[#allocation5 + $0x98] sm:$0xff]  ;;  %v2413_v31 = vld [vmem:[#allocation5 + $0xa0] sm:$0xff]  ;;  %2633 = vmatpush.bf16.msrb.mxu3 %v3397_v42 }
 0x318   : > { %v2426_v17 = vpack.c.bf16 %v2412_v26, %v2411_v22  ;;  %v2414_v32 = vld [vmem:[#allocation5 + $0xa8] sm:$0xff]  ;;  %v2415_v8 = vld [vmem:[#allocation5 + $0xb0] sm:$0xff]  ;;  %v2416_v9 = vld [vmem:[#allocation5 + $0xb8] sm:$0xff] }
 0x319   : > { %v2427_v52 = vpack.c.bf16 %v2414_v32, %v2413_v31  ;;  %v2428_v37 = vpack.c.bf16 %v2416_v9, %v2415_v8  ;;  %v2417_v51 = vld [vmem:[#allocation5 + $0xc0] sm:$0xff]  ;;  %v2419_v45 = vld [vmem:[#allocation5 + $0xd0] sm:$0xff]  ;;  %v2422_v11 = vld [vmem:[#allocation5 + $0xe8] sm:$0xff] }
 0x31a   : > { %v2421_v3 = vld [vmem:[#allocation5 + $0xe0] sm:$0xff]  ;;  %v2423_v22 = vld [vmem:[#allocation5 + $0xf0] sm:$0xff]  ;;  %v2424_v26 = vld [vmem:[#allocation5 + $0xf8] sm:$0xff] }
 0x31b   : > { %v2431_v14 = vpack.c.bf16 %v2422_v11, %v2421_v3 }
 0x324   : > { %3239 = vmatmul.msk.bf16.gmra.mxu2 %vm388_vm0, %v2128_v53  ;;  %v2418_v53 = vld [vmem:[#allocation5 + $0xc8] sm:$0xff] }
 0x325   : > { %v2429_v39 = vpack.c.bf16 %v2418_v53, %v2417_v51 }
 0x334   : > { %3240 = vmatmul.msk.bf16.gmra.mxu2 %vm388_vm0, %v2129_v38 }
 0x344   : > { %3241 = vmatmul.msk.bf16.gmra.mxu2 %vm388_vm0, %v2130_v44 }
 0x354   : > { %3242 = vmatmul.msk.bf16.gmra.mxu2 %vm388_vm0, %v2131_v55  ;;  %v2420_v55 = vld [vmem:[#allocation5 + $0xd8] sm:$0xff] }
 0x364   : > { %3243 = vmatmul.msk.bf16.gmra.mxu2 %vm388_vm0, %v2132_v63  ;;  %v2430_v63 = vpack.c.bf16 %v2420_v55, %v2419_v45 }
 0x374   : > { %3244 = vmatmul.msk.bf16.gmra.mxu2 %vm388_vm0, %v2133_v10 }
 0x384   : > { %3245 = vmatmul.msk.bf16.gmra.mxu2 %vm388_vm0, %v2134_v2 }
 0x394   : > { %3286 = vmatmul.msk.bf16.vlgmr.msrb.gmra.mxu2 %vm388_vm0, %v2425_v19 }
 0x397   : > { %v2204_v20 = vpop.f32.mrf.mxu2 }
 0x398   : > { %v2205_v23 = vadd.f32 %v4332_v57, %v2204_v20 }
 0x39a   : > { %v2244_v24 = vmax.f32 %v2205_v23, 0.0 }
 0x39f   : > { %v2206_v21 = vpop.f32.mrf.mxu2 }
 0x3a0   : > { %v2207_v18 = vadd.f32 %v4332_v57, %v2206_v21 }
 0x3a2   : > { %v2245_v25 = vmax.f32 %v2207_v18, 0.0 }
 0x3a4   : > { %3287 = vmatmul.msk.bf16.gmra.mxu2 %vm388_vm0, %v2426_v17  ;;  %v2260_v27 = vpack.c.bf16 %v2245_v25, %v2244_v24  ;;  %v2432_v17 = vpack.c.bf16 %v2424_v26, %v2423_v22 }
 0x3a6   : > { %3262 = vmatmul.msk.bf16.vlgmr.msra.gmra.mxu3 %vm388_vm0, %v2260_v27 }
 0x3a7   : > { %v2209_v13 = vpop.f32.mrf.mxu2 }
 0x3a8   : > { %v2210_v33 = vadd.f32 %v4332_v57, %v2209_v13 }
 0x3aa   : > { %v2246_v6 = vmax.f32 %v2210_v33, 0.0 }
 0x3af   : > { %v2211_v4 = vpop.f32.mrf.mxu2 }
 0x3b0   : > { %v2212_v28 = vadd.f32 %v4332_v57, %v2211_v4 }
 0x3b2   : > { %v2247_v0 = vmax.f32 %v2212_v28, 0.0 }
 0x3b4   : > { %3288 = vmatmul.msk.bf16.gmra.mxu2 %vm388_vm0, %v2427_v52  ;;  %v2261_v5 = vpack.c.bf16 %v2247_v0, %v2246_v6  ;;  %v4377_v6 = vld [vmem:[%s4470_s8] ss:$0 sm:$0xff] }
 0x3b6   : > { %3263 = vmatmul.msk.bf16.gmra.mxu3 %vm388_vm0, %v2261_v5 }
 0x3b7   : > { %v2214_v7 = vpop.f32.mrf.mxu2 }
 0x3b8   : > { %v2215_v34 = vadd.f32 %v4332_v57, %v2214_v7 }
 0x3ba   : > { %v2248_v46 = vmax.f32 %v2215_v34, 0.0  ;;  %v4385_v34 = vld [vmem:[%s4472_s10] ss:$0 sm:$0xff] }
 0x3bf   : > { %v2216_v35 = vpop.f32.mrf.mxu2 }
 0x3c0   : > { %v2217_v36 = vadd.f32 %v4332_v57, %v2216_v35 }
 0x3c2   : > { %v2249_v48 = vmax.f32 %v2217_v36, 0.0 }
 0x3c4   : > { %3289 = vmatmul.msk.bf16.gmra.mxu2 %vm388_vm0, %v2428_v37  ;;  %v2262_v47 = vpack.c.bf16 %v2249_v48, %v2248_v46 }
 0x3c6   : > { %3264 = vmatmul.msk.bf16.gmra.mxu3 %vm388_vm0, %v2262_v47 }
 0x3c7   : > { %v2219_v30 = vpop.f32.mrf.mxu2 }
 0x3c8   : > { %v2220_v54 = vadd.f32 %v4332_v57, %v2219_v30 }
 0x3ca   : > { %v2250_v40 = vmax.f32 %v2220_v54, 0.0 }
 0x3cf   : > { %v2221_v58 = vpop.f32.mrf.mxu2 }
 0x3d0   : > { %v2222_v38 = vadd.f32 %v4332_v57, %v2221_v58 }
 0x3d2   : > { %v2251_v41 = vmax.f32 %v2222_v38, 0.0 }
 0x3d4   : > { %3290 = vmatmul.msk.bf16.gmra.mxu2 %vm388_vm0, %v2429_v39  ;;  %v2263_v44 = vpack.c.bf16 %v2251_v41, %v2250_v40 }
 0x3d6   : > { %3265 = vmatmul.msk.bf16.gmra.mxu3 %vm388_vm0, %v2263_v44 }
 0x3d7   : > { %v2224_v43 = vpop.f32.mrf.mxu2 }
 0x3d8   : > { %v2225_v50 = vadd.f32 %v4332_v57, %v2224_v43 }
 0x3da   : > { %v2252_v60 = vmax.f32 %v2225_v50, 0.0 }
 0x3df   : > { %v2226_v56 = vpop.f32.mrf.mxu2 }
 0x3e0   : > { %v2227_v59 = vadd.f32 %v4332_v57, %v2226_v56 }
 0x3e2   : > { %v2253_v1 = vmax.f32 %v2227_v59, 0.0 }
 0x3e4   : > { %3291 = vmatmul.msk.bf16.gmra.mxu2 %vm388_vm0, %v2430_v63  ;;  %v2264_v10 = vpack.c.bf16 %v2253_v1, %v2252_v60 }
 0x3e6   : > { %3266 = vmatmul.msk.bf16.gmra.mxu3 %vm388_vm0, %v2264_v10 }
 0x3e7   : > { %v2229_v62 = vpop.f32.mrf.mxu2 }
 0x3e8   : > { %v2230_v12 = vadd.f32 %v4332_v57, %v2229_v62 }
 0x3ea   : > { %v2254_v15 = vmax.f32 %v2230_v12, 0.0 }
 0x3ef   : > { %v2231_v2 = vpop.f32.mrf.mxu2 }
 0x3f0   : > { %v2232_v61 = vadd.f32 %v4332_v57, %v2231_v2 }
 0x3f2   : > { %v2255_v16 = vmax.f32 %v2232_v61, 0.0 }
 0x3f4   : > { %3292 = vmatmul.msk.bf16.gmra.mxu2 %vm388_vm0, %v2431_v14  ;;  %v2265_v19 = vpack.c.bf16 %v2255_v16, %v2254_v15 }
 0x3f6   : > { %3267 = vmatmul.msk.bf16.gmra.mxu3 %vm388_vm0, %v2265_v19 }
 0x3f7   : > { %v2234_v20 = vpop.f32.mrf.mxu2 }
 0x3f8   : > { %v2235_v23 = vadd.f32 %v4332_v57, %v2234_v20 }
 0x3fa   : > { %v2256_v24 = vmax.f32 %v2235_v23, 0.0 }
 0x3ff   : > { %v2236_v21 = vpop.f32.mrf.mxu2 }
 0x400   : > { %v2237_v18 = vadd.f32 %v4332_v57, %v2236_v21 }
 0x402   : > { %v2257_v25 = vmax.f32 %v2237_v18, 0.0 }
 0x404   : > { %3293 = vmatmul.msk.bf16.gmra.mxu2 %vm388_vm0, %v2432_v17  ;;  %v2266_v27 = vpack.c.bf16 %v2257_v25, %v2256_v24 }
 0x406   : > { %3268 = vmatmul.msk.bf16.gmra.mxu3 %vm388_vm0, %v2266_v27 }
 0x407   : > { %v2239_v29 = vpop.f32.mrf.mxu2 }
 0x408   : > { %v2240_v13 = vadd.f32 %v4332_v57, %v2239_v29 }
 0x40a   : > { %v2258_v33 = vmax.f32 %v2240_v13, 0.0 }
 0x40f   : > { %v2241_v31 = vpop.f32.mrf.mxu2 }
 0x410   : > { %v2242_v32 = vadd.f32 %v4332_v57, %v2241_v31 }
 0x412   : > { %v2259_v4 = vmax.f32 %v2242_v32, 0.0 }
 0x414   : > { %v2267_v28 = vpack.c.bf16 %v2259_v4, %v2258_v33 }
 0x416   : > { %3269 = vmatmul.msk.bf16.gmra.mxu3 %vm388_vm0, %v2267_v28 }
 0x417   : > { %v2502_v52 = vpop.f32.mrf.mxu2 }
 0x418   : > { %v2503_v0 = vadd.f32 %v4377_v6, %v2502_v52 }
 0x41a   : > { %v2542_v8 = vmax.f32 %v2503_v0, 0.0 }
 0x41f   : > { %v2504_v5 = vpop.f32.mrf.mxu2 }
 0x420   : > { %v2505_v7 = vadd.f32 %v4377_v6, %v2504_v5 }
 0x422   : > { %v2543_v9 = vmax.f32 %v2505_v7, 0.0 }
 0x424   : > { %v2558_v57 = vpack.c.bf16 %v2543_v9, %v2542_v8 }
 0x426   : > { %3310 = vmatmul.msk.bf16.vlgmr.msrb.gmra.mxu3 %vm388_vm0, %v2558_v57 }
 0x427   : > { %v2507_v35 = vpop.f32.mrf.mxu2 }
 0x428   : > { %v2508_v48 = vadd.f32 %v4377_v6, %v2507_v35 }
 0x429   : > { %v2337_v36 = vpop.f32.mrf.mxu3 }
 0x42a   : > { %v2338_v37 = vadd.f32 %v4385_v34, %v2337_v36  ;;  %v2544_v51 = vmax.f32 %v2508_v48, 0.0 }
 0x42c   : > { %v2377_v46 = vmax.f32 %v2338_v37, 0.0 }
 0x42e   : > { %2393 = vst [vmem:[%s3572_s25] sm:$0xff] %v2377_v46 }
 0x42f   : > { %v2509_v47 = vpop.f32.mrf.mxu2 }
 0x430   : > { %v2510_v49 = vadd.f32 %v4377_v6, %v2509_v47 }
 0x431   : > { %v2339_v30 = vpop.f32.mrf.mxu3 }
 0x432   : > { %v2545_v53 = vmax.f32 %v2510_v49, 0.0  ;;  %v2340_v54 = vadd.f32 %v4385_v34, %v2339_v30 }
 0x434   : > { %v2378_v58 = vmax.f32 %v2340_v54, 0.0  ;;  %v2559_v38 = vpack.c.bf16 %v2545_v53, %v2544_v51 }
 0x436   : > { %2394 = vst [vmem:[%s3572_s25 + $0x8] sm:$0xff] %v2378_v58  ;;  %3311 = vmatmul.msk.bf16.gmra.mxu3 %vm388_vm0, %v2559_v38 }
 0x437   : > { %v2512_v39 = vpop.f32.mrf.mxu2 }
 0x438   : > { %v2513_v43 = vadd.f32 %v4377_v6, %v2512_v39 }
 0x439   : > { %v2342_v40 = vpop.f32.mrf.mxu3 }
 0x43a   : > { %v2343_v41 = vadd.f32 %v4385_v34, %v2342_v40  ;;  %v2546_v56 = vmax.f32 %v2513_v43, 0.0 }
 0x43c   : > { %v2379_v44 = vmax.f32 %v2343_v41, 0.0 }
 0x43e   : > { %2395 = vst [vmem:[%s3572_s25 + $0x10] sm:$0xff] %v2379_v44 }
 0x43f   : > { %v2514_v45 = vpop.f32.mrf.mxu2 }
 0x440   : > { %v2515_v55 = vadd.f32 %v4377_v6, %v2514_v45 }
 0x441   : > { %v2344_v50 = vpop.f32.mrf.mxu3 }
 0x442   : > { %v2547_v59 = vmax.f32 %v2515_v55, 0.0  ;;  %v2345_v63 = vadd.f32 %v4385_v34, %v2344_v50 }
 0x444   : > { %v2380_v60 = vmax.f32 %v2345_v63, 0.0  ;;  %v2560_v1 = vpack.c.bf16 %v2547_v59, %v2546_v56 }
 0x446   : > { %2396 = vst [vmem:[%s3572_s25 + $0x18] sm:$0xff] %v2380_v60  ;;  %3312 = vmatmul.msk.bf16.gmra.mxu3 %vm388_vm0, %v2560_v1 }
 0x447   : > { %v2517_v10 = vpop.f32.mrf.mxu2 }
 0x448   : > { %v2518_v11 = vadd.f32 %v4377_v6, %v2517_v10 }
 0x449   : > { %v2347_v42 = vpop.f32.mrf.mxu3 }
 0x44a   : > { %v2348_v62 = vadd.f32 %v4385_v34, %v2347_v42  ;;  %v2548_v14 = vmax.f32 %v2518_v11, 0.0 }
 0x44c   : > { %v2381_v3 = vmax.f32 %v2348_v62, 0.0 }
 0x44e   : > { %2397 = vst [vmem:[%s3572_s25 + $0x20] sm:$0xff] %v2381_v3 }
 0x44f   : > { %v2519_v12 = vpop.f32.mrf.mxu2 }
 0x450   : > { %v2520_v2 = vadd.f32 %v4377_v6, %v2519_v12 }
 0x451   : > { %v2349_v61 = vpop.f32.mrf.mxu3 }
 0x452   : > { %v2549_v15 = vmax.f32 %v2520_v2, 0.0  ;;  %v2350_v16 = vadd.f32 %v4385_v34, %v2349_v61 }
 0x454   : > { %v2382_v19 = vmax.f32 %v2350_v16, 0.0  ;;  %v2561_v20 = vpack.c.bf16 %v2549_v15, %v2548_v14  ;;  %v3458_v14 = vld [vmem:[%s4472_s10] ss:$0 sm:$0xff] }
 0x456   : > { %2398 = vst [vmem:[%s3572_s25 + $0x28] sm:$0xff] %v2382_v19  ;;  %3313 = vmatmul.msk.bf16.gmra.mxu3 %vm388_vm0, %v2561_v20 }
 0x457   : > { %v2522_v22 = vpop.f32.mrf.mxu2 }
 0x458   : > { %v2523_v18 = vadd.f32 %v4377_v6, %v2522_v22 }
 0x459   : > { %v2352_v26 = vpop.f32.mrf.mxu3 }
 0x45a   : > { %v2353_v23 = vadd.f32 %v4385_v34, %v2352_v26  ;;  %v2550_v27 = vmax.f32 %v2523_v18, 0.0 }
 0x45c   : > { %v2383_v21 = vmax.f32 %v2353_v23, 0.0 }
 0x45e   : > { %2399 = vst [vmem:[%s3572_s25 + $0x30] sm:$0xff] %v2383_v21 }
 0x45f   : > { %v2524_v17 = vpop.f32.mrf.mxu2 }
 0x460   : > { %v2525_v24 = vadd.f32 %v4377_v6, %v2524_v17 }
 0x461   : > { %v2354_v25 = vpop.f32.mrf.mxu3 }
 0x462   : > { %v2551_v29 = vmax.f32 %v2525_v24, 0.0  ;;  %v2355_v13 = vadd.f32 %v4385_v34, %v2354_v25 }
 0x464   : > { %v2562_v31 = vpack.c.bf16 %v2551_v29, %v2550_v27  ;;  %v2384_v32 = vmax.f32 %v2355_v13, 0.0 }
 0x466   : > { %2400 = vst [vmem:[%s3572_s25 + $0x38] sm:$0xff] %v2384_v32  ;;  %3314 = vmatmul.msk.bf16.gmra.mxu3 %vm388_vm0, %v2562_v31 }
 0x467   : > { %v2527_v33 = vpop.f32.mrf.mxu2 }
 0x468   : > { %v2528_v0 = vadd.f32 %v4377_v6, %v2527_v33 }
 0x469   : > { %v2357_v4 = vpop.f32.mrf.mxu3 }
 0x46a   : > { %v2358_v28 = vadd.f32 %v4385_v34, %v2357_v4  ;;  %v2552_v9 = vmax.f32 %v2528_v0, 0.0 }
 0x46c   : > { %v2385_v52 = vmax.f32 %v2358_v28, 0.0 }
 0x46e   : > { %2401 = vst [vmem:[%s3572_s25 + $0x40] sm:$0xff] %v2385_v52 }
 0x46f   : > { %v2529_v5 = vpop.f32.mrf.mxu2 }
 0x470   : > { %v2530_v7 = vadd.f32 %v4377_v6, %v2529_v5 }
 0x471   : > { %v2359_v8 = vpop.f32.mrf.mxu3 }
 0x472   : > { %v2553_v57 = vmax.f32 %v2530_v7, 0.0  ;;  %v2360_v35 = vadd.f32 %v4385_v34, %v2359_v8 }
 0x474   : > { %v2563_v36 = vpack.c.bf16 %v2553_v57, %v2552_v9  ;;  %v2386_v37 = vmax.f32 %v2360_v35, 0.0 }
 0x476   : > { %2402 = vst [vmem:[%s3572_s25 + $0x48] sm:$0xff] %v2386_v37  ;;  %3315 = vmatmul.msk.bf16.gmra.mxu3 %vm388_vm0, %v2563_v36 }
 0x477   : > { %v2532_v46 = vpop.f32.mrf.mxu2 }
 0x478   : > { %v2533_v30 = vadd.f32 %v4377_v6, %v2532_v46 }
 0x479   : > { %v2362_v48 = vpop.f32.mrf.mxu3 }
 0x47a   : > { %v2363_v47 = vadd.f32 %v4385_v34, %v2362_v48  ;;  %v2554_v58 = vmax.f32 %v2533_v30, 0.0 }
 0x47c   : > { %v2387_v49 = vmax.f32 %v2363_v47, 0.0 }
 0x47e   : > { %2403 = vst [vmem:[%s3572_s25 + $0x50] sm:$0xff] %v2387_v49 }
 0x47f   : > { %v2534_v51 = vpop.f32.mrf.mxu2 }
 0x480   : > { %v2535_v53 = vadd.f32 %v4377_v6, %v2534_v51 }
 0x481   : > { %v2364_v54 = vpop.f32.mrf.mxu3 }
 0x482   : > { %v2555_v38 = vmax.f32 %v2535_v53, 0.0  ;;  %v2365_v39 = vadd.f32 %v4385_v34, %v2364_v54 }
 0x484   : > { %v2564_v40 = vpack.c.bf16 %v2555_v38, %v2554_v58  ;;  %v2388_v41 = vmax.f32 %v2365_v39, 0.0 }
 0x486   : > { %2404 = vst [vmem:[%s3572_s25 + $0x58] sm:$0xff] %v2388_v41  ;;  %3316 = vmatmul.msk.bf16.gmra.mxu3 %vm388_vm0, %v2564_v40 }
 0x487   : > { %v2537_v44 = vpop.f32.mrf.mxu2 }
 0x488   : > { %v2538_v50 = vadd.f32 %v4377_v6, %v2537_v44 }
 0x489   : > { %v2367_v43 = vpop.f32.mrf.mxu3 }
 0x48a   : > { %v2368_v45 = vadd.f32 %v4385_v34, %v2367_v43  ;;  %v2556_v60 = vmax.f32 %v2538_v50, 0.0 }
 0x48c   : > { %v2389_v55 = vmax.f32 %v2368_v45, 0.0 }
 0x48e   : > { %2405 = vst [vmem:[%s3572_s25 + $0x60] sm:$0xff] %v2389_v55 }
 0x48f   : > { %v2539_v56 = vpop.f32.mrf.mxu2 }
 0x490   : > { %v2540_v59 = vadd.f32 %v4377_v6, %v2539_v56 }
 0x491   : > { %v2369_v63 = vpop.f32.mrf.mxu3 }
 0x492   : > { %v2557_v1 = vmax.f32 %v2540_v59, 0.0  ;;  %v2370_v10 = vadd.f32 %v4385_v34, %v2369_v63 }
 0x494   : > { %v2565_v42 = vpack.c.bf16 %v2557_v1, %v2556_v60  ;;  %v2390_v62 = vmax.f32 %v2370_v10, 0.0 }
 0x496   : > { %2406 = vst [vmem:[%s3572_s25 + $0x68] sm:$0xff] %v2390_v62  ;;  %3317 = vmatmul.msk.bf16.gmra.mxu3 %vm388_vm0, %v2565_v42 }
 0x499   : > { %v2372_v3 = vpop.f32.mrf.mxu3 }
 0x49a   : > { %v2373_v11 = vadd.f32 %v4385_v34, %v2372_v3 }
 0x49c   : > { %v2391_v12 = vmax.f32 %v2373_v11, 0.0 }
 0x49e   : > { %2407 = vst [vmem:[%s3572_s25 + $0x70] sm:$0xff] %v2391_v12 }
 0x4a1   : > { %v2374_v2 = vpop.f32.mrf.mxu3 }
 0x4a2   : > { %v2375_v6 = vadd.f32 %v4385_v34, %v2374_v2 }
 0x4a4   : > { %v2392_v61 = vmax.f32 %v2375_v6, 0.0 }
 0x4a6   : > { %2408 = vst [vmem:[%s3572_s25 + $0x78] sm:$0xff] %v2392_v61 }
 0x4a9   : > { %v2635_v15 = vpop.f32.mrf.mxu3 }
 0x4aa   : > { %v2636_v16 = vadd.f32 %v3458_v14, %v2635_v15 }
 0x4ac   : > { %v2675_v19 = vmax.f32 %v2636_v16, 0.0 }
 0x4ae   : > { %2691 = vst [vmem:[%s3572_s25 + $0x80] sm:$0xff] %v2675_v19 }
 0x4b1   : > { %v2637_v20 = vpop.f32.mrf.mxu3 }
 0x4b2   : > { %v2638_v22 = vadd.f32 %v3458_v14, %v2637_v20 }
 0x4b4   : > { %v2676_v26 = vmax.f32 %v2638_v22, 0.0 }
 0x4b6   : > { %2692 = vst [vmem:[%s3572_s25 + $0x88] sm:$0xff] %v2676_v26 }
 0x4b9   : > { %v2640_v23 = vpop.f32.mrf.mxu3 }
 0x4ba   : > { %v2641_v21 = vadd.f32 %v3458_v14, %v2640_v23 }
 0x4bc   : > { %v2677_v34 = vmax.f32 %v2641_v21, 0.0 }
 0x4be   : > { %2693 = vst [vmem:[%s3572_s25 + $0x90] sm:$0xff] %v2677_v34 }
 0x4c1   : > { %v2642_v18 = vpop.f32.mrf.mxu3 }
 0x4c2   : > { %v2643_v17 = vadd.f32 %v3458_v14, %v2642_v18 }
 0x4c4   : > { %v2678_v24 = vmax.f32 %v2643_v17, 0.0 }
 0x4c6   : > { %2694 = vst [vmem:[%s3572_s25 + $0x98] sm:$0xff] %v2678_v24 }
 0x4c9   : > { %v2645_v25 = vpop.f32.mrf.mxu3 }
 0x4ca   : > { %v2646_v27 = vadd.f32 %v3458_v14, %v2645_v25 }
 0x4cc   : > { %v2679_v29 = vmax.f32 %v2646_v27, 0.0 }
 0x4ce   : > { %2695 = vst [vmem:[%s3572_s25 + $0xa0] sm:$0xff] %v2679_v29 }
 0x4d1   : > { %v2647_v13 = vpop.f32.mrf.mxu3 }
 0x4d2   : > { %v2648_v31 = vadd.f32 %v3458_v14, %v2647_v13 }
 0x4d4   : > { %v2680_v32 = vmax.f32 %v2648_v31, 0.0 }
 0x4d6   : > { %2696 = vst [vmem:[%s3572_s25 + $0xa8] sm:$0xff] %v2680_v32 }
 0x4d9   : > { %v2650_v33 = vpop.f32.mrf.mxu3 }
 0x4da   : > { %v2651_v4 = vadd.f32 %v3458_v14, %v2650_v33 }
 0x4dc   : > { %v2681_v28 = vmax.f32 %v2651_v4, 0.0 }
 0x4de   : > { %2697 = vst [vmem:[%s3572_s25 + $0xb0] sm:$0xff] %v2681_v28 }
 0x4e1   : > { %v2652_v52 = vpop.f32.mrf.mxu3 }
 0x4e2   : > { %v2653_v0 = vadd.f32 %v3458_v14, %v2652_v52 }
 0x4e4   : > { %v2682_v5 = vmax.f32 %v2653_v0, 0.0 }
 0x4e6   : > { %2698 = vst [vmem:[%s3572_s25 + $0xb8] sm:$0xff] %v2682_v5 }
 0x4e9   : > { %v2655_v7 = vpop.f32.mrf.mxu3 }
 0x4ea   : > { %v2656_v8 = vadd.f32 %v3458_v14, %v2655_v7 }
 0x4ec   : > { %v2683_v9 = vmax.f32 %v2656_v8, 0.0 }
 0x4ee   : > { %2699 = vst [vmem:[%s3572_s25 + $0xc0] sm:$0xff] %v2683_v9 }
 0x4f1   : > { %v2657_v57 = vpop.f32.mrf.mxu3 }
 0x4f2   : > { %v2658_v35 = vadd.f32 %v3458_v14, %v2657_v57 }
 0x4f4   : > { %v2684_v36 = vmax.f32 %v2658_v35, 0.0 }
 0x4f6   : > { %2700 = vst [vmem:[%s3572_s25 + $0xc8] sm:$0xff] %v2684_v36 }
 0x4f9   : > { %v2660_v37 = vpop.f32.mrf.mxu3 }
 0x4fa   : > { %v2661_v46 = vadd.f32 %v3458_v14, %v2660_v37 }
 0x4fc   : > { %v2685_v48 = vmax.f32 %v2661_v46, 0.0 }
 0x4fe   : > { %2701 = vst [vmem:[%s3572_s25 + $0xd0] sm:$0xff] %v2685_v48 }
 0x501   : > { %v2662_v47 = vpop.f32.mrf.mxu3 }
 0x502   : > { %v2663_v49 = vadd.f32 %v3458_v14, %v2662_v47 }
 0x504   : > { %v2686_v30 = vmax.f32 %v2663_v49, 0.0 }
 0x506   : > { %2702 = vst [vmem:[%s3572_s25 + $0xd8] sm:$0xff] %v2686_v30 }
 0x509   : > { %v2665_v51 = vpop.f32.mrf.mxu3 }
 0x50a   : > { %v2666_v53 = vadd.f32 %v3458_v14, %v2665_v51 }
 0x50c   : > { %v2687_v54 = vmax.f32 %v2666_v53, 0.0 }
 0x50e   : > { %2703 = vst [vmem:[%s3572_s25 + $0xe0] sm:$0xff] %v2687_v54 }
 0x511   : > { %v2667_v58 = vpop.f32.mrf.mxu3 }
 0x512   : > { %v2668_v38 = vadd.f32 %v3458_v14, %v2667_v58 }
 0x514   : > { %v2688_v39 = vmax.f32 %v2668_v38, 0.0 }
 0x516   : > { %2704 = vst [vmem:[%s3572_s25 + $0xe8] sm:$0xff] %v2688_v39 }
 0x519   : > { %v2670_v40 = vpop.f32.mrf.mxu3 }
 0x51a   : > { %v2671_v41 = vadd.f32 %v3458_v14, %v2670_v40 }
 0x51c   : > { %v2689_v44 = vmax.f32 %v2671_v41, 0.0 }
 0x51e   : > { %2705 = vst [vmem:[%s3572_s25 + $0xf0] sm:$0xff] %v2689_v44 }
 0x521   : > { %v2672_v43 = vpop.f32.mrf.mxu3 }
 0x522   : > { %v2673_v45 = vadd.f32 %v3458_v14, %v2672_v43 }
 0x524   : > { %v2690_v55 = vmax.f32 %v2673_v45, 0.0 }
 0x526   : > { %2706 = vst [vmem:[%s3572_s25 + $0xf8] sm:$0xff] %v2690_v55 }
 0x527 PF: > { %s21_s17 = sadd.s32 1, %s3477_s17  }
 0x528   : > { %p18_p7 = scmp.ge.s32.totalorder %s21_s17, 4  }
 0x52a   :  { %20 = sbr.rel (!%p18_p7) target bundleno = 1 (0x1), region = 166 }

</bundles_post_ra>
